<compile_context>
chip_gen: v6e
topology: v6e:2x2x1
jax: 0.10.0
libtpu: 0.0.40
codegen_flags: <defaults>
</compile_context>

<pallas_src>
import functools
import math

import jax
import jax.numpy as jnp
import numpy as np
from jax import lax
from jax.experimental import pallas as pl
from jax.experimental.pallas import tpu as pltpu


def _round_up(x, m):
    return ((x + m - 1) // m) * m


# -----------------------------------------------------------------------------
# Fused kernel: all [TransformerConv -> LayerNorm] layers for one 128-row tile.
# Ref order: x, adj, then per layer (w, b, gamma, beta), then the output ref.
# -----------------------------------------------------------------------------
def fused_gtc_kernel(*refs, num_heads, hidden_dims):
    n_layers = len(hidden_dims)
    x_ref, adj_ref = refs[0], refs[1]
    o_ref = refs[-1]
    layer_refs = [refs[2 + 4 * l: 2 + 4 * l + 4] for l in range(n_layers)]

    rows = x_ref.shape[0]

    x = x_ref[...].astype(jnp.float32)          # (rows, Fin), resident across layers
    adj = adj_ref[...].astype(jnp.float32)      # (rows, rows) 0/1 mask (bf16 in HBM)

    # Additive softmax mask and in-degree guard: derived once per tile, reused
    # by every head of every layer (review #6, #8).
    neg_bias = (adj - 1.0) * 1e30               # exactly 0 on edges, -1e30 elsewhere
    has_edges = jnp.sum(adj, axis=-1, keepdims=True) > 0.0     # (rows, 1)

    for li, c in enumerate(hidden_dims):
        w_ref, b_ref, gamma_ref, beta_ref = layer_refs[li]
        hc = num_heads * c
        sec = _round_up(hc, 128)                # 128-lane aligned section width
        mm_dtype = w_ref.dtype                  # bf16 in production (review #2)

        # One fused lane-dense q|k|v|skip projection on the MXU, f32 accumulate.
        proj = jnp.dot(x.astype(mm_dtype), w_ref[...],
                       preferred_element_type=jnp.float32) + b_ref[...]
        # Section slices land on whole-vreg lane boundaries (review #3).
        q = proj[:, 0 * sec:1 * sec]
        k = proj[:, 1 * sec:2 * sec]
        v = proj[:, 2 * sec:3 * sec]
        skip = proj[:, 3 * sec:4 * sec]          # zero in columns hc..sec

        scale = 1.0 / math.sqrt(c)
        head_outs = []
        # TODO(synk): for num_heads >= 4 replace this unrolled per-head loop +
        # concat with one batched (H, rows, C) lax.dot_general (review #4); at
        # H=2 the (rows,H*C)->(H,rows,C) relayout costs more than the slices.
        for h in range(num_heads):
            sl = slice(h * c, (h + 1) * c)
            qh = q[:, sl].astype(mm_dtype)
            kh = k[:, sl].astype(mm_dtype)
            vh = v[:, sl].astype(mm_dtype)
            # scores[i, j] = q_i . k_j (contract last dims, no transpose); the
            # additive mask is applied in f32 AFTER the low-precision dot.
            scores = lax.dot_general(
                qh, kh, (((1,), (1,)), ((), ())),
                preferred_element_type=jnp.float32) * scale + neg_bias
            m = jnp.max(scores, axis=-1, keepdims=True)
            e = jnp.exp(scores - m)              # exact 0 off-edge (exp(-1e30))
            denom = jnp.sum(e, axis=-1, keepdims=True)   # always > 0
            attn = e / denom                     # exact divide (review #9)
            head_outs.append(
                jnp.dot(attn.astype(mm_dtype), vh,
                        preferred_element_type=jnp.float32))

        if sec > hc:
            head_outs = head_outs + [jnp.zeros((rows, sec - hc), jnp.float32)]
        heads = jnp.concatenate(head_outs, axis=-1)      # (rows, sec), lane-dense
        # Nodes with no incoming edge aggregate nothing (PyG semantics).
        heads = jnp.where(has_edges, heads, 0.0)
        out = heads + skip                               # pad columns stay exactly 0

        # LayerNorm over the hc REAL features, computed on the padded slab with
        # masked statistics; gamma/beta are zero-padded so pad columns remain 0
        # and the inter-layer activation / final store stay 128-lane dense.
        mean = jnp.sum(out, axis=-1, keepdims=True) * (1.0 / hc)
        centered = out - mean
        if sec > hc:
            col = lax.broadcasted_iota(jnp.int32, (rows, sec), 1)
            centered = centered * (col < hc).astype(jnp.float32)
        var = jnp.sum(centered * centered, axis=-1, keepdims=True) * (1.0 / hc)
        x = centered * lax.rsqrt(var + 1e-5) * gamma_ref[...] + beta_ref[...]

    # x is already (rows, sec_last) lane-dense with zeros in the pad columns:
    # unmasked full-vreg store, no in-kernel zero-concat (review #10).
    o_ref[...] = x.astype(o_ref.dtype)


# -----------------------------------------------------------------------------
# Wrapper: single fused pallas_call, 1-D parallel grid over 128-row tiles.
# Requires the stacked graphs to be block-diagonal with graph boundaries
# aligned to tile boundaries (each row tile only attends within itself).
# -----------------------------------------------------------------------------
def multilayer_gtc_forward(x, adj, packed_params, *, num_heads, hidden_dims,
                           tile_rows=128):
    rows, fin = x.shape
    assert rows % tile_rows == 0, "pad/stack graphs to a multiple of tile_rows"
    assert adj.shape == (rows, rows)

    hc_last = num_heads * hidden_dims[-1]
    out_pad = _round_up(hc_last, 128)

    flat, flat_specs = [], []
    for p in packed_params:
        for name in ("w", "b", "gamma", "beta"):
            arr = p[name]
            flat.append(arr)
            # Full-array block, same block every grid step (stays resident).
            flat_specs.append(pl.BlockSpec(arr.shape, lambda i: (0, 0)))

    kernel = functools.partial(fused_gtc_kernel, num_heads=num_heads,
                               hidden_dims=tuple(hidden_dims))

    out = pl.pallas_call(
        kernel,
        grid=(rows // tile_rows,),
        out_shape=jax.ShapeDtypeStruct((rows, out_pad), jnp.float32),
        in_specs=[pl.BlockSpec((tile_rows, fin), lambda i: (i, 0)),
                  # diagonal (tile, tile) block of the block-diagonal adjacency
                  pl.BlockSpec((tile_rows, tile_rows), lambda i: (i, i))]
                 + flat_specs,
        out_specs=pl.BlockSpec((tile_rows, out_pad), lambda i: (i, 0)),
        compiler_params=pltpu.CompilerParams(
            dimension_semantics=("parallel",)),   # v7x: 2 TCs; neutral on v5e/v6e
    )(x, adj, *flat)

    return out[:, :hc_last]


# -----------------------------------------------------------------------------
# Parameters: real PyTorch-shaped params + packing into the fused/padded layout.
# -----------------------------------------------------------------------------
def init_params(key, in_features, hidden_dims, num_heads):
    """PyG TransformerConv lin_{query,key,value,skip} (+bias) and LayerNorm."""
    params = []
    fin = in_features
    for hd in hidden_dims:
        hc = num_heads * hd
        key, *ks = jax.random.split(key, 9)
        params.append({
            "wq": 0.1 * jax.random.normal(ks[0], (fin, hc), jnp.float32),
            "wk": 0.1 * jax.random.normal(ks[1], (fin, hc), jnp.float32),
            "wv": 0.1 * jax.random.normal(ks[2], (fin, hc), jnp.float32),
            "ws": 0.1 * jax.random.normal(ks[3], (fin, hc), jnp.float32),
            "bq": 0.1 * jax.random.normal(ks[4], (hc,), jnp.float32),
            "bk": 0.1 * jax.random.normal(ks[5], (hc,), jnp.float32),
            "bv": 0.1 * jax.random.normal(ks[6], (hc,), jnp.float32),
            "bs": 0.1 * jax.random.normal(ks[7], (hc,), jnp.float32),
            "gamma": jnp.ones((hc,), jnp.float32),
            "beta": jnp.zeros((hc,), jnp.float32),
        })
        fin = hc
    return params


def pack_params(params, in_features, hidden_dims, num_heads,
                matmul_dtype=jnp.bfloat16):
    """Fuse q|k|v|skip into one lane-dense weight with 128-aligned, zero-padded
    sections (review #3) and zero-padded gamma/beta (review #10)."""
    packed = []
    fin_real, fin_pad = in_features, in_features      # layer-0 input unpadded
    for li, hd in enumerate(hidden_dims):
        hc = num_heads * hd
        sec = _round_up(hc, 128)
        p = params[li]
        w = np.zeros((fin_pad, 4 * sec), np.float32)
        b = np.zeros((1, 4 * sec), np.float32)
        for s, (wn, bn) in enumerate((("wq", "bq"), ("wk", "bk"),
                                      ("wv", "bv"), ("ws", "bs"))):
            w[:fin_real, s * sec:s * sec + hc] = np.asarray(p[wn])
            b[0, s * sec:s * sec + hc] = np.asarray(p[bn])
        gamma = np.zeros((1, sec), np.float32)
        beta = np.zeros((1, sec), np.float32)
        gamma[0, :hc] = np.asarray(p["gamma"])
        beta[0, :hc] = np.asarray(p["beta"])
        packed.append({
            "w": jnp.asarray(w).astype(matmul_dtype),  # MXU operand dtype
            "b": jnp.asarray(b, jnp.float32),
            "gamma": jnp.asarray(gamma, jnp.float32),
            "beta": jnp.asarray(beta, jnp.float32),
        })
        fin_real, fin_pad = hc, sec                    # next layer sees padded x
    return packed


# -----------------------------------------------------------------------------
# Pure-JAX references.  matmul_dtype=bfloat16 mirrors the kernel's MXU operand
# casting exactly ("numeric twin"); matmul_dtype=float32 is the exact PyTorch
# forward semantics.
# -----------------------------------------------------------------------------
def reference_forward(x, adj, params, *, num_heads, hidden_dims,
                      matmul_dtype=jnp.float32):
    def mm(a, b):
        return jnp.dot(a.astype(matmul_dtype), b.astype(matmul_dtype),
                       preferred_element_type=jnp.float32,
                       precision=lax.Precision.HIGHEST)
    adj = adj.astype(jnp.float32)
    for li, hd in enumerate(hidden_dims):
        p = params[li]
        q = mm(x, p["wq"]) + p["bq"]
        k = mm(x, p["wk"]) + p["bk"]
        v = mm(x, p["wv"]) + p["bv"]
        skip = mm(x, p["ws"]) + p["bs"]
        scale = 1.0 / math.sqrt(hd)
        outs = []
        for h in range(num_heads):
            sl = slice(h * hd, (h + 1) * hd)
            s = mm(q[:, sl], k[:, sl].T) * scale
            s = jnp.where(adj > 0, s, -1e30)
            e = jnp.exp(s - jnp.max(s, axis=-1, keepdims=True)) * adj
            a = e / jnp.maximum(jnp.sum(e, axis=-1, keepdims=True), 1e-30)
            outs.append(mm(a, v[:, sl]))
        o = jnp.concatenate(outs, axis=-1) + skip
        mu = o.mean(-1, keepdims=True)
        var = ((o - mu) ** 2).mean(-1, keepdims=True)
        x = (o - mu) * lax.rsqrt(var + 1e-5) * p["gamma"] + p["beta"]
    return x


if __name__ == "__main__":
    key = jax.random.PRNGKey(0)

    # Small per-graph shapes, batched to fill the 128-row MXU dimension
    # (review #1): 16 graphs x 16 nodes = 256 rows, 2 row tiles of 128.
    NUM_GRAPHS = 16
    NODES_PER_GRAPH = 16
    EDGES_PER_GRAPH = 40
    IN_FEATURES = 8
    HIDDEN_DIMS = [32, 16]
    NUM_HEADS = 2
    TILE_ROWS = 128
    assert TILE_ROWS % NODES_PER_GRAPH == 0      # graphs never span a tile

    rows = NUM_GRAPHS * NODES_PER_GRAPH
    k_x, k_src, k_dst, k_p = jax.random.split(key, 4)

    x = jax.random.normal(k_x, (rows, IN_FEATURES), jnp.float32)
    src = jax.random.randint(k_src, (NUM_GRAPHS, EDGES_PER_GRAPH), 0,
                             NODES_PER_GRAPH, jnp.int32)
    dst = jax.random.randint(k_dst, (NUM_GRAPHS, EDGES_PER_GRAPH), 0,
                             NODES_PER_GRAPH, jnp.int32)
    offs = (jnp.arange(NUM_GRAPHS, dtype=jnp.int32) * NODES_PER_GRAPH)[:, None]
    # Block-diagonal dense adjacency mask: adj[target, source] = 1.
    # (Duplicate directed edges collapse to 1.0 -- dense-mask semantics.)
    adj_f32 = jnp.zeros((rows, rows), jnp.float32).at[
        (dst + offs).ravel(), (src + offs).ravel()].set(1.0)
    adj_bf16 = adj_f32.astype(jnp.bfloat16)       # 0/1 exact in bf16

    params = init_params(k_p, IN_FEATURES, HIDDEN_DIMS, NUM_HEADS)
    packed = pack_params(params, IN_FEATURES, HIDDEN_DIMS, NUM_HEADS,
                         matmul_dtype=jnp.bfloat16)

    out = multilayer_gtc_forward(x, adj_bf16, packed, num_heads=NUM_HEADS,
                                 hidden_dims=HIDDEN_DIMS, tile_rows=TILE_ROWS)
    out = jax.block_until_ready(out)
    assert out.shape == (rows, NUM_HEADS * HIDDEN_DIMS[-1])

    # 1) Structural correctness vs. the bf16 numeric twin (same operand casts).
    ref_bf16 = reference_forward(x, adj_f32, params, num_heads=NUM_HEADS,
                                 hidden_dims=HIDDEN_DIMS,
                                 matmul_dtype=jnp.bfloat16)
    np.testing.assert_allclose(np.asarray(out), np.asarray(ref_bf16),
                               rtol=2e-2, atol=2e-2)

    # 2) Semantics bound vs. the exact f32 PyTorch forward: the only deliberate
    #    deviation is bf16 MXU operands (softmax/LayerNorm/mask are f32).
    ref_f32 = reference_forward(x, adj_f32, params, num_heads=NUM_HEADS,
                                hidden_dims=HIDDEN_DIMS,
                                matmul_dtype=jnp.float32)
    diff = np.abs(np.asarray(out) - np.asarray(ref_f32))
    assert float(diff.mean()) < 0.03 and float(diff.max()) < 0.25

    print("KERNEL_OK")
</pallas_src>

<mosaic_0001>
module attributes {stable_mosaic.version = 11 : i64} {
  func.func @fused_gtc_kernel(%arg0: i32, %arg1: memref<128x8xf32, #tpu.memory_space<vmem>>, %arg2: memref<128x128xbf16, #tpu.memory_space<vmem>>, %arg3: memref<8x512xbf16, #tpu.memory_space<vmem>>, %arg4: memref<1x512xf32, #tpu.memory_space<vmem>>, %arg5: memref<1x128xf32, #tpu.memory_space<vmem>>, %arg6: memref<1x128xf32, #tpu.memory_space<vmem>>, %arg7: memref<128x512xbf16, #tpu.memory_space<vmem>>, %arg8: memref<1x512xf32, #tpu.memory_space<vmem>>, %arg9: memref<1x128xf32, #tpu.memory_space<vmem>>, %arg10: memref<1x128xf32, #tpu.memory_space<vmem>>, %arg11: memref<128x128xf32, #tpu.memory_space<vmem>>) attributes {dimension_semantics = [#tpu.dimension_semantics<parallel>], iteration_bounds = array<i64: 2>, scalar_prefetch = 0 : i64, scratch_operands = 0 : i64, tpu.core_type = #tpu.core_type<tc>, window_params = [{transform_indices = @transform_0, window_bounds = array<i64: 128, 8>}, {transform_indices = @transform_1, window_bounds = array<i64: 128, 128>}, {pipeline_mode = #tpu.pipeline_mode<synchronous>, transform_indices = @transform_2, window_bounds = array<i64: 8, 512>}, {pipeline_mode = #tpu.pipeline_mode<synchronous>, transform_indices = @transform_3, window_bounds = array<i64: 1, 512>}, {pipeline_mode = #tpu.pipeline_mode<synchronous>, transform_indices = @transform_4, window_bounds = array<i64: 1, 128>}, {pipeline_mode = #tpu.pipeline_mode<synchronous>, transform_indices = @transform_5, window_bounds = array<i64: 1, 128>}, {pipeline_mode = #tpu.pipeline_mode<synchronous>, transform_indices = @transform_6, window_bounds = array<i64: 128, 512>}, {pipeline_mode = #tpu.pipeline_mode<synchronous>, transform_indices = @transform_7, window_bounds = array<i64: 1, 512>}, {pipeline_mode = #tpu.pipeline_mode<synchronous>, transform_indices = @transform_8, window_bounds = array<i64: 1, 128>}, {pipeline_mode = #tpu.pipeline_mode<synchronous>, transform_indices = @transform_9, window_bounds = array<i64: 1, 128>}, {transform_indices = @transform_10, window_bounds = array<i64: 128, 128>}]} {
    %c0 = arith.constant 0 : index
    %c0_0 = arith.constant 0 : index
    %0 = vector.load %arg1[%c0, %c0_0] : memref<128x8xf32, #tpu.memory_space<vmem>>, vector<128x8xf32>
    %c0_1 = arith.constant 0 : index
    %c0_2 = arith.constant 0 : index
    %1 = vector.load %arg2[%c0_1, %c0_2] : memref<128x128xbf16, #tpu.memory_space<vmem>>, vector<128x128xbf16>
    %2 = arith.extf %1 : vector<128x128xbf16> to vector<128x128xf32>
    %cst = arith.constant 1.000000e+00 : f32
    %3 = vector.broadcast %cst : f32 to vector<128x128xf32>
    %4 = arith.subf %2, %3 : vector<128x128xf32>
    %cst_3 = arith.constant 1.000000e+30 : f32
    %5 = vector.broadcast %cst_3 : f32 to vector<128x128xf32>
    %6 = arith.mulf %4, %5 : vector<128x128xf32>
    %cst_4 = arith.constant dense<0.000000e+00> : vector<128xf32>
    %7 = vector.multi_reduction <add>, %2, %cst_4 [1] : vector<128x128xf32> to vector<128xf32>
    %8 = vector.shape_cast %7 : vector<128xf32> to vector<128x1xf32>
    %cst_5 = arith.constant 0.000000e+00 : f32
    %9 = vector.broadcast %cst_5 : f32 to vector<128x1xf32>
    %10 = arith.cmpf ogt, %8, %9 : vector<128x1xf32>
    %11 = arith.truncf %0 : vector<128x8xf32> to vector<128x8xbf16>
    %c0_6 = arith.constant 0 : index
    %c0_7 = arith.constant 0 : index
    %12 = vector.load %arg3[%c0_6, %c0_7] : memref<8x512xbf16, #tpu.memory_space<vmem>>, vector<8x512xbf16>
    %cst_8 = arith.constant dense<0.000000e+00> : vector<128x512xf32>
    %13 = tpu.matmul %11, %12, %cst_8 {dimension_numbers = #tpu.dot_dimension_numbers<[1], [0], [0], [1], [0, 0, 1, 1], [], []>} : vector<128x8xbf16>, vector<8x512xbf16>, vector<128x512xf32> -> vector<128x512xf32>
    %c0_9 = arith.constant 0 : index
    %c0_10 = arith.constant 0 : index
    %14 = vector.load %arg4[%c0_9, %c0_10] : memref<1x512xf32, #tpu.memory_space<vmem>>, vector<1x512xf32>
    %15 = vector.broadcast %14 : vector<1x512xf32> to vector<128x512xf32>
    %16 = arith.addf %13, %15 : vector<128x512xf32>
    %17 = vector.extract_strided_slice %16 {offsets = [0, 0], sizes = [128, 128], strides = [1, 1]} : vector<128x512xf32> to vector<128x128xf32>
    %18 = vector.extract_strided_slice %16 {offsets = [0, 128], sizes = [128, 128], strides = [1, 1]} : vector<128x512xf32> to vector<128x128xf32>
    %19 = vector.extract_strided_slice %16 {offsets = [0, 256], sizes = [128, 128], strides = [1, 1]} : vector<128x512xf32> to vector<128x128xf32>
    %20 = vector.extract_strided_slice %16 {offsets = [0, 384], sizes = [128, 128], strides = [1, 1]} : vector<128x512xf32> to vector<128x128xf32>
    %21 = vector.extract_strided_slice %17 {offsets = [0, 0], sizes = [128, 32], strides = [1, 1]} : vector<128x128xf32> to vector<128x32xf32>
    %22 = arith.truncf %21 : vector<128x32xf32> to vector<128x32xbf16>
    %23 = vector.extract_strided_slice %18 {offsets = [0, 0], sizes = [128, 32], strides = [1, 1]} : vector<128x128xf32> to vector<128x32xf32>
    %24 = arith.truncf %23 : vector<128x32xf32> to vector<128x32xbf16>
    %25 = vector.extract_strided_slice %19 {offsets = [0, 0], sizes = [128, 32], strides = [1, 1]} : vector<128x128xf32> to vector<128x32xf32>
    %26 = arith.truncf %25 : vector<128x32xf32> to vector<128x32xbf16>
    %cst_11 = arith.constant dense<0.000000e+00> : vector<128x128xf32>
    %27 = tpu.matmul %22, %24, %cst_11 {dimension_numbers = #tpu.dot_dimension_numbers<[1], [1], [0], [0], [0, 0, 1, 0], [], []>} : vector<128x32xbf16>, vector<128x32xbf16>, vector<128x128xf32> -> vector<128x128xf32>
    %cst_12 = arith.constant 0.176776692 : f32
    %28 = vector.broadcast %cst_12 : f32 to vector<128x128xf32>
    %29 = arith.mulf %27, %28 : vector<128x128xf32>
    %30 = arith.addf %29, %6 : vector<128x128xf32>
    %cst_13 = arith.constant dense<0xFF800000> : vector<128xf32>
    %31 = vector.multi_reduction <maximumf>, %30, %cst_13 [1] : vector<128x128xf32> to vector<128xf32>
    %32 = vector.shape_cast %31 : vector<128xf32> to vector<128x1xf32>
    %33 = vector.broadcast %32 : vector<128x1xf32> to vector<128x128xf32>
    %34 = arith.subf %30, %33 : vector<128x128xf32>
    %35 = math.exp %34 : vector<128x128xf32>
    %cst_14 = arith.constant dense<0.000000e+00> : vector<128xf32>
    %36 = vector.multi_reduction <add>, %35, %cst_14 [1] : vector<128x128xf32> to vector<128xf32>
    %37 = vector.shape_cast %36 : vector<128xf32> to vector<128x1xf32>
    %38 = vector.broadcast %37 : vector<128x1xf32> to vector<128x128xf32>
    %39 = arith.divf %35, %38 : vector<128x128xf32>
    %40 = arith.truncf %39 : vector<128x128xf32> to vector<128x128xbf16>
    %cst_15 = arith.constant dense<0.000000e+00> : vector<128x32xf32>
    %41 = tpu.matmul %40, %26, %cst_15 {dimension_numbers = #tpu.dot_dimension_numbers<[1], [0], [0], [1], [0, 0, 1, 1], [], []>} : vector<128x128xbf16>, vector<128x32xbf16>, vector<128x32xf32> -> vector<128x32xf32>
    %42 = vector.extract_strided_slice %17 {offsets = [0, 32], sizes = [128, 32], strides = [1, 1]} : vector<128x128xf32> to vector<128x32xf32>
    %43 = arith.truncf %42 : vector<128x32xf32> to vector<128x32xbf16>
    %44 = vector.extract_strided_slice %18 {offsets = [0, 32], sizes = [128, 32], strides = [1, 1]} : vector<128x128xf32> to vector<128x32xf32>
    %45 = arith.truncf %44 : vector<128x32xf32> to vector<128x32xbf16>
    %46 = vector.extract_strided_slice %19 {offsets = [0, 32], sizes = [128, 32], strides = [1, 1]} : vector<128x128xf32> to vector<128x32xf32>
    %47 = arith.truncf %46 : vector<128x32xf32> to vector<128x32xbf16>
    %cst_16 = arith.constant dense<0.000000e+00> : vector<128x128xf32>
    %48 = tpu.matmul %43, %45, %cst_16 {dimension_numbers = #tpu.dot_dimension_numbers<[1], [1], [0], [0], [0, 0, 1, 0], [], []>} : vector<128x32xbf16>, vector<128x32xbf16>, vector<128x128xf32> -> vector<128x128xf32>
    %cst_17 = arith.constant 0.176776692 : f32
    %49 = vector.broadcast %cst_17 : f32 to vector<128x128xf32>
    %50 = arith.mulf %48, %49 : vector<128x128xf32>
    %51 = arith.addf %50, %6 : vector<128x128xf32>
    %cst_18 = arith.constant dense<0xFF800000> : vector<128xf32>
    %52 = vector.multi_reduction <maximumf>, %51, %cst_18 [1] : vector<128x128xf32> to vector<128xf32>
    %53 = vector.shape_cast %52 : vector<128xf32> to vector<128x1xf32>
    %54 = vector.broadcast %53 : vector<128x1xf32> to vector<128x128xf32>
    %55 = arith.subf %51, %54 : vector<128x128xf32>
    %56 = math.exp %55 : vector<128x128xf32>
    %cst_19 = arith.constant dense<0.000000e+00> : vector<128xf32>
    %57 = vector.multi_reduction <add>, %56, %cst_19 [1] : vector<128x128xf32> to vector<128xf32>
    %58 = vector.shape_cast %57 : vector<128xf32> to vector<128x1xf32>
    %59 = vector.broadcast %58 : vector<128x1xf32> to vector<128x128xf32>
    %60 = arith.divf %56, %59 : vector<128x128xf32>
    %61 = arith.truncf %60 : vector<128x128xf32> to vector<128x128xbf16>
    %cst_20 = arith.constant dense<0.000000e+00> : vector<128x32xf32>
    %62 = tpu.matmul %61, %47, %cst_20 {dimension_numbers = #tpu.dot_dimension_numbers<[1], [0], [0], [1], [0, 0, 1, 1], [], []>} : vector<128x128xbf16>, vector<128x32xbf16>, vector<128x32xf32> -> vector<128x32xf32>
    %cst_21 = arith.constant 0.000000e+00 : f32
    %63 = vector.broadcast %cst_21 : f32 to vector<128x64xf32>
    %64 = tpu.concatenate %41, %62, %63 in 1 : vector<128x32xf32>, vector<128x32xf32>, vector<128x64xf32> -> vector<128x128xf32>
    %cst_22 = arith.constant 0.000000e+00 : f32
    %65 = vector.shape_cast %10 : vector<128x1xi1> to vector<128x1xi1>
    %66 = vector.broadcast %65 : vector<128x1xi1> to vector<128x128xi1>
    %67 = vector.broadcast %cst_22 : f32 to vector<128x128xf32>
    %68 = arith.select %66, %64, %67 : vector<128x128xi1>, vector<128x128xf32>
    %69 = arith.addf %68, %20 : vector<128x128xf32>
    %cst_23 = arith.constant dense<0.000000e+00> : vector<128xf32>
    %70 = vector.multi_reduction <add>, %69, %cst_23 [1] : vector<128x128xf32> to vector<128xf32>
    %71 = vector.shape_cast %70 : vector<128xf32> to vector<128x1xf32>
    %cst_24 = arith.constant 1.562500e-02 : f32
    %72 = vector.broadcast %cst_24 : f32 to vector<128x1xf32>
    %73 = arith.mulf %71, %72 : vector<128x1xf32>
    %74 = vector.broadcast %73 : vector<128x1xf32> to vector<128x128xf32>
    %75 = arith.subf %69, %74 : vector<128x128xf32>
    %76 = tpu.iota {dimensions = array<i32: 1>} : vector<128x128xi32>
    %c64_i32 = arith.constant 64 : i32
    %77 = vector.broadcast %c64_i32 : i32 to vector<128x128xi32>
    %78 = arith.cmpi slt, %76, %77 : vector<128x128xi32>
    %79 = arith.extui %78 : vector<128x128xi1> to vector<128x128xi32>
    %80 = arith.sitofp %79 : vector<128x128xi32> to vector<128x128xf32>
    %81 = arith.mulf %75, %80 : vector<128x128xf32>
    %82 = arith.mulf %81, %81 : vector<128x128xf32>
    %cst_25 = arith.constant dense<0.000000e+00> : vector<128xf32>
    %83 = vector.multi_reduction <add>, %82, %cst_25 [1] : vector<128x128xf32> to vector<128xf32>
    %84 = vector.shape_cast %83 : vector<128xf32> to vector<128x1xf32>
    %cst_26 = arith.constant 1.562500e-02 : f32
    %85 = vector.broadcast %cst_26 : f32 to vector<128x1xf32>
    %86 = arith.mulf %84, %85 : vector<128x1xf32>
    %cst_27 = arith.constant 9.99999974E-6 : f32
    %87 = vector.broadcast %cst_27 : f32 to vector<128x1xf32>
    %88 = arith.addf %86, %87 : vector<128x1xf32>
    %89 = math.rsqrt %88 : vector<128x1xf32>
    %90 = vector.broadcast %89 : vector<128x1xf32> to vector<128x128xf32>
    %91 = arith.mulf %81, %90 : vector<128x128xf32>
    %c0_28 = arith.constant 0 : index
    %c0_29 = arith.constant 0 : index
    %92 = vector.load %arg5[%c0_28, %c0_29] : memref<1x128xf32, #tpu.memory_space<vmem>>, vector<1x128xf32>
    %93 = vector.broadcast %92 : vector<1x128xf32> to vector<128x128xf32>
    %94 = arith.mulf %91, %93 : vector<128x128xf32>
    %c0_30 = arith.constant 0 : index
    %c0_31 = arith.constant 0 : index
    %95 = vector.load %arg6[%c0_30, %c0_31] : memref<1x128xf32, #tpu.memory_space<vmem>>, vector<1x128xf32>
    %96 = vector.broadcast %95 : vector<1x128xf32> to vector<128x128xf32>
    %97 = arith.addf %94, %96 : vector<128x128xf32>
    %98 = arith.truncf %97 : vector<128x128xf32> to vector<128x128xbf16>
    %c0_32 = arith.constant 0 : index
    %c0_33 = arith.constant 0 : index
    %99 = vector.load %arg7[%c0_32, %c0_33] : memref<128x512xbf16, #tpu.memory_space<vmem>>, vector<128x512xbf16>
    %cst_34 = arith.constant dense<0.000000e+00> : vector<128x512xf32>
    %100 = tpu.matmul %98, %99, %cst_34 {dimension_numbers = #tpu.dot_dimension_numbers<[1], [0], [0], [1], [0, 0, 1, 1], [], []>} : vector<128x128xbf16>, vector<128x512xbf16>, vector<128x512xf32> -> vector<128x512xf32>
    %c0_35 = arith.constant 0 : index
    %c0_36 = arith.constant 0 : index
    %101 = vector.load %arg8[%c0_35, %c0_36] : memref<1x512xf32, #tpu.memory_space<vmem>>, vector<1x512xf32>
    %102 = vector.broadcast %101 : vector<1x512xf32> to vector<128x512xf32>
    %103 = arith.addf %100, %102 : vector<128x512xf32>
    %104 = vector.extract_strided_slice %103 {offsets = [0, 0], sizes = [128, 128], strides = [1, 1]} : vector<128x512xf32> to vector<128x128xf32>
    %105 = vector.extract_strided_slice %103 {offsets = [0, 128], sizes = [128, 128], strides = [1, 1]} : vector<128x512xf32> to vector<128x128xf32>
    %106 = vector.extract_strided_slice %103 {offsets = [0, 256], sizes = [128, 128], strides = [1, 1]} : vector<128x512xf32> to vector<128x128xf32>
    %107 = vector.extract_strided_slice %103 {offsets = [0, 384], sizes = [128, 128], strides = [1, 1]} : vector<128x512xf32> to vector<128x128xf32>
    %108 = vector.extract_strided_slice %104 {offsets = [0, 0], sizes = [128, 16], strides = [1, 1]} : vector<128x128xf32> to vector<128x16xf32>
    %109 = arith.truncf %108 : vector<128x16xf32> to vector<128x16xbf16>
    %110 = vector.extract_strided_slice %105 {offsets = [0, 0], sizes = [128, 16], strides = [1, 1]} : vector<128x128xf32> to vector<128x16xf32>
    %111 = arith.truncf %110 : vector<128x16xf32> to vector<128x16xbf16>
    %112 = vector.extract_strided_slice %106 {offsets = [0, 0], sizes = [128, 16], strides = [1, 1]} : vector<128x128xf32> to vector<128x16xf32>
    %113 = arith.truncf %112 : vector<128x16xf32> to vector<128x16xbf16>
    %cst_37 = arith.constant dense<0.000000e+00> : vector<128x128xf32>
    %114 = tpu.matmul %109, %111, %cst_37 {dimension_numbers = #tpu.dot_dimension_numbers<[1], [1], [0], [0], [0, 0, 1, 0], [], []>} : vector<128x16xbf16>, vector<128x16xbf16>, vector<128x128xf32> -> vector<128x128xf32>
    %cst_38 = arith.constant 2.500000e-01 : f32
    %115 = vector.broadcast %cst_38 : f32 to vector<128x128xf32>
    %116 = arith.mulf %114, %115 : vector<128x128xf32>
    %117 = arith.addf %116, %6 : vector<128x128xf32>
    %cst_39 = arith.constant dense<0xFF800000> : vector<128xf32>
    %118 = vector.multi_reduction <maximumf>, %117, %cst_39 [1] : vector<128x128xf32> to vector<128xf32>
    %119 = vector.shape_cast %118 : vector<128xf32> to vector<128x1xf32>
    %120 = vector.broadcast %119 : vector<128x1xf32> to vector<128x128xf32>
    %121 = arith.subf %117, %120 : vector<128x128xf32>
    %122 = math.exp %121 : vector<128x128xf32>
    %cst_40 = arith.constant dense<0.000000e+00> : vector<128xf32>
    %123 = vector.multi_reduction <add>, %122, %cst_40 [1] : vector<128x128xf32> to vector<128xf32>
    %124 = vector.shape_cast %123 : vector<128xf32> to vector<128x1xf32>
    %125 = vector.broadcast %124 : vector<128x1xf32> to vector<128x128xf32>
    %126 = arith.divf %122, %125 : vector<128x128xf32>
    %127 = arith.truncf %126 : vector<128x128xf32> to vector<128x128xbf16>
    %cst_41 = arith.constant dense<0.000000e+00> : vector<128x16xf32>
    %128 = tpu.matmul %127, %113, %cst_41 {dimension_numbers = #tpu.dot_dimension_numbers<[1], [0], [0], [1], [0, 0, 1, 1], [], []>} : vector<128x128xbf16>, vector<128x16xbf16>, vector<128x16xf32> -> vector<128x16xf32>
    %129 = vector.extract_strided_slice %104 {offsets = [0, 16], sizes = [128, 16], strides = [1, 1]} : vector<128x128xf32> to vector<128x16xf32>
    %130 = arith.truncf %129 : vector<128x16xf32> to vector<128x16xbf16>
    %131 = vector.extract_strided_slice %105 {offsets = [0, 16], sizes = [128, 16], strides = [1, 1]} : vector<128x128xf32> to vector<128x16xf32>
    %132 = arith.truncf %131 : vector<128x16xf32> to vector<128x16xbf16>
    %133 = vector.extract_strided_slice %106 {offsets = [0, 16], sizes = [128, 16], strides = [1, 1]} : vector<128x128xf32> to vector<128x16xf32>
    %134 = arith.truncf %133 : vector<128x16xf32> to vector<128x16xbf16>
    %cst_42 = arith.constant dense<0.000000e+00> : vector<128x128xf32>
    %135 = tpu.matmul %130, %132, %cst_42 {dimension_numbers = #tpu.dot_dimension_numbers<[1], [1], [0], [0], [0, 0, 1, 0], [], []>} : vector<128x16xbf16>, vector<128x16xbf16>, vector<128x128xf32> -> vector<128x128xf32>
    %cst_43 = arith.constant 2.500000e-01 : f32
    %136 = vector.broadcast %cst_43 : f32 to vector<128x128xf32>
    %137 = arith.mulf %135, %136 : vector<128x128xf32>
    %138 = arith.addf %137, %6 : vector<128x128xf32>
    %cst_44 = arith.constant dense<0xFF800000> : vector<128xf32>
    %139 = vector.multi_reduction <maximumf>, %138, %cst_44 [1] : vector<128x128xf32> to vector<128xf32>
    %140 = vector.shape_cast %139 : vector<128xf32> to vector<128x1xf32>
    %141 = vector.broadcast %140 : vector<128x1xf32> to vector<128x128xf32>
    %142 = arith.subf %138, %141 : vector<128x128xf32>
    %143 = math.exp %142 : vector<128x128xf32>
    %cst_45 = arith.constant dense<0.000000e+00> : vector<128xf32>
    %144 = vector.multi_reduction <add>, %143, %cst_45 [1] : vector<128x128xf32> to vector<128xf32>
    %145 = vector.shape_cast %144 : vector<128xf32> to vector<128x1xf32>
    %146 = vector.broadcast %145 : vector<128x1xf32> to vector<128x128xf32>
    %147 = arith.divf %143, %146 : vector<128x128xf32>
    %148 = arith.truncf %147 : vector<128x128xf32> to vector<128x128xbf16>
    %cst_46 = arith.constant dense<0.000000e+00> : vector<128x16xf32>
    %149 = tpu.matmul %148, %134, %cst_46 {dimension_numbers = #tpu.dot_dimension_numbers<[1], [0], [0], [1], [0, 0, 1, 1], [], []>} : vector<128x128xbf16>, vector<128x16xbf16>, vector<128x16xf32> -> vector<128x16xf32>
    %cst_47 = arith.constant 0.000000e+00 : f32
    %150 = vector.broadcast %cst_47 : f32 to vector<128x96xf32>
    %151 = tpu.concatenate %128, %149, %150 in 1 : vector<128x16xf32>, vector<128x16xf32>, vector<128x96xf32> -> vector<128x128xf32>
    %cst_48 = arith.constant 0.000000e+00 : f32
    %152 = vector.shape_cast %10 : vector<128x1xi1> to vector<128x1xi1>
    %153 = vector.broadcast %152 : vector<128x1xi1> to vector<128x128xi1>
    %154 = vector.broadcast %cst_48 : f32 to vector<128x128xf32>
    %155 = arith.select %153, %151, %154 : vector<128x128xi1>, vector<128x128xf32>
    %156 = arith.addf %155, %107 : vector<128x128xf32>
    %cst_49 = arith.constant dense<0.000000e+00> : vector<128xf32>
    %157 = vector.multi_reduction <add>, %156, %cst_49 [1] : vector<128x128xf32> to vector<128xf32>
    %158 = vector.shape_cast %157 : vector<128xf32> to vector<128x1xf32>
    %cst_50 = arith.constant 3.125000e-02 : f32
    %159 = vector.broadcast %cst_50 : f32 to vector<128x1xf32>
    %160 = arith.mulf %158, %159 : vector<128x1xf32>
    %161 = vector.broadcast %160 : vector<128x1xf32> to vector<128x128xf32>
    %162 = arith.subf %156, %161 : vector<128x128xf32>
    %163 = tpu.iota {dimensions = array<i32: 1>} : vector<128x128xi32>
    %c32_i32 = arith.constant 32 : i32
    %164 = vector.broadcast %c32_i32 : i32 to vector<128x128xi32>
    %165 = arith.cmpi slt, %163, %164 : vector<128x128xi32>
    %166 = arith.extui %165 : vector<128x128xi1> to vector<128x128xi32>
    %167 = arith.sitofp %166 : vector<128x128xi32> to vector<128x128xf32>
    %168 = arith.mulf %162, %167 : vector<128x128xf32>
    %169 = arith.mulf %168, %168 : vector<128x128xf32>
    %cst_51 = arith.constant dense<0.000000e+00> : vector<128xf32>
    %170 = vector.multi_reduction <add>, %169, %cst_51 [1] : vector<128x128xf32> to vector<128xf32>
    %171 = vector.shape_cast %170 : vector<128xf32> to vector<128x1xf32>
    %cst_52 = arith.constant 3.125000e-02 : f32
    %172 = vector.broadcast %cst_52 : f32 to vector<128x1xf32>
    %173 = arith.mulf %171, %172 : vector<128x1xf32>
    %cst_53 = arith.constant 9.99999974E-6 : f32
    %174 = vector.broadcast %cst_53 : f32 to vector<128x1xf32>
    %175 = arith.addf %173, %174 : vector<128x1xf32>
    %176 = math.rsqrt %175 : vector<128x1xf32>
    %177 = vector.broadcast %176 : vector<128x1xf32> to vector<128x128xf32>
    %178 = arith.mulf %168, %177 : vector<128x128xf32>
    %c0_54 = arith.constant 0 : index
    %c0_55 = arith.constant 0 : index
    %179 = vector.load %arg9[%c0_54, %c0_55] : memref<1x128xf32, #tpu.memory_space<vmem>>, vector<1x128xf32>
    %180 = vector.broadcast %179 : vector<1x128xf32> to vector<128x128xf32>
    %181 = arith.mulf %178, %180 : vector<128x128xf32>
    %c0_56 = arith.constant 0 : index
    %c0_57 = arith.constant 0 : index
    %182 = vector.load %arg10[%c0_56, %c0_57] : memref<1x128xf32, #tpu.memory_space<vmem>>, vector<1x128xf32>
    %183 = vector.broadcast %182 : vector<1x128xf32> to vector<128x128xf32>
    %184 = arith.addf %181, %183 : vector<128x128xf32>
    %c0_58 = arith.constant 0 : index
    %c0_59 = arith.constant 0 : index
    %185 = vector.load %arg11[%c0_58, %c0_59] : memref<128x128xf32, #tpu.memory_space<vmem>>, vector<128x128xf32>
    tpu.vector_store %arg11[%c0_58, %c0_59], %184 {strides = array<i32>} : memref<128x128xf32, #tpu.memory_space<vmem>>, vector<128x128xf32>,
    return
  }
  func.func @transform_0(%arg0: i32) -> (i32, i32) {
    %c0_i32 = arith.constant 0 : i32
    %c0_i32_0 = arith.constant 0 : i32
    return %arg0, %c0_i32 : i32, i32
  }
  func.func @transform_1(%arg0: i32) -> (i32, i32) {
    %c0_i32 = arith.constant 0 : i32
    return %arg0, %arg0 : i32, i32
  }
  func.func @transform_2(%arg0: i32) -> (i32, i32) {
    %c0_i32 = arith.constant 0 : i32
    %c0_i32_0 = arith.constant 0 : i32
    %c0_i32_1 = arith.constant 0 : i32
    return %c0_i32, %c0_i32_0 : i32, i32
  }
  func.func @transform_3(%arg0: i32) -> (i32, i32) {
    %c0_i32 = arith.constant 0 : i32
    %c0_i32_0 = arith.constant 0 : i32
    %c0_i32_1 = arith.constant 0 : i32
    return %c0_i32, %c0_i32_0 : i32, i32
  }
  func.func @transform_4(%arg0: i32) -> (i32, i32) {
    %c0_i32 = arith.constant 0 : i32
    %c0_i32_0 = arith.constant 0 : i32
    %c0_i32_1 = arith.constant 0 : i32
    return %c0_i32, %c0_i32_0 : i32, i32
  }
  func.func @transform_5(%arg0: i32) -> (i32, i32) {
    %c0_i32 = arith.constant 0 : i32
    %c0_i32_0 = arith.constant 0 : i32
    %c0_i32_1 = arith.constant 0 : i32
    return %c0_i32, %c0_i32_0 : i32, i32
  }
  func.func @transform_6(%arg0: i32) -> (i32, i32) {
    %c0_i32 = arith.constant 0 : i32
    %c0_i32_0 = arith.constant 0 : i32
    %c0_i32_1 = arith.constant 0 : i32
    return %c0_i32, %c0_i32_0 : i32, i32
  }
  func.func @transform_7(%arg0: i32) -> (i32, i32) {
    %c0_i32 = arith.constant 0 : i32
    %c0_i32_0 = arith.constant 0 : i32
    %c0_i32_1 = arith.constant 0 : i32
    return %c0_i32, %c0_i32_0 : i32, i32
  }
  func.func @transform_8(%arg0: i32) -> (i32, i32) {
    %c0_i32 = arith.constant 0 : i32
    %c0_i32_0 = arith.constant 0 : i32
    %c0_i32_1 = arith.constant 0 : i32
    return %c0_i32, %c0_i32_0 : i32, i32
  }
  func.func @transform_9(%arg0: i32) -> (i32, i32) {
    %c0_i32 = arith.constant 0 : i32
    %c0_i32_0 = arith.constant 0 : i32
    %c0_i32_1 = arith.constant 0 : i32
    return %c0_i32, %c0_i32_0 : i32, i32
  }
  func.func @transform_10(%arg0: i32) -> (i32, i32) {
    %c0_i32 = arith.constant 0 : i32
    %c0_i32_0 = arith.constant 0 : i32
    return %arg0, %c0_i32 : i32, i32
  }
}

</mosaic_0001>

<bundles_post_ra>
// kernel: tpu_custom_call.1
= control target key start
LH: loop header
LB: loop body
LE: loop exit
PB: predicated region body
PF: predicated region fallthrough
CT: control target
= control target key end

     0   :  { %s7849_s0 = inlined_call_operand.vmem [shape: f32[256,8], index: 0, kind: input, shape index: {}]   ;;  %s7850_s1 = inlined_call_operand.vmem [shape: bf16[256,256], index: 1, kind: input, shape index: {}]   ;;  %s7851_s2 = inlined_call_operand.vmem [shape: bf16[8,512], index: 2, kind: input, shape index: {}]   ;;  %s7852_s3 = inlined_call_operand.hbm [shape: f32[1,512], index: 3, kind: input, shape index: {}]   ;;  %s7853_s4 = inlined_call_operand.vmem [shape: f32[1,128], index: 4, kind: input, shape index: {}]   ;;  %s7854_s5 = inlined_call_operand.vmem [shape: f32[1,128], index: 5, kind: input, shape index: {}]   ;;  %s7855_s6 = inlined_call_operand.hbm [shape: bf16[128,512], index: 6, kind: input, shape index: {}]   ;;  %s7856_s7 = inlined_call_operand.vmem [shape: f32[1,512], index: 7, kind: input, shape index: {}]   ;;  %s7857_s8 = inlined_call_operand.vmem [shape: f32[1,128], index: 8, kind: input, shape index: {}]   ;;  %s7858_s9 = inlined_call_operand.vmem [shape: f32[1,128], index: 9, kind: input, shape index: {}]   ;;  %s7859_s10 = inlined_call_operand.hbm [shape: f32[256,128], index: 10, kind: output, shape index: {}]  }
   0x1   :  { %7948 = sst [smem:[#allocation60_spill]] %s7852_s3 }
   0x2   :  { %15 = vsyncpa [#allocation4], 0 }
   0x3   :  { %16 = vsyncpa [#allocation7], 0 }
   0x4   :  { %17 = vsyncpa [#allocation5], 0 }
   0x5   :  { %19 = vsyncpa [#allocation5 + $0x1], 0  ;;  %s5474_s13 = smov 0   ;;  %s5476_s14 = smov 0  }
   0x6   :  { %s5478_s15 = smov 0   ;;  %s5480_s16 = smov 0  }
   0x7   :  { %s5482_s17 = smov 0   ;;  %s5484_s18 = smov 0  }
   0x8 LB: > { %7949 = sst [smem:[#allocation12_spill]] %s5392_s15  ;;  %s5505_s19 = sadd.s32 4294967295, %s5404_s18   ;;  %s5404_s18 = sphi %s5484_s18, %s8123_s18   ;;  %s5400_s17 = sphi %s5482_s17, %s8130_s17   ;;  %s5396_s16 = sphi %s5480_s16, %s8129_s16   ;;  %s5392_s15 = sphi %s5478_s15, %s8125_s15   ;;  %s5388_s14 = sphi %s5476_s14, %s8128_s14   ;;  %s5384_s13 = sphi %s5474_s13, %s8127_s13  }
   0x9   : > { %s4222_s20 = sadd.s32 4294967294, %s5404_s18   ;;  %s5509_s21 = sadd.s32 1, %s5404_s18  }
   0xa   : > { %7950 = sst [smem:[#allocation13_spill]] %s5509_s21  ;;  %s60_s22 = sadd.s32 1, %s5400_s17 }
   0xb   : > { %s55_s23 = ssub.s32 %s5404_s18, %s5509_s21  ;;  %p67_p0 = scmp.ne.s32.totalorder %s5400_s17, %s5396_s16 }
   0xc   : > { %s57_s24 = sor.u32 %s55_s23, %s55_s23  ;;  %p68_p1 = scmp.eq.s32.totalorder %s5404_s18, 0 }
   0xd   : > { %p58_p2 = scmp.eq.s32.totalorder %s57_s24, 0  ;;  %p252_p3 = scmp.eq.s32.totalorder %s55_s23, 0 }
   0xe   : > { %p5517_p4 = por %p68_p1, %p67_p0  ;;  %s254_s26 = sadd.s32 1, %s5392_s15 }
   0xf   : > { %s5523_s27 = scalar_select %p58_p2, %s5400_s17, %s60_s22  }
  0x10   : > { %s7951_s25 = scalar_select %p5517_p4, 1, 0 }
  0x11   : > { %7952 = sst [smem:[#allocation14_spill]] %s5523_s27  ;;  %p264_p5 = scmp.ne.s32.totalorder %s5392_s15, %s5388_s14 }
  0x12   : > { %s5526_s28 = scalar_select %p252_p3, %s5392_s15, %s254_s26  }
  0x13   : > { %p265_p6 = scmp.eq.s32.totalorder %s5505_s19, 1  ;;  %p270_p7 = scmp.ne.s32.totalorder %s5388_s14, %s5384_s13 }
  0x14   : > { %7953 = sst [smem:[#allocation15_spill]] %s5526_s28  ;;  %p271_p8 = scmp.eq.s32.totalorder %s4222_s20, 1 }
  0x15   : > { %p5533_p9 = por %p265_p6, %p264_p5  ;;  %p4223_p10 = scmp.ge.s32.totalorder %s5404_s18, 1 }
  0x16   : > { %p5538_p11 = por %p271_p8, %p270_p7  ;;  %p278_p12 = scmp.lt.s32.totalorder %s5404_s18, 3 }
  0x17   : > { %s7954_s29 = scalar_select %p5533_p9, 1, 0 }
  0x18   : > { %s7955_s30 = scalar_select %p5538_p11, 1, 0 }
  0x19   : > { %p7860_p13 = scmp.eq.s32.totalorder %s5505_s19, 0  ;;  %p5544_p0 = pnand %p4223_p10, %p278_p12 }
  0x1a   : > { %7956 = sst [smem:[#allocation16_spill]] %s7955_s30  ;;  %s5406_s12 = smov [#allocation3]  }
  0x1b   : > { %s7957_s11 = scalar_select %p5544_p0, 1, 0 }
  0x1c   : > { %s294_s22 = sshll.u32 %s5406_s12, 4  ;;  %p4818_p1 = pneg %p5544_p0  ;;  %s295_s22 = int_to_ptr.vmem [resolvable:$true] %s294_s22 }
  0x1d   : > { %s5407_s20 = smov [#allocation6]   ;;  %s5279_s26 = scalar_lea.vmem %s295_s22, 64 }
  0x1e   : > { %s310_s23 = sshll.u32 %s5407_s20, 4  ;;  %p5552_p2 = pnand %p7860_p13, %p4818_p1  ;;  %s311_s23 = int_to_ptr.vmem [resolvable:$true] %s310_s23 }
  0x1f   : > { %p5280_p5 = scmp.ne.s32.totalorder %s295_s22, %s5279_s26  ;;  %p5287_p8 = scmp.lt.s32.totalorder %s295_s22, %s295_s22 }
  0x20   : > { %p5270_p3 = pneg %p5552_p2  ;;  %p5288_p10 = scmp.lt.s32.totalorder %s5279_s26, %s5279_s26 }
  0x22   : > { %p5282_p6 = pnand %p5280_p5, %p5270_p3  ;;  %p5289_p12 = por %p5288_p10, %p5287_p8 }
  0x24   : > { %p5283_p7 = pneg %p5282_p6 }
  0x26   : > { %p5290_p11 = pnand %p5289_p12, %p5283_p7 }
  0x28   : > { %5293 = shalt.err (!%p5290_p11)
}
  0x29   : > { %s7959_s3 = sld [smem:[#allocation60_spill]]  ;;  %s5305_s27 = scalar_lea.vmem %s311_s23, 4096 }
  0x2a   : > { %p5306_p1 = scmp.ne.s32.totalorder %s311_s23, %s5305_s27  ;;  %p5313_p5 = scmp.lt.s32.totalorder %s311_s23, %s311_s23 }
  0x2b   : > { %p5314_p6 = scmp.lt.s32.totalorder %s5305_s27, %s5305_s27 }
  0x2c   : > { %p5308_p13 = pnand %p5306_p1, %p5270_p3 }
  0x2d   : > { %p5315_p0 = por %p5314_p6, %p5313_p5 }
  0x2e   : > { %p5309_p9 = pneg %p5308_p13 }
  0x2f   : > { %4821 = dma.hbm_to_vmem [thread:$0]  (!%p5552_p2), %s7959_s3, 64, %s295_s22, [#allocation4]  }
  0x30   : > { %p5316_p4 = pnand %p5315_p0, %p5309_p9 }
  0x32   : > { %5319 = shalt.err (!%p5316_p4)
}
  0x33   : > { %s5408_s26 = smov 256   ;;  %s5409_s28 = smov 16  }
  0x34   : > { %4824 = dma.hbm_to_vmem [thread:$0]  (!%p5552_p2), %s7855_s6, 4096, %s311_s23, [#allocation7], %s5408_s26, %s5408_s26, %s5409_s28  }
  0x35   : > { %p4226_p11 = scmp.ge.s32.totalorder %s5404_s18, 2 }
  0x36   : > { %p7960_p13 = scmp.ne.s32.totalorder (!%p4226_p11), %s7951_s25, 0 }
  0x37   : > { %329 = sbr.rel (%p4226_p11) target bundleno = 76 (0x4c), region = 48 }
  0x3c   : > { %341 = sbr.rel (!%p7960_p13) target bundleno = 76 (0x4c), region = 56  ;;  %s343_s27 = sand.u32 (%p7960_p13), 1, %s5400_s17  }
  0x3d   : > { %s4351_s22 = sshll.u32 (%p7960_p13), %s5404_s18, 5  ;;  %s4227_s12 = sshll.u32 (%p7960_p13), %s343_s27, 6 }
  0x3e   : > { %s348_s20 = sadd.s32 (%p7960_p13), %s5404_s18, %s4351_s22  ;;  %s345_s21 = scalar_lea.vmem (%p7960_p13), [#allocation2], %s4227_s12 }
  0x3f   : > { %s4230_s24 = sshll.u32 (%p7960_p13), %s348_s20, 2 }
  0x40   : > { %s5585_s15 = scalar_lea.vmem (%p7960_p13), %s7850_s1, %s4230_s24 }
  0x41   : > { %v367_v0 = vld [vmem:[%s5585_s15] sm:$0xf]  ;;  %v369_v1 = vld [vmem:[%s5585_s15 + $0x8] sm:$0xf]  ;;  %v371_v2 = vld [vmem:[%s5585_s15 + $0x10] sm:$0xf] }
  0x42   : > { %368 = vst [vmem:[%s345_s21] sm:$0xf] %v367_v0  ;;  %370 = vst [vmem:[%s345_s21 + $0x4] sm:$0xf] %v369_v1  ;;  %v373_v3 = vld [vmem:[%s5585_s15 + $0x18] sm:$0xf] }
  0x43   : > { %372 = vst [vmem:[%s345_s21 + $0x8] sm:$0xf] %v371_v2  ;;  %v375_v4 = vld [vmem:[%s5585_s15 + $0x20] sm:$0xf]  ;;  %v377_v5 = vld [vmem:[%s5585_s15 + $0x28] sm:$0xf] }
  0x44   : > { %374 = vst [vmem:[%s345_s21 + $0xc] sm:$0xf] %v373_v3  ;;  %376 = vst [vmem:[%s345_s21 + $0x10] sm:$0xf] %v375_v4  ;;  %v379_v6 = vld [vmem:[%s5585_s15 + $0x30] sm:$0xf] }
  0x45   : > { %378 = vst [vmem:[%s345_s21 + $0x14] sm:$0xf] %v377_v5  ;;  %v381_v7 = vld [vmem:[%s5585_s15 + $0x38] sm:$0xf]  ;;  %v383_v8 = vld [vmem:[%s5585_s15 + $0x40] sm:$0xf] }
  0x46   : > { %380 = vst [vmem:[%s345_s21 + $0x18] sm:$0xf] %v379_v6  ;;  %382 = vst [vmem:[%s345_s21 + $0x1c] sm:$0xf] %v381_v7  ;;  %v385_v9 = vld [vmem:[%s5585_s15 + $0x48] sm:$0xf] }
  0x47   : > { %384 = vst [vmem:[%s345_s21 + $0x20] sm:$0xf] %v383_v8  ;;  %v387_v10 = vld [vmem:[%s5585_s15 + $0x50] sm:$0xf]  ;;  %v389_v11 = vld [vmem:[%s5585_s15 + $0x58] sm:$0xf] }
  0x48   : > { %386 = vst [vmem:[%s345_s21 + $0x24] sm:$0xf] %v385_v9  ;;  %388 = vst [vmem:[%s345_s21 + $0x28] sm:$0xf] %v387_v10  ;;  %v391_v12 = vld [vmem:[%s5585_s15 + $0x60] sm:$0xf] }
  0x49   : > { %390 = vst [vmem:[%s345_s21 + $0x2c] sm:$0xf] %v389_v11  ;;  %v393_v13 = vld [vmem:[%s5585_s15 + $0x68] sm:$0xf]  ;;  %v395_v14 = vld [vmem:[%s5585_s15 + $0x70] sm:$0xf] }
  0x4a   : > { %392 = vst [vmem:[%s345_s21 + $0x30] sm:$0xf] %v391_v12  ;;  %394 = vst [vmem:[%s345_s21 + $0x34] sm:$0xf] %v393_v13  ;;  %v397_v15 = vld [vmem:[%s5585_s15 + $0x78] sm:$0xf] }
  0x4b   : > { %396 = vst [vmem:[%s345_s21 + $0x38] sm:$0xf] %v395_v14  ;;  %398 = vst [vmem:[%s345_s21 + $0x3c] sm:$0xf] %v397_v15 }
  0x4c PF: > { %p7961_p4 = scmp.ne.s32.totalorder %s7957_s11, 0 }
  0x4e   : > { %457 = sbr.rel (%p7961_p4) target bundleno = 3413 (0xd55), region = 97 }
  0x53   : > { %s460_s3 = sand.u32 1, %s5396_s16   ;;  %p7962_p9 = scmp.eq.s32.totalorder %s5505_s19, 0 }
  0x54   : > { %s4232_s25 = sshll.u32 %s460_s3, 6 }
  0x55   : > { %s5606_s28 = scalar_lea.vmem [#allocation2], %s4232_s25 }
  0x56   : > { %5371 = dma.done.wait (%p7962_p9), [#allocation4], 64   ;;  %p7963_p0 = pmov %p7962_p9 }
  0x58   : > { %5373 = vsyncadd (%p7963_p0), [#allocation4], 4294967232  ;;  %p7964_p2 = pmov %p7963_p0 }
  0x59   : > { %p7965_p3 = pmov %p7963_p0 }
  0x5a   : > { %5375 = dma.done.wait (%p7964_p2), [#allocation7], 4096  }
  0x5b   : > { %5377 = vsyncadd (%p7965_p3), [#allocation7], 4294963200  ;;  %s4236_s30 = sshll.u32 %s5505_s19, 4  ;;  %v7871_v16 = vmov 0   ;;  %v655_v17 = vld [vmem:[%s7851_s2] sm:$0xff]  ;;  %vm714_vm0 = vcmask 1043456   ;;  %v7870_v49 = vlaneseq }
  0x5c   : > { %759 = vmatprep.mubr.bf16.mxu0 %v7871_v16  ;;  %p511_p7 = scmp.lt.s32.totalorder %s4236_s30, 31  ;;  %872 = vmatprep.mubr.bf16.mxu1 %v7871_v16  ;;  %v4255_v20 = vcombine.high %v655_v17, %v655_v17  ;;  %v4254_v21 = vcombine.low %v655_v17, %v655_v17  ;;  %vm689_vm1 = vcmask 64512   ;;  %v656_v45 = vld [vmem:[%s7851_s2 + $0x8] sm:$0xff]  ;;  %v5684_v52 = vld [vmem:[#allocation3] sm:$0xf]  ;;  %vm977_vm2 = vcmask 261120  }
  0x5d   : > { %v4257_v46 = vcombine.high %v656_v45, %v656_v45  ;;  %v4256_v47 = vcombine.low %v656_v45, %v656_v45  ;;  %v5681_v50 = vshrl.u32 %v7870_v49, 7  ;;  %s5411_s24 = smov 96   ;;  %s5412_s15 = smov 32   ;;  %vm1990_vm3 = vcmask 523264  }
  0x5e   : > { %s8132_s30 = smov (!%p511_p7, %s4236_s30), 31  ;;  %4258 = vmatprep.subr.msk.bf16.mxu0 %vm714_vm0, %v4255_v20  ;;  %v716_v22 = vsel %vm714_vm0, %v4254_v21, 0  ;;  %s5414_s11 = smov 112  }
  0x5f   : > { %s4237_s16 = sshll.u32 %s8132_s30, 3  ;;  %742 = vmatpush1.bf16.msra.mxu0 %v716_v22  ;;  %4267 = vmatprep.subr.msk.bf16.mxu1 %vm714_vm0, %v4257_v46  ;;  %v722_v48 = vsel %vm714_vm0, %v4256_v47, 0  ;;  %7966 = vst [vmem:[#allocation17_spill] sm:$0xff] %v5681_v50  ;;  %v7869_v51 = vsub.s32 0, %v5681_v50  ;;  %s5415_s23 = smov 16  }
  0x60   : > { %s5622_s26 = scalar_lea.vmem %s7849_s0, %s4237_s16  ;;  %855 = vmatpush1.bf16.msra.mxu1 %v722_v48  ;;  %s507_s22 = sand.u32 1, %s5388_s14  }
  0x61   : > { %v519_v18 = vld [vmem:[%s5622_s26] sm:$0xff]  ;;  %v520_v19 = vld [vmem:[%s5622_s26 + $0x8] sm:$0xff]  ;;  %v521_v24 = vld [vmem:[%s5622_s26 + $0x10] sm:$0xff]  ;;  %v5689_v54 = vrot.slane %v5684_v52, %v7869_v51  ;;  %s4352_s25 = sshll.u32 %s5505_s19, 11  ;;  %s7802_s19 = scalar_lea.sflag [#allocation5], %s507_s22 }
  0x62   : > { %v647_v23 = vpack.c.bf16 %v520_v19, %v519_v18  ;;  %v522_v25 = vld [vmem:[%s5622_s26 + $0x18] sm:$0xff]  ;;  %v523_v27 = vld [vmem:[%s5622_s26 + $0x20] sm:$0xff]  ;;  %v524_v28 = vld [vmem:[%s5622_s26 + $0x28] sm:$0xff]  ;;  %v7867_v18 = vsub.s32 1, %v5681_v50  ;;  %p8120_p10 = scmp.ne.s32.totalorder %s7954_s29, 0 }
  0x63   : > { %v648_v26 = vpack.c.bf16 %v522_v25, %v521_v24  ;;  %v649_v29 = vpack.c.bf16 %v524_v28, %v523_v27  ;;  %v525_v30 = vld [vmem:[%s5622_s26 + $0x30] sm:$0xff]  ;;  %v526_v31 = vld [vmem:[%s5622_s26 + $0x38] sm:$0xff]  ;;  %v527_v33 = vld [vmem:[%s5622_s26 + $0x40] sm:$0xff] }
  0x64   : > { %4259 = vmatmul.mubr.msk.bf16.vlgmr.msra.gmra.mxu0 %vm689_vm1, %v647_v23  ;;  %v650_v32 = vpack.c.bf16 %v526_v31, %v525_v30  ;;  %v528_v34 = vld [vmem:[%s5622_s26 + $0x48] sm:$0xff]  ;;  %v529_v36 = vld [vmem:[%s5622_s26 + $0x50] sm:$0xff]  ;;  %v530_v37 = vld [vmem:[%s5622_s26 + $0x58] sm:$0xff]  ;;  %4268 = vmatmul.mubr.msk.bf16.vlgmr.msra.gmra.mxu1 %vm689_vm1, %v647_v23  ;;  %v666_v21 = vrot.slane %v5684_v52, %v7867_v18 }
  0x65   : > { %769 = vmatprep.mubr.bf16.mxu0 %v7871_v16  ;;  %v651_v35 = vpack.c.bf16 %v528_v34, %v527_v33  ;;  %v652_v38 = vpack.c.bf16 %v530_v37, %v529_v36  ;;  %v531_v39 = vld [vmem:[%s5622_s26 + $0x60] sm:$0xff]  ;;  %v532_v40 = vld [vmem:[%s5622_s26 + $0x68] sm:$0xff]  ;;  %v533_v42 = vld [vmem:[%s5622_s26 + $0x70] sm:$0xff]  ;;  %882 = vmatprep.mubr.bf16.mxu1 %v7871_v16 }
  0x66   : > { %v653_v41 = vpack.c.bf16 %v532_v40, %v531_v39  ;;  %v534_v43 = vld [vmem:[%s5622_s26 + $0x78] sm:$0xff]  ;;  %s5416_s26 = smov [#allocation8]  }
  0x67   : > { %v654_v44 = vpack.c.bf16 %v534_v43, %v533_v42  ;;  %s5324_s27 = sshll.u32 %s5416_s26, 4  ;;  %s5325_s27 = int_to_ptr.vmem [resolvable:$false] %s5324_s27 }
  0x68   : > { %s5326_s12 = scalar_lea.vmem %s5325_s27, 4096 }
  0x6c   : > { %4260 = vmatmul.mubr.msk.bf16.gmra.mxu0 %vm689_vm1, %v648_v26  ;;  %4269 = vmatmul.mubr.msk.bf16.gmra.mxu1 %vm689_vm1, %v648_v26 }
  0x6d   : > { %779 = vmatprep.mubr.bf16.mxu0 %v7871_v16  ;;  %892 = vmatprep.mubr.bf16.mxu1 %v7871_v16 }
  0x74   : > { %4261 = vmatmul.mubr.msk.bf16.gmra.mxu0 %vm689_vm1, %v649_v29  ;;  %4270 = vmatmul.mubr.msk.bf16.gmra.mxu1 %vm689_vm1, %v649_v29 }
  0x75   : > { %789 = vmatprep.mubr.bf16.mxu0 %v7871_v16  ;;  %902 = vmatprep.mubr.bf16.mxu1 %v7871_v16 }
  0x7c   : > { %4262 = vmatmul.mubr.msk.bf16.gmra.mxu0 %vm689_vm1, %v650_v32  ;;  %4271 = vmatmul.mubr.msk.bf16.gmra.mxu1 %vm689_vm1, %v650_v32 }
  0x7d   : > { %799 = vmatprep.mubr.bf16.mxu0 %v7871_v16  ;;  %912 = vmatprep.mubr.bf16.mxu1 %v7871_v16 }
  0x84   : > { %4263 = vmatmul.mubr.msk.bf16.gmra.mxu0 %vm689_vm1, %v651_v35  ;;  %4272 = vmatmul.mubr.msk.bf16.gmra.mxu1 %vm689_vm1, %v651_v35 }
  0x85   : > { %809 = vmatprep.mubr.bf16.mxu0 %v7871_v16  ;;  %922 = vmatprep.mubr.bf16.mxu1 %v7871_v16 }
  0x8c   : > { %4264 = vmatmul.mubr.msk.bf16.gmra.mxu0 %vm689_vm1, %v652_v38  ;;  %4273 = vmatmul.mubr.msk.bf16.gmra.mxu1 %vm689_vm1, %v652_v38 }
  0x8d   : > { %819 = vmatprep.mubr.bf16.mxu0 %v7871_v16  ;;  %932 = vmatprep.mubr.bf16.mxu1 %v7871_v16 }
  0x94   : > { %4265 = vmatmul.mubr.msk.bf16.gmra.mxu0 %vm689_vm1, %v653_v41  ;;  %4274 = vmatmul.mubr.msk.bf16.gmra.mxu1 %vm689_vm1, %v653_v41 }
  0x95   : > { %829 = vmatprep.mubr.bf16.mxu0 %v7871_v16  ;;  %942 = vmatprep.mubr.bf16.mxu1 %v7871_v16 }
  0x9c   : > { %4266 = vmatmul.mubr.msk.bf16.gmra.mxu0 %vm689_vm1, %v654_v44  ;;  %4275 = vmatmul.mubr.msk.bf16.gmra.mxu1 %vm689_vm1, %v654_v44 }
 0x124   : > { %v761_v53 = vpop.f32.mrf.mxu0 }
 0x125   : > { %v762_v57 = vadd.f32 %v761_v53, %v5689_v54 }
 0x126   : > { %v763_v55 = vpop.f32.mrf.mxu0 }
 0x127   : > { %v764_v39 = vadd.f32 %v763_v55, %v666_v21 }
 0x128   : > { %v765_v56 = vpop.f32.mrf.mxu0 }
 0x129   : > { %v766_v58 = vadd.f32 %v765_v56, %v5689_v54 }
 0x12a   : > { %v767_v59 = vpop.f32.mrf.mxu0 }
 0x12b   : > { %v5693_v60 = vpack.c.bf16 %v766_v58, %v762_v57  ;;  %v768_v36 = vadd.f32 %v767_v59, %v666_v21 }
 0x12c   : > { %v771_v61 = vpop.f32.mrf.mxu0 }
 0x12d   : > { %4536 = vmatprep.mubr.msk.bf16.mxu0 %vm977_vm2, %v5693_v60  ;;  %v5726_v41 = vpack.c.bf16 %v768_v36, %v764_v39  ;;  %v772_v47 = vadd.f32 %v771_v61, %v5689_v54 }
 0x12e   : > { %v5697_v62 = vpop.f32.mrf.mxu0 }
 0x130   : > { %v775_v63 = vpop.f32.mrf.mxu0 }
 0x131   : > { %v776_v42 = vadd.f32 %v775_v63, %v5689_v54 }
 0x132   : > { %v5699_v0 = vpop.f32.mrf.mxu0 }
 0x133   : > { %v5732_v55 = vpack.c.bf16 %v776_v42, %v772_v47 }
 0x134   : > { %v781_v1 = vpop.f32.mrf.mxu0 }
 0x135   : > { %v782_v2 = vadd.f32 %v781_v1, %v5689_v54 }
 0x136   : > { %v783_v3 = vpop.f32.mrf.mxu0 }
 0x137   : > { %v784_v34 = vadd.f32 %v783_v3, %v666_v21 }
 0x138   : > { %v785_v4 = vpop.f32.mrf.mxu0 }
 0x139   : > { %v786_v5 = vadd.f32 %v785_v4, %v5689_v54  ;;  %v778_v4 = vadd.f32 %v5699_v0, %v666_v21 }
 0x13a   : > { %v787_v6 = vpop.f32.mrf.mxu0 }
 0x13b   : > { %v5703_v7 = vpack.c.bf16 %v786_v5, %v782_v2  ;;  %v788_v31 = vadd.f32 %v787_v6, %v666_v21 }
 0x13c   : > { %v791_v8 = vpop.f32.mrf.mxu0 }
 0x13d   : > { %v5722_v37 = vpack.c.bf16 %v788_v31, %v784_v34  ;;  %v792_v59 = vadd.f32 %v791_v8, %v5689_v54 }
 0x13e   : > { %v793_v9 = vpop.f32.mrf.mxu0 }
 0x13f   : > { %v794_v2 = vadd.f32 %v793_v9, %v666_v21 }
 0x140   : > { %v795_v10 = vpop.f32.mrf.mxu0 }
 0x141   : > { %v796_v56 = vadd.f32 %v795_v10, %v5689_v54  ;;  %v774_v10 = vadd.f32 %v5697_v62, %v666_v21  ;;  %v7868_v62 = vsub.s32 2, %v5681_v50 }
 0x142   : > { %v797_v11 = vpop.f32.mrf.mxu0 }
 0x143   : > { %v798_v61 = vadd.f32 %v797_v11, %v666_v21  ;;  %v5742_v63 = vpack.c.bf16 %v796_v56, %v792_v59  ;;  %v1003_v56 = vsel %vm977_vm2, %v5726_v41, 0 }
 0x144   : > { %v5705_v12 = vpop.f32.mrf.mxu0 }
 0x145   : > { %v964_v5 = vpack.c.bf16 %v798_v61, %v794_v2 }
 0x146   : > { %v803_v13 = vpop.f32.mrf.mxu0 }
 0x147   : > { %v804_v29 = vadd.f32 %v803_v13, %v666_v21  ;;  %v962_v13 = vpack.c.bf16 %v778_v4, %v774_v10 }
 0x148   : > { %v5707_v14 = vpop.f32.mrf.mxu0 }
 0x14a   : > { %v807_v15 = vpop.f32.mrf.mxu0 }
 0x14b   : > { %v808_v26 = vadd.f32 %v807_v15, %v666_v21 }
 0x14c   : > { %v811_v17 = vpop.f32.mrf.mxu0 }
 0x14d   : > { %v5718_v32 = vpack.c.bf16 %v808_v26, %v804_v29  ;;  %v812_v3 = vadd.f32 %v811_v17, %v5689_v54  ;;  %v806_v17 = vadd.f32 %v5707_v14, %v5689_v54 }
 0x14e   : > { %v813_v19 = vpop.f32.mrf.mxu0 }
 0x14f   : > { %v814_v23 = vadd.f32 %v813_v19, %v666_v21  ;;  %v874_v19 = vpop.f32.mrf.mxu1 }
 0x150   : > { %v815_v20 = vpop.f32.mrf.mxu0 }
 0x151   : > { %v816_v1 = vadd.f32 %v815_v20, %v5689_v54  ;;  %v5776_v20 = vrot.slane %v5684_v52, %v7868_v62 }
 0x152   : > { %v817_v22 = vpop.f32.mrf.mxu0 }
 0x153   : > { %v818_v24 = vadd.f32 %v817_v22, %v666_v21  ;;  %v5750_v6 = vpack.c.bf16 %v816_v1, %v812_v3  ;;  %v875_v22 = vadd.f32 %v874_v19, %v5776_v20 }
 0x154   : > { %v5713_v25 = vpop.f32.mrf.mxu0 }
 0x155   : > { %v966_v27 = vpack.c.bf16 %v818_v24, %v814_v23  ;;  %v822_v52 = vadd.f32 %v5713_v25, %v5689_v54 }
 0x156   : > { %v823_v28 = vpop.f32.mrf.mxu0 }
 0x157   : > { %1446 = vrot.lane.b32.xlu1 %v966_v27, %s5411_s24  ;;  %v824_v48 = vadd.f32 %v823_v28, %v666_v21  ;;  %v1018_v15 = vsel %vm977_vm2, %v966_v27, 0 }
 0x158   : > { %v5716_v30 = vpop.f32.mrf.mxu0 }
 0x159   : > { %v826_v23 = vadd.f32 %v5716_v30, %v5689_v54 }
 0x15a   : > { %v827_v33 = vpop.f32.mrf.mxu0 }
 0x15b   : > { %1444 = vrot.lane.b32.xlu1 %v5718_v32, %s5411_s24  ;;  %v828_v44 = vadd.f32 %v827_v33, %v666_v21  ;;  %v959_v29 = vpack.c.bf16 %v826_v23, %v822_v52 }
 0x15c   : > { %v831_v35 = vpop.f32.mrf.mxu0 }
 0x15d   : > { %v967_v57 = vpack.c.bf16 %v828_v44, %v824_v48  ;;  %v832_v11 = vadd.f32 %v831_v35, %v5689_v54 }
 0x15e   : > { %v833_v38 = vpop.f32.mrf.mxu0 }
 0x15f   : > { %1440 = vrot.lane.b32.xlu1 %v5722_v37, %s5411_s24  ;;  %v834_v45 = vadd.f32 %v833_v38, %v666_v21  ;;  %v1021_v9 = vsel %vm977_vm2, %v967_v57, 0 }
 0x160   : > { %v835_v40 = vpop.f32.mrf.mxu0 }
 0x161   : > { %v836_v8 = vadd.f32 %v835_v40, %v5689_v54  ;;  %v1009_v40 = vsel %vm977_vm2, %v5722_v37, 0 }
 0x162   : > { %v837_v43 = vpop.f32.mrf.mxu0 }
 0x163   : > { %v838_v46 = vadd.f32 %v837_v43, %v666_v21  ;;  %1436 = vrot.lane.b32.xlu1 %v5726_v41, %s5411_s24  ;;  %v5760_v0 = vpack.c.bf16 %v836_v8, %v832_v11  ;;  %v802_v21 = vadd.f32 %v5705_v12, %v5689_v54  ;;  %v1015_v12 = vsel %vm977_vm2, %v5718_v32, 0 }
 0x165   : > { %v968_v53 = vpack.c.bf16 %v838_v46, %v834_v45  ;;  %v957_v14 = vpack.c.bf16 %v806_v17, %v802_v21  ;;  %v1006_v46 = vsel %vm977_vm2, %v962_v13, 0 }
 0x167   : > { %1450 = vrot.lane.b32.xlu0 %v968_v53, %s5411_s24  ;;  %4776 = vmatprep.subr.msk.bf16.mxu0 %vm977_vm2, %v968_v53  ;;  %v1024_v58 = vsel %vm977_vm2, %v968_v53, 0 }
 0x168   : > { %1414 = vrot.lane.b32.xlu1 %v5732_v55, %s5411_s24  ;;  %4521 = vmatpush3.bf16.xpose.msra.mxu0 %v1024_v58 }
 0x169   : > { %4777 = vmatprep.subr.msk.bf16.mxu0 %vm977_vm2, %v967_v57 }
 0x16b   : > { %1448 = vrot.lane.b32.xlu0 %v967_v57, %s5411_s24 }
 0x16c   : > { %1418 = vrot.lane.b32.xlu1 %v5742_v63, %s5411_s24 }
 0x16f   : > { %1442 = vrot.lane.b32.xlu0 %v964_v5, %s5411_s24 }
 0x170   : > { %1422 = vrot.lane.b32.xlu1 %v5750_v6, %s5411_s24  ;;  %4523 = vmatpush3.bf16.xpose.msra.mxu0 %v1021_v9 }
 0x171   : > { %4778 = vmatprep.subr.msk.bf16.mxu0 %vm977_vm2, %v966_v27 }
 0x173   : > { %1438 = vrot.lane.b32.xlu0 %v962_v13, %s5411_s24 }
 0x174   : > { %1426 = vrot.lane.b32.xlu1 %v5760_v0, %s5411_s24 }
 0x177   : > { %1412 = vrot.lane.b32.xlu0 %v5693_v60, %s5411_s24  ;;  %v5782_v60 = vpop.f32.mrf.mxu1 }
 0x178   : > { %4525 = vmatpush3.bf16.xpose.msra.mxu0 %v1018_v15  ;;  %7967 = vst [vmem:[#allocation18_spill] sm:$0xff] %v5782_v60 }
 0x179   : > { %4779 = vmatprep.subr.msk.bf16.mxu0 %vm977_vm2, %v5718_v32  ;;  %v878_v24 = vpop.f32.mrf.mxu1  ;;  %v1012_v32 = vsel %vm977_vm2, %v964_v5, 0 }
 0x17a   : > { %v879_v26 = vadd.f32 %v878_v24, %v5776_v20 }
 0x17b   : > { %1416 = vrot.lane.b32.xlu0 %v5703_v7, %s5411_s24  ;;  %v5793_v27 = vpop.f32.mrf.mxu1 }
 0x17c   : > { %7968 = vst [vmem:[#allocation19_spill] sm:$0xff] %v5793_v27  ;;  %v5795_v28 = vpack.c.bf16 %v879_v26, %v875_v22 }
 0x17d   : > { %v884_v30 = vpop.f32.mrf.mxu1 }
 0x17e   : > { %v885_v54 = vadd.f32 %v884_v30, %v5776_v20 }
 0x17f   : > { %1420 = vrot.lane.b32.xlu0 %v957_v14, %s5411_s24  ;;  %v5799_v31 = vpop.f32.mrf.mxu1 }
 0x180   : > { %4527 = vmatpush3.bf16.xpose.msra.mxu0 %v1015_v12  ;;  %7969 = vst [vmem:[#allocation20_spill] sm:$0xff] %v5799_v31 }
 0x181   : > { %4780 = vmatprep.subr.msk.bf16.mxu0 %vm977_vm2, %v964_v5  ;;  %v888_v25 = vpop.f32.mrf.mxu1 }
 0x182   : > { %v889_v33 = vadd.f32 %v888_v25, %v5776_v20 }
 0x183   : > { %1424 = vrot.lane.b32.xlu0 %v959_v29, %s5411_s24  ;;  %v5804_v34 = vpop.f32.mrf.mxu1 }
 0x184   : > { %7970 = vst [vmem:[#allocation21_spill] sm:$0xff] %v5804_v34  ;;  %v5806_v35 = vpack.c.bf16 %v889_v33, %v885_v54 }
 0x185   : > { %v894_v36 = vpop.f32.mrf.mxu1 }
 0x186   : > { %v895_v24 = vadd.f32 %v894_v36, %v5776_v20 }
 0x187   : > { %v5810_v38 = vpop.f32.mrf.mxu1 }
 0x188   : > { %4529 = vmatpush3.bf16.xpose.msra.mxu0 %v1012_v32  ;;  %7971 = vst [vmem:[#allocation22_spill] sm:$0xff] %v5810_v38 }
 0x189   : > { %4781 = vmatprep.subr.msk.bf16.mxu0 %vm977_vm2, %v5722_v37  ;;  %v898_v39 = vpop.f32.mrf.mxu1 }
 0x18a   : > { %v899_v26 = vadd.f32 %v898_v39, %v5776_v20 }
 0x18b   : > { %v5814_v42 = vpop.f32.mrf.mxu1 }
 0x18c   : > { %7972 = vst [vmem:[#allocation23_spill] sm:$0xff] %v5814_v42 }
 0x18d   : > { %v904_v43 = vpop.f32.mrf.mxu1 }
 0x18f   : > { %v5817_v44 = vpop.f32.mrf.mxu1 }
 0x190   : > { %4531 = vmatpush3.bf16.xpose.msra.mxu0 %v1009_v40  ;;  %7973 = vst [vmem:[#allocation24_spill] sm:$0xff] %v5817_v44 }
 0x191   : > { %4782 = vmatprep.subr.msk.bf16.mxu0 %vm977_vm2, %v962_v13  ;;  %v908_v45 = vpop.f32.mrf.mxu1 }
 0x193   : > { %v5820_v47 = vpop.f32.mrf.mxu1 }
 0x194   : > { %7974 = vst [vmem:[#allocation25_spill] sm:$0xff] %v5820_v47 }
 0x195   : > { %v914_v48 = vpop.f32.mrf.mxu1 }
 0x196   : > { %v915_v21 = vadd.f32 %v914_v48, %v5776_v20 }
 0x197   : > { %v5824_v53 = vpop.f32.mrf.mxu1 }
 0x198   : > { %4533 = vmatpush3.bf16.xpose.msra.mxu0 %v1006_v46  ;;  %7975 = vst [vmem:[#allocation26_spill] sm:$0xff] %v5824_v53 }
 0x199   : > { %4783 = vmatprep.subr.msk.bf16.mxu0 %vm977_vm2, %v5726_v41  ;;  %v918_v37 = vpop.f32.mrf.mxu1 }
 0x19a   : > { %v919_v22 = vadd.f32 %v918_v37, %v5776_v20 }
 0x19b   : > { %v5828_v57 = vpop.f32.mrf.mxu1 }
 0x19c   : > { %7976 = vst [vmem:[#allocation27_spill] sm:$0xff] %v5828_v57  ;;  %v973_v23 = vpack.c.bf16 %v919_v22, %v915_v21  ;;  %v5918_v21 = vld [vmem:[%s5606_s28 + $0x18] sm:$0xff]  }
 0x19d   : > { %v924_v58 = vpop.f32.mrf.mxu1 }
 0x19e   : > { %v925_v61 = vadd.f32 %v924_v58, %v5776_v20 }
 0x19f   : > { %v5830_v59 = vpop.f32.mrf.mxu1 }
 0x1a0   : > { %4535 = vmatpush3.bf16.xpose.msra.mxu0 %v1003_v56  ;;  %7977 = vst [vmem:[#allocation28_spill] sm:$0xff] %v5830_v59 }
 0x1a1   : > { %v928_v1 = vpop.f32.mrf.mxu1 }
 0x1a2   : > { %v929_v2 = vadd.f32 %v928_v1, %v5776_v20 }
 0x1a3   : > { %v5836_v3 = vpop.f32.mrf.mxu1 }
 0x1a4   : > { %7978 = vst [vmem:[#allocation29_spill] sm:$0xff] %v5836_v3  ;;  %v974_v41 = vpack.c.bf16 %v929_v2, %v925_v61 }
 0x1a5   : > { %v934_v4 = vpop.f32.mrf.mxu1 }
 0x1a6   : > { %1799 = vrot.lane.b32.xlu0 %v974_v41, %s5411_s24  ;;  %v935_v11 = vadd.f32 %v934_v4, %v5776_v20 }
 0x1a7   : > { %4537 = vmatmul.mubr.msk.bf16.vlgmr.msra.gmra.mxu0 %vm977_vm2, %v5732_v55  ;;  %v5841_v5 = vpop.f32.mrf.mxu1 }
 0x1a8   : > { %4540 = vmatprep.mubr.msk.bf16.mxu0 %vm977_vm2, %v5703_v7  ;;  %7979 = vst [vmem:[#allocation30_spill] sm:$0xff] %v5841_v5 }
 0x1a9   : > { %v938_v8 = vpop.f32.mrf.mxu1 }
 0x1aa   : > { %v939_v7 = vadd.f32 %v938_v8, %v5776_v20 }
 0x1ab   : > { %v5845_v10 = vpop.f32.mrf.mxu1 }
 0x1ac   : > { %7980 = vst [vmem:[#allocation31_spill] sm:$0xff] %v5845_v10 }
 0x1ad   : > { %v944_v55 = vpop.f32.mrf.mxu1 }
 0x1ae   : > { %v945_v13 = vadd.f32 %v944_v55, %v5776_v20 }
 0x1af   : > { %4541 = vmatmul.mubr.msk.bf16.gmra.mxu0 %vm977_vm2, %v5742_v63  ;;  %v5848_v9 = vpop.f32.mrf.mxu1  ;;  %v975_v63 = vpack.c.bf16 %v939_v7, %v935_v11  ;;  %v5906_v11 = vld [vmem:[%s5606_s28 + $0x8] sm:$0xff]  }
 0x1b0   : > { %4544 = vmatprep.mubr.msk.bf16.mxu0 %vm977_vm2, %v957_v14  ;;  %7981 = vst [vmem:[#allocation32_spill] sm:$0xff] %v5848_v9  ;;  %v909_v14 = vadd.f32 %v908_v45, %v5776_v20  ;;  %v7884_v7 = vunpack.c.l.bf16 %v5906_v11 }
 0x1b1   : > { %v948_v15 = vpop.f32.mrf.mxu1 }
 0x1b2   : > { %v949_v17 = vadd.f32 %v948_v15, %v5776_v20  ;;  %v4240_v15 = vadd.f32 -1.0, %v7884_v7 }
 0x1b4   : > { %v976_v19 = vpack.c.bf16 %v949_v17, %v945_v13  ;;  %v5910_v13 = vld [vmem:[%s5606_s28] sm:$0xff]   ;;  %v5920_v22 = vmul.f32 1e+30, %v4240_v15 }
 0x1b5   : > { %v7885_v17 = vunpack.c.l.bf16 %v5910_v13  ;;  %v5965_v15 = vld [vmem:[%s5606_s28 + $0x20] sm:$0xff]  }
 0x1b6   : > { %4552 = vmatprep.subr.bf16.mxu1 %v976_v19  ;;  %1803 = vrot.lane.b32.xlu1 %v976_v19, %s5411_s24  ;;  %7982 = vst [vmem:[#allocation33_spill] sm:$0xff] %v5920_v22  ;;  %v7880_v18 = vunpack.c.h.bf16 %v5965_v15 }
 0x1b7   : > { %4545 = vmatmul.mubr.msk.bf16.gmra.mxu0 %vm977_vm2, %v5750_v6  ;;  %4553 = vmatpush3.bf16.msra.mxu1 %v976_v19  ;;  %v905_v6 = vadd.f32 %v904_v43, %v5776_v20  ;;  %v7879_v19 = vunpack.c.h.bf16 %v5906_v11 }
 0x1b8   : > { %4548 = vmatprep.mubr.msk.bf16.mxu0 %vm977_vm2, %v959_v29  ;;  %4554 = vmatprep.subr.bf16.mxu1 %v975_v63 }
 0x1b9   : > { %v972_v52 = vpack.c.bf16 %v909_v14, %v905_v6  ;;  %v4238_v6 = vadd.f32 -1.0, %v7885_v17 }
 0x1ba   : > { %1801 = vrot.lane.b32.xlu1 %v975_v63, %s5411_s24 }
 0x1bb   : > { %4555 = vmatpush3.bf16.msra.mxu1 %v975_v63  ;;  %v7882_v63 = vunpack.c.h.bf16 %v5910_v13 }
 0x1bc   : > { %4556 = vmatprep.subr.bf16.mxu1 %v974_v41 }
 0x1be   : > { %1797 = vrot.lane.b32.xlu1 %v973_v23, %s5411_s24 }
 0x1bf   : > { %4549 = vmatmul.mubr.msk.bf16.gmra.mxu0 %vm977_vm2, %v5760_v0  ;;  %4557 = vmatpush3.bf16.msra.mxu1 %v974_v41  ;;  %v5869_v0 = vpack.c.bf16 %v899_v26, %v895_v24  ;;  %v4239_v24 = vadd.f32 -1.0, %v7882_v63  ;;  %v7878_v26 = vunpack.c.l.bf16 %v5918_v21 }
 0x1c0   : > { %4558 = vmatprep.subr.bf16.mxu1 %v973_v23 }
 0x1c2   : > { %1795 = vrot.lane.b32.xlu1 %v972_v52, %s5411_s24 }
 0x1c3   : > { %4559 = vmatpush3.bf16.msra.mxu1 %v973_v23 }
 0x1c4   : > { %4560 = vmatprep.subr.bf16.mxu1 %v972_v52 }
 0x1c7   : > { %4561 = vmatpush3.bf16.msra.mxu1 %v972_v52  ;;  %v5928_v52 = vld [vmem:[%s5606_s28 + $0x10] sm:$0xff]  }
 0x1c8   : > { %4562 = vmatprep.subr.bf16.mxu1 %v5869_v0 }
 0x1c9   : > { %v1447_v25 = vpop.permute.xlu1 %1446 }
 0x1ca   : > { %v1492_v36 = vsel %vm977_vm2, %v1447_v25, 0 }
 0x1cb   : > { %4563 = vmatpush3.bf16.msra.mxu1 %v5869_v0 }
 0x1cc   : > { %4564 = vmatprep.subr.bf16.mxu1 %v5806_v35 }
 0x1cd   : > { %v1445_v39 = vpop.permute.xlu1 %1444 }
 0x1ce   : > { %v1489_v40 = vsel %vm977_vm2, %v1445_v39, 0 }
 0x1cf   : > { %4565 = vmatpush3.bf16.msra.mxu1 %v5806_v35 }
 0x1d0   : > { %4566 = vmatprep.subr.bf16.mxu1 %v5795_v28 }
 0x1d1   : > { %v1441_v45 = vpop.permute.xlu1 %1440 }
 0x1d2   : > { %v1483_v46 = vsel %vm977_vm2, %v1441_v45, 0 }
 0x1d3   : > { %4567 = vmatpush3.bf16.msra.mxu1 %v5795_v28 }
 0x1d5   : > { %v1437_v37 = vpop.permute.xlu1 %1436 }
 0x1d6   : > { %v1477_v56 = vsel %vm977_vm2, %v1437_v37, 0 }
 0x1d9   : > { %v1451_v20 = vpop.permute.xlu0 %1450 }
 0x1da   : > { %4784 = vmatprep.subr.msk.bf16.mxu0 %vm977_vm2, %v1451_v20  ;;  %v1498_v12 = vsel %vm977_vm2, %v1451_v20, 0  ;;  %v1415_v58 = vpop.permute.xlu1 %1414 }
 0x1db   : > { %4585 = vmatpush3.bf16.xpose.msra.mxu0 %v1498_v12  ;;  %v4241_v12 = vadd.f32 -1.0, %v7879_v19 }
 0x1dd   : > { %v1449_v29 = vpop.permute.xlu0 %1448 }
 0x1de   : > { %4785 = vmatprep.subr.msk.bf16.mxu0 %vm977_vm2, %v1449_v29  ;;  %v1495_v54 = vsel %vm977_vm2, %v1449_v29, 0  ;;  %v1419_v1 = vpop.permute.xlu1 %1418  ;;  %v7874_v29 = vunpack.c.h.bf16 %v5918_v21 }
 0x1e1   : > { %v1443_v30 = vpop.permute.xlu0 %1442 }
 0x1e2   : > { %v1486_v43 = vsel %vm977_vm2, %v1443_v30, 0  ;;  %v1423_v2 = vpop.permute.xlu1 %1422 }
 0x1e3   : > { %4587 = vmatpush3.bf16.xpose.msra.mxu0 %v1495_v54 }
 0x1e4   : > { %4786 = vmatprep.subr.msk.bf16.mxu0 %vm977_vm2, %v1447_v25  ;;  %v5936_v25 = vmul.f32 1e+30, %v4238_v6 }
 0x1e5   : > { %v1439_v33 = vpop.permute.xlu0 %1438 }
 0x1e6   : > { %v1480_v48 = vsel %vm977_vm2, %v1439_v33, 0  ;;  %v1427_v4 = vpop.permute.xlu1 %1426  ;;  %7983 = vst [vmem:[#allocation34_spill] sm:$0xff] %v5936_v25 }
 0x1e9   : > { %v1413_v32 = vpop.permute.xlu0 %1412 }
 0x1ea   : > { %4600 = vmatprep.mubr.msk.bf16.mxu0 %vm977_vm2, %v1413_v32  ;;  %v7881_v32 = vunpack.c.l.bf16 %v5928_v52 }
 0x1eb   : > { %4589 = vmatpush3.bf16.xpose.msra.mxu0 %v1492_v36  ;;  %v5940_v36 = vmul.f32 1e+30, %v4239_v24 }
 0x1ec   : > { %4787 = vmatprep.subr.msk.bf16.mxu0 %vm977_vm2, %v1445_v39  ;;  %v4244_v39 = vadd.f32 -1.0, %v7878_v26 }
 0x1ed   : > { %v1417_v61 = vpop.permute.xlu0 %1416  ;;  %7984 = vst [vmem:[#allocation35_spill] sm:$0xff] %v5940_v36 }
 0x1f1   : > { %v1421_v41 = vpop.permute.xlu0 %1420 }
 0x1f3   : > { %4591 = vmatpush3.bf16.xpose.msra.mxu0 %v1489_v40 }
 0x1f4   : > { %4788 = vmatprep.subr.msk.bf16.mxu0 %vm977_vm2, %v1443_v30 }
 0x1f5   : > { %v1425_v8 = vpop.permute.xlu0 %1424 }
 0x1fb   : > { %4593 = vmatpush3.bf16.xpose.msra.mxu0 %v1486_v43  ;;  %v5944_v43 = vmul.f32 1e+30, %v4241_v12 }
 0x1fc   : > { %4789 = vmatprep.subr.msk.bf16.mxu0 %vm977_vm2, %v1441_v45  ;;  %v4245_v45 = vadd.f32 -1.0, %v7874_v29  ;;  %v6009_v29 = vld [vmem:[%s5606_s28 + $0x30] sm:$0xff]  }
 0x1fd   : > { %7985 = vst [vmem:[#allocation36_spill] sm:$0xff] %v5944_v43 }
 0x203   : > { %4595 = vmatpush3.bf16.xpose.msra.mxu0 %v1483_v46  ;;  %v5949_v46 = vld [vmem:[%s5606_s28 + $0x28] sm:$0xff]  }
 0x204   : > { %4790 = vmatprep.subr.msk.bf16.mxu0 %vm977_vm2, %v1439_v33 }
 0x20b   : > { %4597 = vmatpush3.bf16.xpose.msra.mxu0 %v1480_v48 }
 0x20c   : > { %4791 = vmatprep.subr.msk.bf16.mxu0 %vm977_vm2, %v1437_v37 }
 0x213   : > { %4599 = vmatpush3.bf16.xpose.msra.mxu0 %v1477_v56 }
 0x21a   : > { %4601 = vmatmul.mubr.msk.bf16.vlgmr.msra.gmra.mxu0 %vm977_vm2, %v1415_v58  ;;  %v7877_v58 = vunpack.c.h.bf16 %v5928_v52 }
 0x21b   : > { %4604 = vmatprep.mubr.msk.bf16.mxu0 %vm977_vm2, %v1417_v61 }
 0x21c   : > { %v4243_v24 = vadd.f32 -1.0, %v7877_v58 }
 0x222   : > { %4605 = vmatmul.mubr.msk.bf16.gmra.mxu0 %vm977_vm2, %v1419_v1  ;;  %v4242_v1 = vadd.f32 -1.0, %v7881_v32 }
 0x223   : > { %4608 = vmatprep.mubr.msk.bf16.mxu0 %vm977_vm2, %v1421_v41 }
 0x228   : > { %v5900_v55 = vpop.permute.xlu1 %1803 }
 0x229   : > { %4616 = vmatprep.subr.bf16.mxu1 %v5900_v55 }
 0x22a   : > { %4609 = vmatmul.mubr.msk.bf16.gmra.mxu0 %vm977_vm2, %v1423_v2 }
 0x22b   : > { %4612 = vmatprep.mubr.msk.bf16.mxu0 %vm977_vm2, %v1425_v8  ;;  %v7873_v8 = vunpack.c.l.bf16 %v5949_v46 }
 0x232   : > { %4613 = vmatmul.mubr.msk.bf16.gmra.mxu0 %vm977_vm2, %v1427_v4  ;;  %v5961_v4 = vmul.f32 1e+30, %v4244_v39 }
 0x233   : > { %2681 = vmatprep.mubr.bf16.mxu0 %v7871_v16 }
 0x234   : > { %7986 = vst [vmem:[#allocation37_spill] sm:$0xff] %v5961_v4 }
 0x267   : > { %v4538_v14 = vpop.f32.mrf.mxu0 }
 0x268   : > { %v1125_v23 = vmul.f32 0.17677669, %v4538_v14 }
 0x269   : > { %v1060_v20 = vpop.f32.mrf.mxu0 }
 0x26a   : > { %v1123_v30 = vmul.f32 0.17677669, %v1060_v20  ;;  %v5934_v54 = vadd.f32 %v1125_v23, %v5920_v22  ;;  %v5971_v23 = vmul.f32 1e+30, %v4245_v45  ;;  %v7875_v20 = vunpack.c.h.bf16 %v5949_v46 }
 0x26b   : > { %v4539_v33 = vpop.f32.mrf.mxu0  ;;  %v4248_v45 = vadd.f32 -1.0, %v7873_v8 }
 0x26c   : > { %1159 = vmax.xlane.f32.xlu0 %v5934_v54  ;;  %v1126_v48 = vmul.f32 0.17677669, %v4539_v33  ;;  %v5952_v56 = vadd.f32 %v1123_v30, %v5936_v25  ;;  %7987 = vst [vmem:[#allocation38_spill] sm:$0xff] %v5971_v23  ;;  %v5976_v30 = vmul.f32 1e+30, %v4242_v1  ;;  %v7876_v33 = vunpack.c.l.bf16 %v5965_v15 }
 0x26d   : > { %v1063_v40 = vpop.f32.mrf.mxu0  ;;  %v6004_v8 = vmul.f32 1e+30, %v4248_v45 }
 0x26e   : > { %v1124_v37 = vmul.f32 0.17677669, %v1063_v40  ;;  %v5969_v14 = vadd.f32 %v1126_v48, %v5944_v43  ;;  %7988 = vst [vmem:[#allocation39_spill] sm:$0xff] %v5976_v30  ;;  %v5986_v48 = vld [vmem:[%s5606_s28 + $0x38] sm:$0xff]   ;;  %v4246_v51 = vadd.f32 -1.0, %v7876_v33 }
 0x26f   : > { %v4542_v61 = vpop.f32.mrf.mxu0  ;;  %7989 = vst [vmem:[#allocation40_spill] sm:$0xff] %v5986_v48  ;;  %v7883_v49 = vunpack.c.l.bf16 %v5986_v48  ;;  %7991 = vst [vmem:[#allocation42_spill] sm:$0xff] %v6004_v8 }
 0x270   : > { %v1129_v2 = vmul.f32 0.17677669, %v4542_v61  ;;  %1155 = vmax.xlane.f32.xlu0 %v5952_v56  ;;  %v5959_v41 = vadd.f32 %v1124_v37, %v5940_v36 }
 0x271   : > { %v1076_v6 = vpop.f32.mrf.mxu0  ;;  %v4252_v45 = vadd.f32 -1.0, %v7883_v49 }
 0x272   : > { %1157 = vmax.xlane.f32.xlu1 %v5959_v41  ;;  %v1127_v39 = vmul.f32 0.17677669, %v1076_v6  ;;  %v5981_v37 = vadd.f32 %v1129_v2, %v5961_v4  ;;  %v4249_v2 = vadd.f32 -1.0, %v7875_v20 }
 0x273   : > { %v4543_v12 = vpop.f32.mrf.mxu0 }
 0x274   : > { %v1130_v40 = vmul.f32 0.17677669, %v4543_v12  ;;  %1161 = vmax.xlane.f32.xlu0 %v5969_v14  ;;  %v5993_v12 = vmul.f32 1e+30, %v4243_v24  ;;  %v4247_v24 = vadd.f32 -1.0, %v7880_v18 }
 0x275   : > { %v1079_v61 = vpop.f32.mrf.mxu0  ;;  %v6015_v33 = vmul.f32 1e+30, %v4249_v2 }
 0x276   : > { %v1128_v1 = vmul.f32 0.17677669, %v1079_v61  ;;  %1167 = vmax.xlane.f32.xlu1 %v5981_v37  ;;  %v5991_v6 = vadd.f32 %v1130_v40, %v5971_v23  ;;  %7990 = vst [vmem:[#allocation41_spill] sm:$0xff] %v5993_v12  ;;  %v6002_v61 = vadd.f32 %v1127_v39, %v5976_v30  ;;  %v6018_v39 = vmul.f32 1e+30, %v4246_v51 }
 0x277   : > { %v4546_v62 = vpop.f32.mrf.mxu0  ;;  %7992 = vst [vmem:[#allocation43_spill] sm:$0xff] %v6015_v33  ;;  %v6027_v2 = vmul.f32 1e+30, %v4247_v24  ;;  %v6040_v24 = vmul.f32 1e+30, %v4252_v45 }
 0x278   : > { %v1133_v16 = vmul.f32 0.17677669, %v4546_v62  ;;  %1169 = vmax.xlane.f32.xlu0 %v5991_v6  ;;  %v6013_v20 = vadd.f32 %v1128_v1, %v5993_v12  ;;  %v7886_v62 = vunpack.c.h.bf16 %v5986_v48  ;;  %7993 = vst [vmem:[#allocation44_spill] sm:$0xff] %v6018_v39  ;;  %v7887_v1 = vunpack.c.l.bf16 %v6009_v29 }
 0x279   : > { %v1092_v40 = vpop.f32.mrf.mxu0  ;;  %7994 = vst [vmem:[#allocation45_spill] sm:$0xff] %v6027_v2  ;;  %7995 = vst [vmem:[#allocation46_spill] sm:$0xff] %v6040_v24 }
 0x27a   : > { %1163 = vmax.xlane.f32.xlu1 %v6002_v61  ;;  %v1131_v26 = vmul.f32 0.17677669, %v1092_v40  ;;  %v6024_v18 = vadd.f32 %v1133_v16, %v6004_v8  ;;  %v4253_v40 = vadd.f32 -1.0, %v7886_v62 }
 0x27b   : > { %v4547_v58 = vpop.f32.mrf.mxu0 }
 0x27c   : > { %v1134_v19 = vmul.f32 0.17677669, %v4547_v58  ;;  %1165 = vmax.xlane.f32.xlu0 %v6013_v20  ;;  %v7888_v58 = vunpack.c.h.bf16 %v6009_v29  ;;  %v6038_v16 = vadd.f32 %v1131_v26, %v6018_v39  ;;  %v6048_v62 = vmul.f32 1e+30, %v4253_v40 }
 0x27d   : > { %v1095_v32 = vpop.f32.mrf.mxu0 }
 0x27e   : > { %v1132_v63 = vmul.f32 0.17677669, %v1095_v32  ;;  %1175 = vmax.xlane.f32.xlu1 %v6024_v18  ;;  %v6031_v51 = vadd.f32 %v1134_v19, %v6015_v33  ;;  %v4250_v32 = vadd.f32 -1.0, %v7887_v1  ;;  %7996 = vst [vmem:[#allocation47_spill] sm:$0xff] %v6048_v62 }
 0x27f   : > { %v4550_v49 = vpop.f32.mrf.mxu0 }
 0x280   : > { %v1137_v7 = vmul.f32 0.17677669, %v4550_v49  ;;  %1177 = vmax.xlane.f32.xlu0 %v6031_v51  ;;  %v6046_v19 = vadd.f32 %v1132_v63, %v6027_v2  ;;  %v4251_v49 = vadd.f32 -1.0, %v7888_v58  ;;  %v6056_v1 = vmul.f32 1e+30, %v4250_v32 }
 0x281   : > { %v1108_v17 = vpop.f32.mrf.mxu0 }
 0x282   : > { %1171 = vmax.xlane.f32.xlu1 %v6038_v16  ;;  %v1135_v5 = vmul.f32 0.17677669, %v1108_v17  ;;  %v6054_v45 = vadd.f32 %v1137_v7, %v6040_v24  ;;  %7997 = vst [vmem:[#allocation48_spill] sm:$0xff] %v6056_v1  ;;  %v6062_v40 = vmul.f32 1e+30, %v4251_v49 }
 0x283   : > { %v4551_v9 = vpop.f32.mrf.mxu0 }
 0x284   : > { %v1138_v26 = vmul.f32 0.17677669, %v4551_v9  ;;  %1173 = vmax.xlane.f32.xlu0 %v6046_v19  ;;  %7998 = vst [vmem:[#allocation49_spill] sm:$0xff] %v6062_v40  ;;  %v6066_v9 = vadd.f32 %v1135_v5, %v6056_v1 }
 0x285   : > { %v1111_v10 = vpop.f32.mrf.mxu0 }
 0x286   : > { %v1136_v3 = vmul.f32 0.17677669, %v1111_v10  ;;  %1183 = vmax.xlane.f32.xlu1 %v6054_v45  ;;  %v6060_v63 = vadd.f32 %v1138_v26, %v6048_v62 }
 0x288   : > { %1185 = vmax.xlane.f32.xlu0 %v6060_v63  ;;  %v6070_v7 = vadd.f32 %v1136_v3, %v6062_v40 }
 0x28a   : > { %1179 = vmax.xlane.f32.xlu1 %v6066_v9 }
 0x28c   : > { %1181 = vmax.xlane.f32.xlu0 %v6070_v7 }
 0x2da   : > { %v4602_v10 = vpop.f32.mrf.mxu0 }
 0x2db   : > { %v1599_v17 = vmul.f32 0.17677669, %v4602_v10 }
 0x2dc   : > { %v1534_v32 = vpop.f32.mrf.mxu0 }
 0x2dd   : > { %v1597_v58 = vmul.f32 0.17677669, %v1534_v32  ;;  %v6074_v26 = vadd.f32 %v1599_v17, %v5920_v22 }
 0x2de   : > { %v4603_v49 = vpop.f32.mrf.mxu0 }
 0x2df   : > { %v1600_v59 = vmul.f32 0.17677669, %v4603_v49  ;;  %1633 = vmax.xlane.f32.xlu1 %v6074_v26  ;;  %v6078_v53 = vadd.f32 %v1597_v58, %v5936_v25 }
 0x2e0   : > { %v1537_v5 = vpop.f32.mrf.mxu0 }
 0x2e1   : > { %v1598_v57 = vmul.f32 0.17677669, %v1537_v5  ;;  %v6081_v3 = vadd.f32 %v1600_v59, %v5944_v43 }
 0x2e2   : > { %v4606_v44 = vpop.f32.mrf.mxu0 }
 0x2e3   : > { %v1603_v47 = vmul.f32 0.17677669, %v4606_v44  ;;  %1629 = vmax.xlane.f32.xlu1 %v6078_v53  ;;  %1635 = vmax.xlane.f32.xlu0 %v6081_v3  ;;  %v6089_v49 = vadd.f32 %v1598_v57, %v5940_v36 }
 0x2e4   : > { %v1550_v10 = vpop.f32.mrf.mxu0 }
 0x2e5   : > { %v1601_v17 = vmul.f32 0.17677669, %v1550_v10  ;;  %v6086_v32 = vadd.f32 %v1603_v47, %v5961_v4  ;;  %v6099_v47 = vpop.permute.xlu1 %1801 }
 0x2e6   : > { %v4607_v5 = vpop.f32.mrf.mxu0 }
 0x2e7   : > { %v1604_v58 = vmul.f32 0.17677669, %v4607_v5  ;;  %1641 = vmax.xlane.f32.xlu1 %v6086_v32  ;;  %1631 = vmax.xlane.f32.xlu0 %v6089_v49  ;;  %v6094_v43 = vadd.f32 %v1601_v17, %v5976_v30 }
 0x2e8   : > { %v1553_v59 = vpop.f32.mrf.mxu0 }
 0x2e9   : > { %v1602_v44 = vmul.f32 0.17677669, %v1553_v59  ;;  %v6097_v25 = vadd.f32 %v1604_v58, %v5971_v23  ;;  %v6111_v58 = vpop.permute.xlu0 %1799  ;;  %v6113_v23 = vpop.permute.xlu1 %1797 }
 0x2ea   : > { %v4610_v10 = vpop.f32.mrf.mxu0 }
 0x2eb   : > { %v1607_v4 = vmul.f32 0.17677669, %v4610_v10  ;;  %1637 = vmax.xlane.f32.xlu1 %v6094_v43  ;;  %1643 = vmax.xlane.f32.xlu0 %v6097_v25  ;;  %v6107_v59 = vadd.f32 %v1602_v44, %v5993_v12 }
 0x2ec   : > { %v1566_v57 = vpop.f32.mrf.mxu0 }
 0x2ed   : > { %v1605_v5 = vmul.f32 0.17677669, %v1566_v57  ;;  %v6104_v36 = vadd.f32 %v1607_v4, %v6004_v8 }
 0x2ee   : > { %v4611_v17 = vpop.f32.mrf.mxu0 }
 0x2ef   : > { %v1608_v30 = vmul.f32 0.17677669, %v4611_v17  ;;  %1649 = vmax.xlane.f32.xlu1 %v6104_v36  ;;  %1639 = vmax.xlane.f32.xlu0 %v6107_v59  ;;  %v6116_v57 = vadd.f32 %v1605_v5, %v6018_v39 }
 0x2f0   : > { %v1569_v10 = vpop.f32.mrf.mxu0 }
 0x2f1   : > { %v1606_v22 = vmul.f32 0.17677669, %v1569_v10  ;;  %v6119_v4 = vadd.f32 %v1608_v30, %v6015_v33  ;;  %v6130_v30 = vpop.permute.xlu1 %1795 }
 0x2f2   : > { %v4614_v44 = vpop.f32.mrf.mxu0 }
 0x2f3   : > { %v1611_v8 = vmul.f32 0.17677669, %v4614_v44  ;;  %1645 = vmax.xlane.f32.xlu1 %v6116_v57  ;;  %1651 = vmax.xlane.f32.xlu0 %v6119_v4  ;;  %v6127_v10 = vadd.f32 %v1606_v22, %v6027_v2 }
 0x2f4   : > { %v1582_v17 = vpop.f32.mrf.mxu0 }
 0x2f5   : > { %v1609_v12 = vmul.f32 0.17677669, %v1582_v17  ;;  %v1160_v38 = vpop.xlane.xlu0 %1159  ;;  %v6124_v42 = vadd.f32 %v1611_v8, %v6040_v24 }
 0x2f6   : > { %v1189_v5 = vsub.f32 %v5934_v54, %v1160_v38  ;;  %v4615_v39 = vpop.f32.mrf.mxu0 }
 0x2f7   : > { %v1612_v33 = vmul.f32 0.17677669, %v4615_v39  ;;  %1657 = vmax.xlane.f32.xlu1 %v6124_v42  ;;  %1647 = vmax.xlane.f32.xlu0 %v6127_v10  ;;  %v6135_v8 = vadd.f32 %v1609_v12, %v6056_v1 }
 0x2f8   : > { %v1207_v44 = vmul.f32 1.442695, %v1189_v5  ;;  %v1585_v27 = vpop.f32.mrf.mxu0 }
 0x2f9   : > { %v1610_v17 = vmul.f32 0.17677669, %v1585_v27  ;;  %v1156_v34 = vpop.xlane.xlu0 %1155  ;;  %v6138_v22 = vadd.f32 %v1612_v33, %v6048_v62 }
 0x2fa   : > { %4946 = vpow2.f32 %v1207_v44  ;;  %v1187_v38 = vsub.f32 %v5952_v56, %v1156_v34 }
 0x2fb   : > { %v1158_v54 = vpop.xlane.xlu1 %1157  ;;  %1653 = vmax.xlane.f32.xlu1 %v6135_v8  ;;  %1659 = vmax.xlane.f32.xlu0 %v6138_v22  ;;  %v6144_v5 = vadd.f32 %v1610_v17, %v6062_v40 }
 0x2fc   : > { %v1203_v39 = vmul.f32 1.442695, %v1187_v38  ;;  %v1188_v27 = vsub.f32 %v5959_v41, %v1158_v54 }
 0x2fd   : > { %v1162_v24 = vpop.xlane.xlu0 %1161 }
 0x2fe   : > { %4948 = vpow2.f32 %v1203_v39  ;;  %v1190_v12 = vsub.f32 %v5969_v14, %v1162_v24  ;;  %v1205_v1 = vmul.f32 1.442695, %v1188_v27 }
 0x2ff   : > { %v1168_v33 = vpop.xlane.xlu1 %1167  ;;  %1655 = vmax.xlane.f32.xlu0 %v6144_v5 }
 0x300   : > { %v1209_v44 = vmul.f32 1.442695, %v1190_v12  ;;  %v1193_v34 = vsub.f32 %v5981_v37, %v1168_v33 }
 0x301   : > { %v1170_v56 = vpop.xlane.xlu0 %1169 }
 0x302   : > { %4950 = vpow2.f32 %v1209_v44  ;;  %v1215_v62 = vmul.f32 1.442695, %v1193_v34  ;;  %v1194_v38 = vsub.f32 %v5991_v6, %v1170_v56 }
 0x303   : > { %v1164_v2 = vpop.xlane.xlu1 %1163 }
 0x304   : > { %4952 = vpow2.f32 %v1215_v62  ;;  %v1191_v17 = vsub.f32 %v6002_v61, %v1164_v2  ;;  %v1217_v41 = vmul.f32 1.442695, %v1194_v38 }
 0x305   : > { %v1166_v39 = vpop.xlane.xlu0 %1165  ;;  %4954 = vpow2.f32 %v1205_v1 }
 0x306   : > { %v1211_v14 = vmul.f32 1.442695, %v1191_v17  ;;  %v1192_v24 = vsub.f32 %v6013_v20, %v1166_v39 }
 0x307   : > { %v6153_v54 = vpop.eup %4946  ;;  %v1176_v12 = vpop.xlane.xlu1 %1175 }
 0x308   : > { %4956 = vpow2.f32 %v1211_v14  ;;  %v1197_v37 = vsub.f32 %v6024_v18, %v1176_v12  ;;  %1239 = vadd.xlane.f32.xlu1 %v6153_v54  ;;  %v1213_v6 = vmul.f32 1.442695, %v1192_v24 }
 0x309   : > { %v1178_v27 = vpop.xlane.xlu0 %1177  ;;  %4958 = vpow2.f32 %v1217_v41 }
 0x30a   : > { %v1223_v62 = vmul.f32 1.442695, %v1197_v37  ;;  %v1198_v61 = vsub.f32 %v6031_v51, %v1178_v27 }
 0x30b   : > { %v6158_v2 = vpop.eup %4948  ;;  %v1172_v1 = vpop.xlane.xlu1 %1171 }
 0x30c   : > { %4960 = vpow2.f32 %v1223_v62  ;;  %v1195_v20 = vsub.f32 %v6038_v16, %v1172_v1  ;;  %1235 = vadd.xlane.f32.xlu1 %v6158_v2  ;;  %v1225_v44 = vmul.f32 1.442695, %v1198_v61 }
 0x30d   : > { %v1174_v33 = vpop.xlane.xlu0 %1173  ;;  %4962 = vpow2.f32 %v1213_v6 }
 0x30e   : > { %v1219_v18 = vmul.f32 1.442695, %v1195_v20  ;;  %v1196_v34 = vsub.f32 %v6046_v19, %v1174_v33 }
 0x30f   : > { %v6163_v56 = vpop.eup %4950  ;;  %v1184_v38 = vpop.xlane.xlu1 %1183 }
 0x310   : > { %4964 = vpow2.f32 %v1219_v18  ;;  %v1201_v51 = vsub.f32 %v6054_v45, %v1184_v38  ;;  %1241 = vadd.xlane.f32.xlu0 %v6163_v56  ;;  %v1221_v16 = vmul.f32 1.442695, %v1196_v34 }
 0x311   : > { %v6167_v17 = vpop.eup %4952  ;;  %v1186_v39 = vpop.xlane.xlu0 %1185  ;;  %4966 = vpow2.f32 %v1225_v44 }
 0x312   : > { %v1231_v41 = vmul.f32 1.442695, %v1201_v51  ;;  %v1202_v14 = vsub.f32 %v6060_v63, %v1186_v39  ;;  %1247 = vadd.xlane.f32.xlu1 %v6167_v17  ;;  %v6171_v24 = vpop.eup %4954 }
 0x313   : > { %v1180_v19 = vpop.xlane.xlu1 %1179 }
 0x314   : > { %4968 = vpow2.f32 %v1231_v41  ;;  %v1199_v12 = vsub.f32 %v6066_v9, %v1180_v19  ;;  %1237 = vadd.xlane.f32.xlu0 %v6171_v24  ;;  %v1233_v27 = vmul.f32 1.442695, %v1202_v14 }
 0x315   : > { %v6175_v45 = vpop.eup %4956  ;;  %v1182_v37 = vpop.xlane.xlu0 %1181  ;;  %4970 = vpow2.f32 %v1221_v16 }
 0x316   : > { %v1227_v6 = vmul.f32 1.442695, %v1199_v12  ;;  %v1200_v62 = vsub.f32 %v6070_v7, %v1182_v37  ;;  %1243 = vadd.xlane.f32.xlu1 %v6175_v45  ;;  %v6179_v63 = vpop.eup %4958 }
 0x318   : > { %4972 = vpow2.f32 %v1227_v6  ;;  %1249 = vadd.xlane.f32.xlu0 %v6179_v63  ;;  %v1229_v9 = vmul.f32 1.442695, %v1200_v62 }
 0x319   : > { %v6182_v61 = vpop.eup %4960  ;;  %4974 = vpow2.f32 %v1233_v27 }
 0x31a   : > { %1255 = vadd.xlane.f32.xlu1 %v6182_v61  ;;  %v6185_v1 = vpop.eup %4962  ;;  %4976 = vpow2.f32 %v1229_v9 }
 0x31c   : > { %1245 = vadd.xlane.f32.xlu0 %v6185_v1 }
 0x31d   : > { %v6188_v20 = vpop.eup %4964 }
 0x31e   : > { %1251 = vadd.xlane.f32.xlu1 %v6188_v20  ;;  %v6191_v7 = vpop.eup %4966 }
 0x320   : > { %1257 = vadd.xlane.f32.xlu0 %v6191_v7 }
 0x321   : > { %v6194_v33 = vpop.eup %4968 }
 0x322   : > { %1263 = vadd.xlane.f32.xlu1 %v6194_v33  ;;  %v6197_v44 = vpop.eup %4970 }
 0x324   : > { %1253 = vadd.xlane.f32.xlu0 %v6197_v44 }
 0x325   : > { %v6200_v18 = vpop.eup %4972 }
 0x326   : > { %1259 = vadd.xlane.f32.xlu1 %v6200_v18  ;;  %v6203_v34 = vpop.eup %4974 }
 0x327   : > { %v6206_v38 = vpop.eup %4976 }
 0x328   : > { %1265 = vadd.xlane.f32.xlu0 %v6203_v34 }
 0x32c   : > { %1261 = vadd.xlane.f32.xlu0 %v6206_v38 }
 0x368   : > { %v1634_v51 = vpop.xlane.xlu1 %1633 }
 0x369   : > { %v1663_v39 = vsub.f32 %v6074_v26, %v1634_v51 }
 0x36b   : > { %v1681_v16 = vmul.f32 1.442695, %v1663_v39 }
 0x36c   : > { %v1630_v41 = vpop.xlane.xlu1 %1629  ;;  %v1636_v14 = vpop.xlane.xlu0 %1635 }
 0x36d   : > { %4978 = vpow2.f32 %v1681_v16  ;;  %v1661_v19 = vsub.f32 %v6078_v53, %v1630_v41  ;;  %v1664_v12 = vsub.f32 %v6081_v3, %v1636_v14 }
 0x36f   : > { %v1677_v37 = vmul.f32 1.442695, %v1661_v19  ;;  %v1683_v27 = vmul.f32 1.442695, %v1664_v12 }
 0x370   : > { %v1642_v6 = vpop.xlane.xlu1 %1641  ;;  %v1632_v62 = vpop.xlane.xlu0 %1631 }
 0x371   : > { %4980 = vpow2.f32 %v1677_v37  ;;  %v1667_v9 = vsub.f32 %v6086_v32, %v1642_v6  ;;  %v1662_v40 = vsub.f32 %v6089_v49, %v1632_v62 }
 0x372   : > { %4982 = vpow2.f32 %v1683_v27 }
 0x373   : > { %v1689_v31 = vmul.f32 1.442695, %v1667_v9  ;;  %v1679_v26 = vmul.f32 1.442695, %v1662_v40 }
 0x374   : > { %v1638_v51 = vpop.xlane.xlu1 %1637  ;;  %v1644_v39 = vpop.xlane.xlu0 %1643 }
 0x375   : > { %4984 = vpow2.f32 %v1689_v31  ;;  %v1665_v16 = vsub.f32 %v6094_v43, %v1638_v51  ;;  %v1668_v53 = vsub.f32 %v6097_v25, %v1644_v39 }
 0x376   : > { %4986 = vpow2.f32 %v1679_v26 }
 0x377   : > { %v1685_v3 = vmul.f32 1.442695, %v1665_v16  ;;  %v1691_v14 = vmul.f32 1.442695, %v1668_v53 }
 0x378   : > { %v1640_v41 = vpop.xlane.xlu0 %1639  ;;  %v6219_v49 = vpop.xlane.xlu1 %1649 }
 0x379   : > { %4988 = vpow2.f32 %v1685_v3  ;;  %v1666_v19 = vsub.f32 %v6107_v59, %v1640_v41 }
 0x37a   : > { %v6217_v32 = vpop.eup %4978  ;;  %4990 = vpow2.f32 %v1691_v14 }
 0x37b   : > { %v1687_v12 = vmul.f32 1.442695, %v1666_v19  ;;  %1713 = vadd.xlane.f32.xlu0 %v6217_v32 }
 0x37c   : > { %v1646_v43 = vpop.xlane.xlu1 %1645  ;;  %v6229_v37 = vpop.xlane.xlu0 %1651 }
 0x37d   : > { %4992 = vpow2.f32 %v1687_v12 }
 0x37e   : > { %v6222_v31 = vpop.eup %4980 }
 0x37f   : > { %1709 = vadd.xlane.f32.xlu0 %v6222_v31  ;;  %v6225_v25 = vpop.eup %4982 }
 0x380   : > { %v6237_v6 = vpop.xlane.xlu1 %1657  ;;  %v1648_v62 = vpop.xlane.xlu0 %1647 }
 0x382   : > { %v6227_v40 = vpop.eup %4984 }
 0x383   : > { %7999 = vst [vmem:[#allocation50_spill] sm:$0xff] %v6227_v40  ;;  %1721 = vadd.xlane.f32.xlu1 %v6227_v40  ;;  %1715 = vadd.xlane.f32.xlu0 %v6225_v25  ;;  %v6233_v59 = vpop.eup %4986 }
 0x384   : > { %v6247_v51 = vpop.xlane.xlu1 %1653  ;;  %v6249_v39 = vpop.xlane.xlu0 %1659 }
 0x386   : > { %v6235_v27 = vpop.eup %4988 }
 0x387   : > { %8000 = vst [vmem:[#allocation51_spill] sm:$0xff] %v6235_v27  ;;  %1717 = vadd.xlane.f32.xlu1 %v6235_v27  ;;  %1711 = vadd.xlane.f32.xlu0 %v6233_v59  ;;  %v6241_v9 = vpop.eup %4990 }
 0x388   : > { %8001 = vst [vmem:[#allocation52_spill] sm:$0xff] %v6241_v9  ;;  %v6251_v53 = vpop.xlane.xlu0 %1655 }
 0x38a   : > { %v6243_v26 = vpop.eup %4992 }
 0x38b   : > { %8002 = vst [vmem:[#allocation53_spill] sm:$0xff] %v6243_v26  ;;  %1723 = vadd.xlane.f32.xlu1 %v6241_v9  ;;  %1719 = vadd.xlane.f32.xlu0 %v6243_v26  ;;  %v1670_v9 = vsub.f32 %v6127_v10, %v1648_v62  ;;  %v1671_v10 = vsub.f32 %v6104_v36, %v6219_v49 }
 0x38c   : > { %v1672_v36 = vsub.f32 %v6119_v4, %v6229_v37 }
 0x38e   : > { %v1699_v37 = vmul.f32 1.442695, %v1672_v36  ;;  %v8013_v36 = vunpack.c.h.bf16 %v5965_v15 }
 0x391   : > { %v1240_v16 = vpop.xlane.xlu1 %1239 }
 0x395   : > { %v1236_v3 = vpop.xlane.xlu1 %1235 }
 0x399   : > { %v1242_v41 = vpop.xlane.xlu0 %1241 }
 0x39a   : > { %4994 = vrcp.f32 %v1242_v41 }
 0x39b   : > { %v1248_v14 = vpop.xlane.xlu1 %1247  ;;  %4996 = vrcp.f32 %v1236_v3 }
 0x39c   : > { %1791 = vrot.lane.b32.xlu1 %v5806_v35, %s5411_s24  ;;  %4998 = vrcp.f32 %v1240_v16  ;;  %v1669_v16 = vsub.f32 %v6116_v57, %v1646_v43  ;;  %v1695_v57 = vmul.f32 1.442695, %v1670_v9 }
 0x39d   : > { %v1238_v19 = vpop.xlane.xlu0 %1237 }
 0x39e   : > { %5000 = vrcp.f32 %v1238_v19 }
 0x39f   : > { %v1244_v12 = vpop.xlane.xlu1 %1243 }
 0x3a0   : > { %1789 = vrot.lane.b32.xlu1 %v5795_v28, %s5411_s24 }
 0x3a1   : > { %v1250_v60 = vpop.xlane.xlu0 %1249  ;;  %1793 = vrot.lane.b32.xlu0 %v5869_v0, %s5411_s24  ;;  %s4235_s24 = sshll.u32 %s507_s22, 7 }
 0x3a2   : > { %5002 = vrcp.f32 %v1250_v60  ;;  %s7729_s3 = scalar_lea.vmem [#allocation8], %s4235_s24 }
 0x3a3   : > { %v1256_v50 = vpop.xlane.xlu1 %1255  ;;  %5004 = vrcp.f32 %v1244_v12  ;;  %v1693_v12 = vmul.f32 1.442695, %v1669_v16  ;;  %s4118_s28 = sshll.u32 %s7729_s3, 4  ;;  %s7795_s28 = int_to_ptr.vmem [resolvable:$true] %s4118_s28 }
 0x3a4   : > { %5006 = vrcp.f32 %v1248_v14  ;;  %p5327_p5 = scmp.lt.s32.totalorder %s7795_s28, %s5325_s27 }
 0x3a5   : > { %v1246_v41 = vpop.xlane.xlu0 %1245 }
 0x3a6   : > { %5008 = vrcp.f32 %v1246_v41 }
 0x3a7   : > { %v1252_v3 = vpop.xlane.xlu1 %1251  ;;  %v4995_v48 = vpop.eup %4994 }
 0x3a8   : > { %v4997_v35 = vpop.eup %4996  ;;  %v1274_v0 = vmul.f32 %v4995_v48, %v6163_v56 }
 0x3a9   : > { %v1258_v19 = vpop.xlane.xlu0 %1257  ;;  %v4999_v40 = vpop.eup %4998  ;;  %v1268_v60 = vmul.f32 %v4997_v35, %v6158_v2 }
 0x3aa   : > { %5010 = vrcp.f32 %v1258_v19  ;;  %v1272_v27 = vmul.f32 %v4999_v40, %v6153_v54  ;;  %v1697_v40 = vmul.f32 1.442695, %v1671_v10 }
 0x3ab   : > { %v5001_v28 = vpop.eup %5000  ;;  %v1264_v26 = vpop.xlane.xlu1 %1263  ;;  %5012 = vrcp.f32 %v1252_v3 }
 0x3ac   : > { %v1270_v14 = vmul.f32 %v5001_v28, %v6171_v24  ;;  %5014 = vrcp.f32 %v1256_v50  ;;  %v1300_v62 = vpack.c.bf16 %v1274_v0, %v1272_v27  ;;  %v1673_v50 = vsub.f32 %v6135_v8, %v6247_v51 }
 0x3ad   : > { %v1254_v41 = vpop.xlane.xlu0 %1253 }
 0x3ae   : > { %5016 = vrcp.f32 %v1254_v41  ;;  %v1299_v43 = vpack.c.bf16 %v1270_v14, %v1268_v60  ;;  %v1701_v51 = vmul.f32 1.442695, %v1673_v50  ;;  %v8009_v50 = vunpack.c.h.bf16 %v5928_v52 }
 0x3af   : > { %v5003_v19 = vpop.eup %5002  ;;  %5018 = vpow2.f32 %v1693_v12  ;;  %v1260_v56 = vpop.xlane.xlu1 %1259 }
 0x3b0   : > { %4568 = vmatprep.mubr.bf16.mxu1 %v1299_v43  ;;  %v5005_v48 = vpop.eup %5004  ;;  %5020 = vpow2.f32 %v1695_v57  ;;  %v1282_v49 = vmul.f32 %v5003_v19, %v6179_v63  ;;  %v1674_v63 = vsub.f32 %v6144_v5, %v6251_v53  ;;  %v8004_v19 = vunpack.c.l.bf16 %v5906_v11 }
 0x3b1   : > { %4569 = vmatmul.mubr.bf16.vlgmr.msra.gmra.mxu1 %v1300_v62  ;;  %v1266_v2 = vpop.xlane.xlu0 %1265  ;;  %v5007_v24 = vpop.eup %5006  ;;  %v1276_v27 = vmul.f32 %v5005_v48, %v6175_v45  ;;  %v8005_v48 = vunpack.c.h.bf16 %v5910_v13 }
 0x3b2   : > { %4617 = vmatpush3.bf16.msra.mxu1 %v5900_v55  ;;  %5022 = vrcp.f32 %v1266_v2  ;;  %v1280_v8 = vmul.f32 %v5007_v24, %v6167_v17  ;;  %v1675_v55 = vsub.f32 %v6124_v42, %v6237_v6  ;;  %v1703_v6 = vmul.f32 1.442695, %v1674_v63 }
 0x3b3   : > { %v5009_v54 = vpop.eup %5008  ;;  %4618 = vmatprep.subr.bf16.mxu1 %v6099_v47  ;;  %5024 = vrcp.f32 %v1260_v56  ;;  %v8006_v56 = vunpack.c.l.bf16 %v5928_v52  ;;  %v8007_v2 = vunpack.c.h.bf16 %v5906_v11  ;;  %v8008_v24 = vunpack.c.l.bf16 %v5918_v21 }
 0x3b4   : > { %v1278_v9 = vmul.f32 %v5009_v54, %v6185_v1  ;;  %5026 = vrcp.f32 %v1264_v26  ;;  %v1302_v45 = vpack.c.bf16 %v1282_v49, %v1280_v8  ;;  %v1705_v35 = vmul.f32 1.442695, %v1675_v55 }
 0x3b5   : > { %v1262_v3 = vpop.xlane.xlu0 %1261  ;;  %v8010_v54 = vunpack.c.l.bf16 %v5965_v15  ;;  %v8014_v11 = vunpack.c.l.bf16 %v6009_v29  ;;  %v8015_v49 = vunpack.c.h.bf16 %v5949_v46  ;;  %v8016_v52 = vunpack.c.h.bf16 %v6009_v29 }
 0x3b6   : > { %4619 = vmatpush3.bf16.msra.mxu1 %v6099_v47  ;;  %5028 = vrcp.f32 %v1262_v3  ;;  %v1301_v4 = vpack.c.bf16 %v1278_v9, %v1276_v27  ;;  %v1676_v47 = vsub.f32 %v6138_v22, %v6249_v39 }
 0x3b7   : > { %5030 = vpow2.f32 %v1697_v40  ;;  %4620 = vmatprep.subr.bf16.mxu1 %v6111_v58  ;;  %v5011_v1 = vpop.eup %5010  ;;  %v8011_v40 = vunpack.c.h.bf16 %v5918_v21 }
 0x3b8   : > { %4572 = vmatprep.mubr.bf16.mxu1 %v1301_v4  ;;  %v5013_v26 = vpop.eup %5012  ;;  %5032 = vpow2.f32 %v1701_v51  ;;  %v1290_v5 = vmul.f32 %v5011_v1, %v6191_v7  ;;  %v1707_v22 = vmul.f32 1.442695, %v1676_v47 }
 0x3b9   : > { %4573 = vmatmul.mubr.bf16.gmra.mxu1 %v1302_v45  ;;  %v5015_v17 = vpop.eup %5014  ;;  %5034 = vpow2.f32 %v1699_v37  ;;  %v1284_v53 = vmul.f32 %v5013_v26, %v6188_v20 }
 0x3ba   : > { %4621 = vmatpush3.bf16.msra.mxu1 %v6111_v58  ;;  %v1288_v28 = vmul.f32 %v5015_v17, %v6182_v61  ;;  %5036 = vpow2.f32 %v1705_v35 }
 0x3bb   : > { %v5017_v42 = vpop.eup %5016  ;;  %4622 = vmatprep.subr.bf16.mxu1 %v6113_v23  ;;  %5038 = vpow2.f32 %v1703_v6 }
 0x3bc   : > { %v1286_v16 = vmul.f32 %v5017_v42, %v6197_v44  ;;  %v6291_v0 = vpop.eup %5018  ;;  %v1304_v39 = vpack.c.bf16 %v1290_v5, %v1288_v28  ;;  %5040 = vpow2.f32 %v1707_v22 }
 0x3bd   : > { %v6294_v60 = vpop.eup %5020 }
 0x3be   : > { %4623 = vmatpush3.bf16.msra.mxu1 %v6113_v23  ;;  %v1303_v58 = vpack.c.bf16 %v1286_v16, %v1284_v53  ;;  %v8017_v16 = vld [vmem:[#allocation51_spill] sm:$0xff] }
 0x3bf   : > { %4624 = vmatprep.subr.bf16.mxu1 %v6130_v30  ;;  %v5023_v7 = vpop.eup %5022 }
 0x3c0   : > { %4576 = vmatprep.mubr.bf16.mxu1 %v1303_v58  ;;  %v5025_v20 = vpop.eup %5024  ;;  %1725 = vadd.xlane.f32.xlu0 %v6291_v0  ;;  %v1298_v23 = vmul.f32 %v5023_v7, %v6203_v34  ;;  %v8018_v58 = vld [vmem:[#allocation53_spill] sm:$0xff] }
 0x3c1   : > { %4577 = vmatmul.mubr.bf16.gmra.mxu1 %v1304_v39  ;;  %v5027_v61 = vpop.eup %5026  ;;  %v1292_v12 = vmul.f32 %v5025_v20, %v6200_v18 }
 0x3c2   : > { %4625 = vmatpush3.bf16.msra.mxu1 %v6130_v30  ;;  %v1296_v57 = vmul.f32 %v5027_v61, %v6194_v33 }
 0x3c3   : > { %v5029_v44 = vpop.eup %5028 }
 0x3c4   : > { %v6300_v14 = vpop.eup %5030  ;;  %1727 = vadd.xlane.f32.xlu1 %v6294_v60  ;;  %v1294_v41 = vmul.f32 %v5029_v44, %v6206_v38  ;;  %v1306_v30 = vpack.c.bf16 %v1298_v23, %v1296_v57  ;;  %v8003_v38 = vunpack.c.l.bf16 %v5910_v13  ;;  %v8012_v13 = vunpack.c.l.bf16 %v5949_v46 }
 0x3c5   : > { %1729 = vadd.xlane.f32.xlu0 %v6300_v14  ;;  %v6307_v10 = vpop.eup %5032 }
 0x3c6   : > { %v1305_v43 = vpack.c.bf16 %v1294_v41, %v1292_v12  ;;  %v6309_v62 = vpop.eup %5034 }
 0x3c7   : > { %v6313_v34 = vpop.eup %5036 }
 0x3c8   : > { %1733 = vadd.xlane.f32.xlu1 %v6307_v10  ;;  %4580 = vmatprep.mubr.bf16.mxu1 %v1305_v43  ;;  %v6315_v18 = vpop.eup %5038 }
 0x3c9   : > { %1731 = vadd.xlane.f32.xlu0 %v6309_v62  ;;  %4581 = vmatmul.mubr.bf16.gmra.mxu1 %v1306_v30  ;;  %v6319_v33 = vpop.eup %5040 }
 0x3cc   : > { %1737 = vadd.xlane.f32.xlu1 %v6313_v34 }
 0x3cd   : > { %1735 = vadd.xlane.f32.xlu0 %v6315_v18 }
 0x3d0   : > { %599 = vadd.xlane.f32.xlu1 %v8003_v38 }
 0x3d1   : > { %1739 = vadd.xlane.f32.xlu0 %v6319_v33 }
 0x3d4   : > { %603 = vadd.xlane.f32.xlu1 %v8004_v19 }
 0x3d5   : > { %601 = vadd.xlane.f32.xlu0 %v8005_v48 }
 0x3d8   : > { %607 = vadd.xlane.f32.xlu1 %v8006_v56 }
 0x3d9   : > { %605 = vadd.xlane.f32.xlu0 %v8007_v2 }
 0x3dc   : > { %611 = vadd.xlane.f32.xlu1 %v8008_v24 }
 0x3dd   : > { %609 = vadd.xlane.f32.xlu0 %v8009_v50 }
 0x3e0   : > { %615 = vadd.xlane.f32.xlu1 %v8010_v54 }
 0x3e1   : > { %613 = vadd.xlane.f32.xlu0 %v8011_v40 }
 0x3e4   : > { %619 = vadd.xlane.f32.xlu1 %v8012_v13 }
 0x3e5   : > { %617 = vadd.xlane.f32.xlu0 %v8013_v36 }
 0x3e8   : > { %623 = vadd.xlane.f32.xlu1 %v8014_v11 }
 0x3e9   : > { %621 = vadd.xlane.f32.xlu0 %v8015_v49 }
 0x3ed   : > { %625 = vadd.xlane.f32.xlu0 %v8016_v52 }
 0x404   : > { %v1714_v27 = vpop.xlane.xlu0 %1713 }
 0x408   : > { %v1710_v9 = vpop.xlane.xlu0 %1709 }
 0x409   : > { %5042 = vrcp.f32 %v1710_v9 }
 0x40c   : > { %v1722_v3 = vpop.xlane.xlu1 %1721  ;;  %v1716_v21 = vpop.xlane.xlu0 %1715 }
 0x40d   : > { %5044 = vrcp.f32 %v1716_v21 }
 0x40e   : > { %5046 = vrcp.f32 %v1714_v27 }
 0x410   : > { %v1718_v8 = vpop.xlane.xlu1 %1717  ;;  %v1712_v55 = vpop.xlane.xlu0 %1711 }
 0x411   : > { %5048 = vrcp.f32 %v1712_v55 }
 0x412   : > { %5050 = vrcp.f32 %v1718_v8 }
 0x414   : > { %v1724_v15 = vpop.xlane.xlu1 %1723  ;;  %v1720_v51 = vpop.xlane.xlu0 %1719 }
 0x415   : > { %5052 = vrcp.f32 %v1720_v51 }
 0x416   : > { %5054 = vrcp.f32 %v1724_v15  ;;  %v5043_v29 = vpop.eup %5042 }
 0x417   : > { %5056 = vrcp.f32 %v1722_v3  ;;  %v1742_v26 = vmul.f32 %v5043_v29, %v6222_v31 }
 0x418   : > { %v1792_v46 = vpop.permute.xlu1 %1791  ;;  %v1794_v4 = vpop.permute.xlu0 %1793 }
 0x419   : > { %4626 = vmatprep.subr.bf16.mxu1 %v1794_v4 }
 0x41a   : > { %4627 = vmatpush3.bf16.msra.mxu1 %v1794_v4  ;;  %v5045_v37 = vpop.eup %5044 }
 0x41b   : > { %4628 = vmatprep.subr.bf16.mxu1 %v1792_v46  ;;  %v5047_v63 = vpop.eup %5046  ;;  %v1748_v35 = vmul.f32 %v5045_v37, %v6225_v25  ;;  %v8020_v25 = vld [vmem:[#allocation50_spill] sm:$0xff] }
 0x41c   : > { %v1790_v1 = vpop.permute.xlu1 %1789  ;;  %v1746_v6 = vmul.f32 %v5047_v63, %v6217_v32 }
 0x41e   : > { %v5049_v45 = vpop.eup %5048  ;;  %4629 = vmatpush3.bf16.msra.mxu1 %v1792_v46  ;;  %v1774_v53 = vpack.c.bf16 %v1748_v35, %v1746_v6 }
 0x41f   : > { %4630 = vmatprep.subr.bf16.mxu1 %v1790_v1  ;;  %v1744_v17 = vmul.f32 %v5049_v45, %v6233_v59  ;;  %v5051_v42 = vpop.eup %5050  ;;  %v8019_v59 = vld [vmem:[#allocation52_spill] sm:$0xff] }
 0x420   : > { %v1750_v28 = vmul.f32 %v5051_v42, %v8017_v16 }
 0x421   : > { %v1773_v47 = vpack.c.bf16 %v1744_v17, %v1742_v26 }
 0x422   : > { %v5053_v5 = vpop.eup %5052  ;;  %4631 = vmatpush3.bf16.msra.mxu1 %v1790_v1 }
 0x423   : > { %4632 = vmatprep.mubr.bf16.mxu1 %v1773_v47  ;;  %v1752_v22 = vmul.f32 %v5053_v5, %v8018_v58  ;;  %v5055_v39 = vpop.eup %5054 }
 0x424   : > { %v5057_v31 = vpop.eup %5056  ;;  %v1756_v20 = vmul.f32 %v5055_v39, %v8019_v59 }
 0x425   : > { %4633 = vmatmul.mubr.bf16.vlgmr.msra.gmra.mxu1 %v1774_v53  ;;  %v1775_v7 = vpack.c.bf16 %v1752_v22, %v1750_v28  ;;  %v1754_v61 = vmul.f32 %v5057_v31, %v8020_v25 }
 0x427   : > { %4636 = vmatprep.mubr.bf16.mxu1 %v1775_v7  ;;  %v1776_v44 = vpack.c.bf16 %v1756_v20, %v1754_v61  ;;  %v8023_v61 = vld [vmem:[#allocation40_spill] sm:$0xff] }
 0x42d   : > { %4637 = vmatmul.mubr.bf16.gmra.mxu1 %v1776_v44  ;;  %v8024_v44 = vunpack.c.h.bf16 %v8023_v61 }
 0x449   : > { %v1726_v32 = vpop.xlane.xlu0 %1725 }
 0x44a   : > { %5058 = vrcp.f32 %v1726_v32  ;;  %v8025_v32 = vunpack.c.l.bf16 %v8023_v61 }
 0x44d   : > { %v1728_v23 = vpop.xlane.xlu1 %1727 }
 0x44e   : > { %5060 = vrcp.f32 %v1728_v23  ;;  %v1730_v12 = vpop.xlane.xlu0 %1729 }
 0x44f   : > { %5062 = vrcp.f32 %v1730_v12 }
 0x451   : > { %v1734_v41 = vpop.xlane.xlu1 %1733 }
 0x452   : > { %v1732_v57 = vpop.xlane.xlu0 %1731 }
 0x453   : > { %5064 = vrcp.f32 %v1732_v57 }
 0x454   : > { %5066 = vrcp.f32 %v1734_v41 }
 0x455   : > { %v1738_v43 = vpop.xlane.xlu1 %1737 }
 0x456   : > { %v1736_v30 = vpop.xlane.xlu0 %1735 }
 0x457   : > { %5068 = vrcp.f32 %v1736_v30  ;;  %v5059_v38 = vpop.eup %5058 }
 0x458   : > { %5070 = vrcp.f32 %v1738_v43  ;;  %v1758_v56 = vmul.f32 %v5059_v38, %v6291_v0 }
 0x459   : > { %v6413_v31 = vpop.xlane.xlu1 %599 }
 0x45a   : > { %v1740_v19 = vpop.xlane.xlu0 %1739  ;;  %vm631_vm4 = vcmp.gt.f32.partialorder %v6413_v31, 0.0 }
 0x45b   : > { %v5061_v48 = vpop.eup %5060  ;;  %5072 = vrcp.f32 %v1740_v19 }
 0x45c   : > { %v1760_v2 = vmul.f32 %v5061_v48, %v6294_v60  ;;  %v5063_v24 = vpop.eup %5062 }
 0x45d   : > { %v1762_v40 = vmul.f32 %v5063_v24, %v6300_v14  ;;  %v8021_v14 = vmov 0   ;;  %v6417_v20 = vpop.xlane.xlu1 %603 }
 0x45e   : > { %v1777_v50 = vpack.c.bf16 %v1760_v2, %v1758_v56  ;;  %v6415_v59 = vpop.xlane.xlu0 %601  ;;  %vm633_vm5 = vcmp.gt.f32.partialorder %v6417_v20, 0.0 }
 0x45f   : > { %8022 = vst [vmem:[#allocation51_spill] sm:$0xff] %v6415_v59  ;;  %vm632_vm7 = vcmp.gt.f32.partialorder %v6415_v59, 0.0 }
 0x460   : > { %v5065_v54 = vpop.eup %5064  ;;  %4640 = vmatprep.mubr.bf16.mxu1 %v1777_v50 }
 0x461   : > { %v1764_v13 = vmul.f32 %v5065_v54, %v6309_v62  ;;  %v5067_v36 = vpop.eup %5066  ;;  %v6367_v62 = vpop.f32.mrf.mxu1 }
 0x462   : > { %v1766_v52 = vmul.f32 %v5067_v36, %v6307_v10  ;;  %v6419_v25 = vpop.xlane.xlu0 %605  ;;  %v6425_v23 = vpop.xlane.xlu1 %607 }
 0x463   : > { %v1778_v11 = vpack.c.bf16 %v1764_v13, %v1762_v40  ;;  %8026 = vst [vmem:[#allocation53_spill] sm:$0xff] %v6425_v23  ;;  %vm634_vm6 = vcmp.gt.f32.partialorder %v6419_v25, 0.0  ;;  %vm635_vm9 = vcmp.gt.f32.partialorder %v6425_v23, 0.0 }
 0x464   : > { %v5069_v49 = vpop.eup %5068 }
 0x465   : > { %4641 = vmatmul.mubr.bf16.gmra.mxu1 %v1778_v11  ;;  %v1768_v27 = vmul.f32 %v5069_v49, %v6315_v18  ;;  %v5071_v9 = vpop.eup %5070  ;;  %v8036_v49 = vld [vmem:[#allocation17_spill] sm:$0xff] }
 0x466   : > { %v1770_v60 = vmul.f32 %v5071_v9, %v6313_v34  ;;  %v6427_v12 = vpop.xlane.xlu0 %609  ;;  %v6429_v41 = vpop.xlane.xlu1 %611  ;;  %v5266_v9 = vld [vmem:[#allocation3] sm:$0xf] }
 0x467   : > { %v1779_v0 = vpack.c.bf16 %v1768_v27, %v1766_v52  ;;  %8027 = vst [vmem:[#allocation52_spill] sm:$0xff] %v6427_v12  ;;  %8028 = vst [vmem:[#allocation50_spill] sm:$0xff] %v6429_v41  ;;  %v7933_v52 = vsub.s32 3, %v8036_v49  ;;  %vm636_vm8 = vcmp.gt.f32.partialorder %v6427_v12, 0.0  ;;  %vm637_vm11 = vcmp.gt.f32.partialorder %v6429_v41, 0.0 }
 0x468   : > { %v5073_v3 = vpop.eup %5072 }
 0x469   : > { %4644 = vmatprep.mubr.bf16.mxu1 %v1779_v0  ;;  %v1772_v21 = vmul.f32 %v5073_v3, %v6319_v33  ;;  %v6454_v0 = vrot.slane %v5266_v9, %v7933_v52  ;;  %v8041_v9 = vld [vmem:[#allocation23_spill] sm:$0xff] }
 0x46a   : > { %v6431_v43 = vpop.xlane.xlu0 %613  ;;  %v6433_v38 = vpop.xlane.xlu1 %615 }
 0x46b   : > { %v1780_v8 = vpack.c.bf16 %v1772_v21, %v1770_v60  ;;  %8029 = vst [vmem:[#allocation40_spill] sm:$0xff] %v6431_v43  ;;  %8030 = vst [vmem:[#allocation54_spill] sm:$0xff] %v6433_v38  ;;  %vm638_vm10 = vcmp.gt.f32.partialorder %v6431_v43, 0.0  ;;  %vm639_vm12 = vcmp.gt.f32.partialorder %v6433_v38, 0.0 }
 0x46d   : > { %4645 = vmatmul.mubr.bf16.gmra.mxu1 %v1780_v8 }
 0x46e   : > { %2568 = vmatprep.mubr.bf16.mxu1 %v8021_v14  ;;  %v6435_v19 = vpop.xlane.xlu0 %617  ;;  %v6438_v56 = vpop.xlane.xlu1 %619 }
 0x46f   : > { %8031 = vst [vmem:[#allocation55_spill] sm:$0xff] %v6435_v19  ;;  %8032 = vst [vmem:[#allocation56_spill] sm:$0xff] %v6438_v56  ;;  %vm641_vm13 = vcmp.gt.f32.partialorder %v6438_v56, 0.0  ;;  %vm7930_vm14 = vcmp.gt.f32.partialorder %v6435_v19, 0.0 }
 0x471   : > { %v6369_v55 = vpop.f32.mrf.mxu1 }
 0x472   : > { %v6440_v24 = vpop.xlane.xlu0 %621  ;;  %v6445_v50 = vpop.xlane.xlu1 %623 }
 0x473   : > { %v6371_v15 = vpop.f32.mrf.mxu1  ;;  %8033 = vst [vmem:[#allocation57_spill] sm:$0xff] %v6440_v24  ;;  %8034 = vst [vmem:[#allocation58_spill] sm:$0xff] %v6445_v50  ;;  %vm642_vm15 = vcmp.gt.f32.partialorder %v6440_v24, 0.0  ;;  %vm643_vm1 = vcmp.gt.f32.partialorder %v6445_v50, 0.0 }
 0x475   : > { %v6373_v10 = vpop.f32.mrf.mxu1 }
 0x476   : > { %v6447_v54 = vpop.xlane.xlu0 %625 }
 0x477   : > { %v6375_v18 = vpop.f32.mrf.mxu1  ;;  %8035 = vst [vmem:[#allocation59_spill] sm:$0xff] %v6447_v54  ;;  %vm7929_vm0 = vcmp.gt.f32.partialorder %v6447_v54, 0.0 }
 0x479   : > { %v6377_v51 = vpop.f32.mrf.mxu1 }
 0x47b   : > { %v6379_v46 = vpop.f32.mrf.mxu1 }
 0x47d   : > { %v6381_v34 = vpop.f32.mrf.mxu1 }
 0x47f   : > { %v6383_v33 = vpop.f32.mrf.mxu1 }
 0x481   : > { %v6385_v4 = vpop.f32.mrf.mxu1 }
 0x483   : > { %v6387_v29 = vpop.f32.mrf.mxu1 }
 0x485   : > { %v6389_v37 = vpop.f32.mrf.mxu1 }
 0x487   : > { %v6391_v63 = vpop.f32.mrf.mxu1 }
 0x489   : > { %v6393_v45 = vpop.f32.mrf.mxu1 }
 0x48b   : > { %v6395_v1 = vpop.f32.mrf.mxu1 }
 0x48d   : > { %v6397_v26 = vpop.f32.mrf.mxu1 }
 0x48f   : > { %v6399_v17 = vpop.f32.mrf.mxu1 }
 0x4e5   : > { %v4634_v35 = vpop.f32.mrf.mxu1 }
 0x4e6   : > { %1930 = vrot.lane.b32.xlu1 %v4634_v35, %s5412_s15 }
 0x4e7   : > { %v1847_v42 = vpop.f32.mrf.mxu1 }
 0x4e9   : > { %v4635_v47 = vpop.f32.mrf.mxu1 }
 0x4ea   : > { %1926 = vrot.lane.b32.xlu1 %v1847_v42, %s5412_s15  ;;  %1932 = vrot.lane.b32.xlu0 %v4635_v47, %s5412_s15 }
 0x4eb   : > { %v1850_v6 = vpop.f32.mrf.mxu1 }
 0x4ed   : > { %v4638_v5 = vpop.f32.mrf.mxu1 }
 0x4ee   : > { %1928 = vrot.lane.b32.xlu0 %v1850_v6, %s5412_s15  ;;  %1938 = vrot.lane.b32.xlu1 %v4638_v5, %s5412_s15 }
 0x4ef   : > { %v1863_v53 = vpop.f32.mrf.mxu1 }
 0x4f1   : > { %v4639_v16 = vpop.f32.mrf.mxu1 }
 0x4f2   : > { %1934 = vrot.lane.b32.xlu1 %v1863_v53, %s5412_s15  ;;  %1940 = vrot.lane.b32.xlu0 %v4639_v16, %s5412_s15 }
 0x4f3   : > { %v1866_v28 = vpop.f32.mrf.mxu1 }
 0x4f6   : > { %1936 = vrot.lane.b32.xlu0 %v1866_v28, %s5412_s15 }
 0x525   : > { %v4642_v58 = vpop.f32.mrf.mxu1 }
 0x526   : > { %1946 = vrot.lane.b32.xlu1 %v4642_v58, %s5412_s15  ;;  %v8038_v58 = vld [vmem:[#allocation20_spill] sm:$0xff] }
 0x527   : > { %v1879_v22 = vpop.f32.mrf.mxu1 }
 0x529   : > { %v4643_v39 = vpop.f32.mrf.mxu1 }
 0x52a   : > { %1942 = vrot.lane.b32.xlu1 %v1879_v22, %s5412_s15  ;;  %1948 = vrot.lane.b32.xlu0 %v4643_v39, %s5412_s15  ;;  %v887_v22 = vadd.f32 %v8038_v58, %v6454_v0 }
 0x52b   : > { %v1882_v7 = vpop.f32.mrf.mxu1 }
 0x52d   : > { %v4646_v57 = vpop.f32.mrf.mxu1 }
 0x52e   : > { %1944 = vrot.lane.b32.xlu0 %v1882_v7, %s5412_s15 }
 0x52f   : > { %v1895_v30 = vpop.f32.mrf.mxu1 }
 0x531   : > { %v4647_v48 = vpop.f32.mrf.mxu1 }
 0x533   : > { %v1898_v2 = vpop.f32.mrf.mxu1 }
 0x54d   : > { %629 = vadd.xlane.f32.xlu0 %v8024_v44 }
 0x54e   : > { %627 = vadd.xlane.f32.xlu1 %v8025_v32  ;;  %v8039_v32 = vld [vmem:[#allocation21_spill] sm:$0xff] }
 0x558   : > { %v1931_v40 = vpop.permute.xlu1 %1930 }
 0x559   : > { %v1976_v21 = vsel %vm977_vm2, %v6369_v55, %v1931_v40 }
 0x55a   : > { %v1993_v47 = vsel %vm1990_vm3, %v1976_v21, 0.0 }
 0x55b   : > { %v2041_v55 = vsel %vm633_vm5, %v1993_v47, 0.0  ;;  %v8043_v47 = vld [vmem:[#allocation25_spill] sm:$0xff] }
 0x55c   : > { %v1933_v13 = vpop.permute.xlu0 %1932  ;;  %v1927_v36 = vpop.permute.xlu1 %1926  ;;  %v6485_v61 = vadd.f32 %v2041_v55, %v887_v22 }
 0x55d   : > { %v1974_v27 = vsel %vm977_vm2, %v6371_v15, %v1927_v36  ;;  %v8037_v15 = vld [vmem:[#allocation18_spill] sm:$0xff]  ;;  %v1977_v6 = vsel %vm977_vm2, %v6373_v10, %v1933_v13 }
 0x55e   : > { %v1991_v3 = vsel %vm1990_vm3, %v1974_v27, 0.0  ;;  %v877_v42 = vadd.f32 %v8037_v15, %v6454_v0  ;;  %v1994_v39 = vsel %vm1990_vm3, %v1977_v6, 0.0  ;;  %v911_v6 = vadd.f32 %v8043_v47, %v6454_v0 }
 0x55f   : > { %1954 = vrot.lane.b32.xlu1 %v4646_v57, %s5412_s15  ;;  %v2039_v35 = vsel %vm631_vm4, %v1991_v3, 0.0  ;;  %v2042_v44 = vsel %vm634_vm6, %v1994_v39, 0.0  ;;  %v891_v57 = vadd.f32 %v8039_v32, %v6454_v0  ;;  %v901_v3 = vadd.f32 %v8041_v9, %v6454_v0 }
 0x560   : > { %v1929_v11 = vpop.permute.xlu0 %1928  ;;  %v1939_v8 = vpop.permute.xlu1 %1938  ;;  %v6470_v16 = vadd.f32 %v2039_v35, %v877_v42 }
 0x561   : > { %v1975_v5 = vsel %vm977_vm2, %v6375_v18, %v1929_v11  ;;  %v1980_v13 = vsel %vm977_vm2, %v6377_v51, %v1939_v8  ;;  %v6504_v36 = vadd.f32 %v2042_v44, %v891_v57  ;;  %v8042_v51 = vld [vmem:[#allocation22_spill] sm:$0xff] }
 0x562   : > { %v1992_v10 = vsel %vm1990_vm3, %v1975_v5, 0.0  ;;  %v1997_v8 = vsel %vm1990_vm3, %v1980_v13, 0.0  ;;  %v8045_v44 = vld [vmem:[#allocation26_spill] sm:$0xff] }
 0x563   : > { %1950 = vrot.lane.b32.xlu1 %v1895_v30, %s5412_s15  ;;  %1952 = vrot.lane.b32.xlu0 %v1898_v2, %s5412_s15  ;;  %v2040_v30 = vsel %vm632_vm7, %v1992_v10, 0.0  ;;  %v2045_v5 = vsel %vm637_vm11, %v1997_v8, 0.0  ;;  %v917_v32 = vadd.f32 %v8045_v44, %v6454_v0 }
 0x564   : > { %v1941_v60 = vpop.permute.xlu0 %1940  ;;  %v1935_v28 = vpop.permute.xlu1 %1934 }
 0x565   : > { %v1978_v7 = vsel %vm977_vm2, %v6379_v46, %v1935_v28  ;;  %v1981_v40 = vsel %vm977_vm2, %v6381_v34, %v1941_v60  ;;  %v897_v60 = vadd.f32 %v8042_v51, %v6454_v0 }
 0x566   : > { %v1995_v2 = vsel %vm1990_vm3, %v1978_v7, 0.0  ;;  %v1998_v34 = vsel %vm1990_vm3, %v1981_v40, 0.0 }
 0x567   : > { %1956 = vrot.lane.b32.xlu1 %v4647_v48, %s5412_s15  ;;  %v2043_v21 = vsel %vm635_vm9, %v1995_v2, 0.0  ;;  %v2046_v15 = vsel %vm638_vm10, %v1998_v34, 0.0 }
 0x568   : > { %v1937_v53 = vpop.permute.xlu0 %1936  ;;  %v6526_v42 = vadd.f32 %v2043_v21, %v897_v60  ;;  %v6536_v28 = vadd.f32 %v2046_v15, %v911_v6  ;;  %v8048_v60 = vld [vmem:[#allocation29_spill] sm:$0xff] }
 0x569   : > { %v1979_v18 = vsel %vm977_vm2, %v6383_v33, %v1937_v53  ;;  %v8040_v33 = vld [vmem:[#allocation19_spill] sm:$0xff]  ;;  %v8044_v53 = vld [vmem:[#allocation24_spill] sm:$0xff]  ;;  %v931_v8 = vadd.f32 %v8048_v60, %v6454_v0  ;;  %v7932_v60 = vmov 0.0  }
 0x56a   : > { %v1996_v48 = vsel %vm1990_vm3, %v1979_v18, 0.0  ;;  %v881_v46 = vadd.f32 %v8040_v33, %v6454_v0  ;;  %v907_v55 = vadd.f32 %v8044_v53, %v6454_v0 }
 0x56b   : > { %v2044_v11 = vsel %vm636_vm8, %v1996_v48, 0.0 }
 0x56c   : > { %v6508_v27 = vadd.f32 %v2040_v30, %v881_v46  ;;  %v6522_v35 = vadd.f32 %v2044_v11, %v901_v3  ;;  %v6538_v58 = vadd.f32 %v2045_v5, %v907_v55  ;;  %v8047_v11 = vld [vmem:[#allocation28_spill] sm:$0xff] }
 0x56d   : > { %v927_v9 = vadd.f32 %v8047_v11, %v6454_v0  ;;  %v951_v11 = vadd.f32 %v6367_v62, %v6454_v0 }
 0x582   : > { %2071 = vadd.xlane.f32.xlu0 %v6470_v16 }
 0x586   : > { %2075 = vadd.xlane.f32.xlu0 %v6485_v61 }
 0x58a   : > { %2077 = vadd.xlane.f32.xlu0 %v6504_v36 }
 0x58b   : > { %2073 = vadd.xlane.f32.xlu1 %v6508_v27 }
 0x58e   : > { %2081 = vadd.xlane.f32.xlu0 %v6522_v35 }
 0x58f   : > { %2079 = vadd.xlane.f32.xlu1 %v6526_v42 }
 0x592   : > { %2085 = vadd.xlane.f32.xlu0 %v6536_v28 }
 0x593   : > { %2083 = vadd.xlane.f32.xlu1 %v6538_v58 }
 0x598   : > { %v1947_v22 = vpop.permute.xlu1 %1946 }
 0x599   : > { %v1984_v39 = vsel %vm977_vm2, %v6385_v4, %v1947_v22  ;;  %v8051_v22 = vld [vmem:[#allocation31_spill] sm:$0xff] }
 0x59a   : > { %v2001_v57 = vsel %vm1990_vm3, %v1984_v39, 0.0  ;;  %v941_v39 = vadd.f32 %v8051_v22, %v6454_v0 }
 0x59b   : > { %v2049_v40 = vsel %vm641_vm13, %v2001_v57, 0.0  ;;  %v8052_v57 = vld [vmem:[#allocation30_spill] sm:$0xff] }
 0x59c   : > { %v1943_v10 = vpop.permute.xlu1 %1942  ;;  %v1949_v18 = vpop.permute.xlu0 %1948  ;;  %v6573_v34 = vadd.f32 %v2049_v40, %v927_v9  ;;  %v8053_v40 = vld [vmem:[#allocation32_spill] sm:$0xff] }
 0x59d   : > { %v1982_v7 = vsel %vm977_vm2, %v6387_v29, %v1943_v10  ;;  %v1985_v4 = vsel %vm977_vm2, %v6389_v37, %v1949_v18  ;;  %v8046_v29 = vld [vmem:[#allocation27_spill] sm:$0xff] }
 0x59e   : > { %v1999_v30 = vsel %vm1990_vm3, %v1982_v7, 0.0  ;;  %v921_v2 = vadd.f32 %v8046_v29, %v6454_v0  ;;  %v2002_v37 = vsel %vm1990_vm3, %v1985_v4, 0.0 }
 0x59f   : > { %v2047_v48 = vsel %vm639_vm12, %v1999_v30, 0.0  ;;  %v937_v30 = vadd.f32 %v8052_v57, %v6454_v0 }
 0x5a0   : > { %v1945_v33 = vpop.permute.xlu0 %1944  ;;  %v6556_v46 = vadd.f32 %v2047_v48, %v917_v32 }
 0x5a1   : > { %v1983_v13 = vsel %vm977_vm2, %v6391_v63, %v1945_v33  ;;  %v2050_v63 = vsel %vm642_vm15, %v2002_v37, 0.0 }
 0x5a2   : > { %v2000_v3 = vsel %vm1990_vm3, %v1983_v13, 0.0  ;;  %2087 = vadd.xlane.f32.xlu1 %v6556_v46  ;;  %v6583_v15 = vadd.f32 %v2050_v63, %v931_v8  ;;  %v947_v13 = vadd.f32 %v8053_v40, %v6454_v0 }
 0x5a3   : > { %v2048_v21 = vsel %vm7930_vm14, %v2000_v3, 0.0 }
 0x5a4   : > { %v6575_v51 = vadd.f32 %v2048_v21, %v921_v2 }
 0x5a6   : > { %2091 = vadd.xlane.f32.xlu1 %v6573_v34  ;;  %2089 = vadd.xlane.f32.xlu0 %v6575_v51 }
 0x5aa   : > { %2093 = vadd.xlane.f32.xlu0 %v6583_v15 }
 0x5d6   : > { %v6586_v47 = vpop.xlane.xlu0 %629 }
 0x5d7   : > { %8049 = vst [vmem:[#allocation17_spill] sm:$0xff] %v6586_v47  ;;  %v6588_v6 = vpop.xlane.xlu1 %627  ;;  %vm646_vm14 = vcmp.gt.f32.partialorder %v6586_v47, 0.0 }
 0x5d8   : > { %8050 = vst [vmem:[#allocation18_spill] sm:$0xff] %v6588_v6 }
 0x5da   : > { %v1953_v5 = vpop.permute.xlu0 %1952 }
 0x5db   : > { %v1987_v53 = vsel %vm977_vm2, %v6399_v17, %v1953_v5  ;;  %v1955_v55 = vpop.permute.xlu1 %1954 }
 0x5dc   : > { %v2004_v10 = vsel %vm1990_vm3, %v1987_v53, 0.0  ;;  %v1988_v7 = vsel %vm977_vm2, %v6393_v45, %v1955_v55 }
 0x5dd   : > { %v2052_v18 = vsel %vm7929_vm0, %v2004_v10, 0.0  ;;  %v2005_v48 = vsel %vm1990_vm3, %v1988_v7, 0.0  ;;  %vm7931_vm0 = vcmp.gt.f32.partialorder %v6588_v6, 0.0 }
 0x5de   : > { %v6600_v44 = vadd.f32 %v2052_v18, %v941_v39 }
 0x5df   : > { %v1951_v32 = vpop.permute.xlu1 %1950 }
 0x5e0   : > { %v1986_v17 = vsel %vm977_vm2, %v6395_v1, %v1951_v32  ;;  %2097 = vadd.xlane.f32.xlu0 %v6600_v44  ;;  %v2053_v1 = vsel %vm7931_vm0, %v2005_v48, 0.0 }
 0x5e1   : > { %v2003_v4 = vsel %vm1990_vm3, %v1986_v17, 0.0  ;;  %v6628_v3 = vadd.f32 %v2053_v1, %v947_v13 }
 0x5e2   : > { %v2051_v45 = vsel %vm643_vm1, %v2003_v4, 0.0 }
 0x5e3   : > { %v1957_v33 = vpop.permute.xlu1 %1956  ;;  %v6613_v29 = vadd.f32 %v2051_v45, %v937_v30 }
 0x5e4   : > { %v1989_v2 = vsel %vm977_vm2, %v6397_v26, %v1957_v33  ;;  %v8054_v26 = vlaneseq }
 0x5e5   : > { %v2006_v9 = vsel %vm1990_vm3, %v1989_v2, 0.0  ;;  %2095 = vadd.xlane.f32.xlu1 %v6613_v29  ;;  %vm2786_vm3 = vcmask 130048  }
 0x5e6   : > { %v2054_v37 = vsel %vm646_vm14, %v2006_v9, 0.0  ;;  %v6635_v63 = vand.u32 127, %v8054_v26 }
 0x5e7   : > { %v6630_v21 = vadd.f32 %v2054_v37, %v951_v11 }
 0x5e8   : > { %8055 = vst [vmem:[#allocation20_spill] sm:$0xff] %v6635_v63  ;;  %vm2137_vm0 = vcmp.lt.s32.totalorder %v6635_v63, 64 }
 0x5e9   : > { %2099 = vadd.xlane.f32.xlu1 %v6628_v3  ;;  %2101 = vadd.xlane.f32.xlu0 %v6630_v21  ;;  %v6639_v8 = vsel %vm2137_vm0, 1.0, %v7932_v60 }
 0x60b   : > { %v2072_v62 = vpop.xlane.xlu0 %2071 }
 0x60c   : > { %v2103_v0 = vmul.f32 0.015625, %v2072_v62 }
 0x60e   : > { %v2119_v5 = vsub.f32 %v6470_v16, %v2103_v0 }
 0x60f   : > { %v2076_v53 = vpop.xlane.xlu0 %2075 }
 0x610   : > { %v6643_v55 = vmul.f32 %v6639_v8, %v2119_v5  ;;  %v2105_v22 = vmul.f32 0.015625, %v2076_v53  ;;  %v4900_v53 = vld [vmem:[#allocation6 + $0xe4] ss:$16 sps:$4 sm:$0xff]  }
 0x611   : > { %2536 = vmatprep.subr.bf16.mxu1 %v4900_v53 }
 0x612   : > { %v2121_v39 = vsub.f32 %v6485_v61, %v2105_v22  ;;  %v2156_v10 = vmul.f32 %v6643_v55, %v6643_v55  ;;  %v4903_v22 = vld [vmem:[#allocation6 + $0xec] ss:$16 sps:$4 sm:$0xff]  }
 0x613   : > { %v2078_v18 = vpop.xlane.xlu0 %2077  ;;  %2649 = vmatprep.subr.bf16.mxu0 %v4903_v22  ;;  %v4924_v22 = vld [vmem:[#allocation6 + $0x64] ss:$16 sps:$4 sm:$0xff]  }
 0x614   : > { %v6649_v7 = vmul.f32 %v6639_v8, %v2121_v39  ;;  %v2106_v32 = vmul.f32 0.015625, %v2078_v18  ;;  %v2074_v17 = vpop.xlane.xlu1 %2073  ;;  %2172 = vadd.xlane.f32.xlu1 %v2156_v10  ;;  %v4898_v39 = vld [vmem:[#allocation6 + $0xe0] ss:$16 sps:$4 sm:$0xff]   ;;  %v4901_v10 = vld [vmem:[#allocation6 + $0xe8] ss:$16 sps:$4 sm:$0xff]  }
 0x615   : > { %v2104_v57 = vmul.f32 0.015625, %v2074_v17  ;;  %2537 = vmatpush1.bf16.msra.mxu1 %v4898_v39  ;;  %2650 = vmatpush1.bf16.msra.mxu0 %v4901_v10  ;;  %v4906_v17 = vld [vmem:[#allocation6 + $0xc4] ss:$16 sps:$4 sm:$0xff]   ;;  %v4927_v39 = vld [vmem:[#allocation6 + $0x6c] ss:$16 sps:$4 sm:$0xff]  }
 0x616   : > { %v2122_v16 = vsub.f32 %v6504_v36, %v2106_v32  ;;  %v2158_v30 = vmul.f32 %v6649_v7, %v6649_v7  ;;  %2538 = vmatprep.subr.bf16.mxu1 %v4906_v17  ;;  %v4922_v10 = vld [vmem:[#allocation6 + $0x60] ss:$16 sps:$4 sm:$0xff]  }
 0x617   : > { %v2120_v48 = vsub.f32 %v6508_v27, %v2104_v57  ;;  %v2082_v4 = vpop.xlane.xlu0 %2081  ;;  %v4909_v57 = vld [vmem:[#allocation6 + $0xcc] ss:$16 sps:$4 sm:$0xff]  }
 0x618   : > { %v2108_v61 = vmul.f32 0.015625, %v2082_v4  ;;  %v2080_v45 = vpop.xlane.xlu1 %2079  ;;  %2176 = vadd.xlane.f32.xlu1 %v2158_v30  ;;  %v6659_v2 = vmul.f32 %v6639_v8, %v2122_v16  ;;  %v4904_v16 = vld [vmem:[#allocation6 + $0xc0] ss:$16 sps:$4 sm:$0xff]   ;;  %v4907_v30 = vld [vmem:[#allocation6 + $0xc8] ss:$16 sps:$4 sm:$0xff]   ;;  %2651 = vmatprep.subr.bf16.mxu0 %v4909_v57 }
 0x619   : > { %v6656_v33 = vmul.f32 %v6639_v8, %v2120_v48  ;;  %v2107_v1 = vmul.f32 0.015625, %v2080_v45  ;;  %2539 = vmatpush1.bf16.msra.mxu1 %v4904_v16  ;;  %2652 = vmatpush1.bf16.msra.mxu0 %v4907_v30  ;;  %v4912_v4 = vld [vmem:[#allocation6 + $0xa4] ss:$16 sps:$4 sm:$0xff]   ;;  %v4910_v45 = vld [vmem:[#allocation6 + $0xa0] ss:$16 sps:$4 sm:$0xff]  }
 0x61a   : > { %v2124_v40 = vsub.f32 %v6522_v35, %v2108_v61  ;;  %v2159_v62 = vmul.f32 %v6659_v2, %v6659_v2  ;;  %v4915_v61 = vld [vmem:[#allocation6 + $0xac] ss:$16 sps:$4 sm:$0xff]   ;;  %2540 = vmatprep.subr.bf16.mxu1 %v4912_v4  ;;  %v4930_v4 = vld [vmem:[#allocation6 + $0x44] ss:$16 sps:$4 sm:$0xff]  }
 0x61b   : > { %v2123_v36 = vsub.f32 %v6526_v42, %v2107_v1  ;;  %v2086_v13 = vpop.xlane.xlu0 %2085  ;;  %v2157_v11 = vmul.f32 %v6656_v33, %v6656_v33  ;;  %v4913_v1 = vld [vmem:[#allocation6 + $0xa8] ss:$16 sps:$4 sm:$0xff]   ;;  %2653 = vmatprep.subr.bf16.mxu0 %v4915_v61  ;;  %v4928_v61 = vld [vmem:[#allocation6 + $0x40] ss:$16 sps:$4 sm:$0xff]  }
 0x61c   : > { %v2110_v27 = vmul.f32 0.015625, %v2086_v13  ;;  %v2084_v9 = vpop.xlane.xlu1 %2083  ;;  %v6671_v0 = vmul.f32 %v6639_v8, %v2124_v40  ;;  %v4918_v13 = vld [vmem:[#allocation6 + $0x84] ss:$16 sps:$4 sm:$0xff]  }
 0x61d   : > { %v6666_v37 = vmul.f32 %v6639_v8, %v2123_v36  ;;  %v2109_v26 = vmul.f32 0.015625, %v2084_v9  ;;  %2174 = vadd.xlane.f32.xlu0 %v2157_v11  ;;  %2541 = vmatpush1.bf16.msra.mxu1 %v4910_v45  ;;  %v4921_v11 = vld [vmem:[#allocation6 + $0x8c] ss:$16 sps:$4 sm:$0xff]   ;;  %v4919_v9 = vld [vmem:[#allocation6 + $0x88] ss:$16 sps:$4 sm:$0xff]  }
 0x61e   : > { %v2126_v35 = vsub.f32 %v6536_v28, %v2110_v27  ;;  %2654 = vmatpush1.bf16.msra.mxu0 %v4913_v1  ;;  %v4916_v27 = vld [vmem:[#allocation6 + $0x80] ss:$16 sps:$4 sm:$0xff]   ;;  %2542 = vmatprep.subr.bf16.mxu1 %v4918_v13  ;;  %v4936_v13 = vld [vmem:[#allocation6 + $0x24] ss:$16 sps:$4 sm:$0xff]  }
 0x61f   : > { %v2125_v42 = vsub.f32 %v6538_v58, %v2109_v26  ;;  %v2160_v5 = vmul.f32 %v6666_v37, %v6666_v37  ;;  %v2161_v58 = vmul.f32 %v6671_v0, %v6671_v0  ;;  %2655 = vmatprep.subr.bf16.mxu0 %v4921_v11  ;;  %v4939_v11 = vld [vmem:[#allocation6 + $0x2c] ss:$16 sps:$4 sm:$0xff]  }
 0x620   : > { %v6681_v32 = vmul.f32 %v6639_v8, %v2126_v35 }
 0x621   : > { %v6678_v18 = vmul.f32 %v6639_v8, %v2125_v42  ;;  %2180 = vadd.xlane.f32.xlu1 %v2160_v5  ;;  %2178 = vadd.xlane.f32.xlu0 %v2159_v62 }
 0x622   : > { %v2163_v48 = vmul.f32 %v6681_v32, %v6681_v32  ;;  %2543 = vmatpush1.bf16.msra.mxu1 %v4916_v27  ;;  %2656 = vmatpush1.bf16.msra.mxu0 %v4919_v9  ;;  %v4934_v27 = vld [vmem:[#allocation6 + $0x20] ss:$16 sps:$4 sm:$0xff]   ;;  %v4937_v9 = vld [vmem:[#allocation6 + $0x28] ss:$16 sps:$4 sm:$0xff]  }
 0x623   : > { %v2162_v28 = vmul.f32 %v6678_v18, %v6678_v18  ;;  %2544 = vmatprep.subr.bf16.mxu1 %v4924_v22  ;;  %2657 = vmatprep.subr.bf16.mxu0 %v4927_v39 }
 0x625   : > { %2184 = vadd.xlane.f32.xlu1 %v2162_v28  ;;  %2182 = vadd.xlane.f32.xlu0 %v2161_v58  ;;  %v4925_v28 = vld [vmem:[#allocation6 + $0x68] ss:$16 sps:$4 sm:$0xff]  }
 0x626   : > { %2545 = vmatpush1.bf16.msra.mxu1 %v4922_v10  ;;  %2658 = vmatpush1.bf16.msra.mxu0 %v4925_v28 }
 0x627   : > { %2546 = vmatprep.subr.bf16.mxu1 %v4930_v4 }
 0x629   : > { %2186 = vadd.xlane.f32.xlu0 %v2163_v48 }
 0x62a   : > { %2547 = vmatpush1.bf16.msra.mxu1 %v4928_v61 }
 0x62b   : > { %v2088_v40 = vpop.xlane.xlu1 %2087  ;;  %2548 = vmatprep.subr.bf16.mxu1 %v4936_v13 }
 0x62c   : > { %v2111_v36 = vmul.f32 0.015625, %v2088_v40 }
 0x62e   : > { %v2127_v26 = vsub.f32 %v6556_v46, %v2111_v36  ;;  %2549 = vmatpush1.bf16.msra.mxu1 %v4934_v27 }
 0x62f   : > { %v2092_v62 = vpop.xlane.xlu1 %2091  ;;  %v2090_v35 = vpop.xlane.xlu0 %2089 }
 0x630   : > { %v6691_v42 = vmul.f32 %v6639_v8, %v2127_v26  ;;  %v2113_v5 = vmul.f32 0.015625, %v2092_v62  ;;  %v2112_v53 = vmul.f32 0.015625, %v2090_v35  ;;  %v4942_v26 = vld [vmem:[#allocation6 + $0x4] ss:$16 sps:$4 sm:$0xff]   ;;  %v4945_v62 = vld [vmem:[#allocation6 + $0xc] ss:$16 sps:$4 sm:$0xff]  }
 0x631   : > { %v4940_v35 = vld [vmem:[#allocation6] ss:$16 sps:$4 sm:$0xff]   ;;  %2550 = vmatprep.subr.bf16.mxu1 %v4942_v26 }
 0x632   : > { %v2129_v58 = vsub.f32 %v6573_v34, %v2113_v5  ;;  %v2128_v17 = vsub.f32 %v6575_v51, %v2112_v53  ;;  %v2164_v46 = vmul.f32 %v6691_v42, %v6691_v42  ;;  %v4933_v34 = vld [vmem:[#allocation6 + $0x4c] ss:$16 sps:$4 sm:$0xff]   ;;  %v4931_v51 = vld [vmem:[#allocation6 + $0x48] ss:$16 sps:$4 sm:$0xff]   ;;  %2551 = vmatpush1.bf16.msra.mxu1 %v4940_v35 }
 0x633   : > { %v2094_v57 = vpop.xlane.xlu0 %2093  ;;  %2659 = vmatprep.subr.bf16.mxu0 %v4933_v34  ;;  %v4943_v5 = vld [vmem:[#allocation6 + $0x8] ss:$16 sps:$4 sm:$0xff]  }
 0x634   : > { %v6698_v16 = vmul.f32 %v6639_v8, %v2129_v58  ;;  %v6701_v30 = vmul.f32 %v6639_v8, %v2128_v17  ;;  %v2114_v48 = vmul.f32 0.015625, %v2094_v57  ;;  %2188 = vadd.xlane.f32.xlu1 %v2164_v46  ;;  %2660 = vmatpush1.bf16.msra.mxu0 %v4931_v51 }
 0x635   : > { %2661 = vmatprep.subr.bf16.mxu0 %v4939_v11 }
 0x636   : > { %v2130_v45 = vsub.f32 %v6583_v15, %v2114_v48  ;;  %v2166_v1 = vmul.f32 %v6698_v16, %v6698_v16  ;;  %v2165_v40 = vmul.f32 %v6701_v30, %v6701_v30 }
 0x638   : > { %v6709_v36 = vmul.f32 %v6639_v8, %v2130_v45  ;;  %2192 = vadd.xlane.f32.xlu1 %v2166_v1  ;;  %2190 = vadd.xlane.f32.xlu0 %v2165_v40 }
 0x639   : > { %2662 = vmatpush1.bf16.msra.mxu0 %v4937_v9 }
 0x63a   : > { %v2167_v15 = vmul.f32 %v6709_v36, %v6709_v36  ;;  %2663 = vmatprep.subr.bf16.mxu0 %v4945_v62 }
 0x63c   : > { %2194 = vadd.xlane.f32.xlu0 %v2167_v15 }
 0x63d   : > { %2664 = vmatpush1.bf16.msra.mxu0 %v4943_v5 }
 0x669   : > { %v2098_v53 = vpop.xlane.xlu0 %2097 }
 0x66a   : > { %v2116_v22 = vmul.f32 0.015625, %v2098_v53 }
 0x66c   : > { %v2132_v39 = vsub.f32 %v6600_v44, %v2116_v22 }
 0x66e   : > { %v6715_v10 = vmul.f32 %v6639_v8, %v2132_v39  ;;  %v2096_v28 = vpop.xlane.xlu1 %2095 }
 0x66f   : > { %v2115_v58 = vmul.f32 0.015625, %v2096_v28 }
 0x670   : > { %v2169_v17 = vmul.f32 %v6715_v10, %v6715_v10 }
 0x671   : > { %v2131_v46 = vsub.f32 %v6613_v29, %v2115_v58 }
 0x672   : > { %v2100_v57 = vpop.xlane.xlu1 %2099  ;;  %2198 = vadd.xlane.f32.xlu0 %v2169_v17  ;;  %v2102_v48 = vpop.xlane.xlu0 %2101 }
 0x673   : > { %v6721_v4 = vmul.f32 %v6639_v8, %v2131_v46  ;;  %v2117_v34 = vmul.f32 0.015625, %v2100_v57  ;;  %v2118_v61 = vmul.f32 0.015625, %v2102_v48 }
 0x675   : > { %v2133_v44 = vsub.f32 %v6628_v3, %v2117_v34  ;;  %v2134_v51 = vsub.f32 %v6630_v21, %v2118_v61  ;;  %v2168_v45 = vmul.f32 %v6721_v4, %v6721_v4 }
 0x677   : > { %v6728_v1 = vmul.f32 %v6639_v8, %v2133_v44  ;;  %v6731_v29 = vmul.f32 %v6639_v8, %v2134_v51  ;;  %2196 = vadd.xlane.f32.xlu1 %v2168_v45  ;;  %v6741_v45 = vld [vmem:[%s7853_s4] ss:$0 sm:$0xff] }
 0x679   : > { %v2170_v40 = vmul.f32 %v6728_v1, %v6728_v1  ;;  %v2171_v13 = vmul.f32 %v6731_v29, %v6731_v29 }
 0x67b   : > { %2200 = vadd.xlane.f32.xlu1 %v2170_v40  ;;  %2202 = vadd.xlane.f32.xlu0 %v2171_v13 }
 0x69d   : > { %v2173_v3 = vpop.xlane.xlu1 %2172 }
 0x69e   : > { %v2204_v21 = vmul.f32 0.015625, %v2173_v3 }
 0x6a0   : > { %v2220_v11 = vadd.f32 1e-05, %v2204_v21 }
 0x6a1   : > { %v2177_v27 = vpop.xlane.xlu1 %2176 }
 0x6a2   : > { %5074 = vrsqrt.f32 %v2220_v11  ;;  %v2206_v9 = vmul.f32 0.015625, %v2177_v27 }
 0x6a4   : > { %v2222_v62 = vadd.f32 1e-05, %v2206_v9  ;;  %v6748_v9 = vld [vmem:[%s7854_s5] ss:$0 sm:$0xff] }
 0x6a6   : > { %v2175_v15 = vpop.xlane.xlu0 %2174 }
 0x6a7   : > { %v2205_v26 = vmul.f32 0.015625, %v2175_v15 }
 0x6a9   : > { %v2221_v8 = vadd.f32 1e-05, %v2205_v26 }
 0x6aa   : > { %v2181_v35 = vpop.xlane.xlu1 %2180  ;;  %v2179_v5 = vpop.xlane.xlu0 %2178 }
 0x6ab   : > { %5076 = vrsqrt.f32 %v2221_v8  ;;  %v2207_v53 = vmul.f32 0.015625, %v2179_v5  ;;  %v2208_v22 = vmul.f32 0.015625, %v2181_v35 }
 0x6ac   : > { %5078 = vrsqrt.f32 %v2222_v62 }
 0x6ad   : > { %v2223_v39 = vadd.f32 1e-05, %v2207_v53  ;;  %v2224_v17 = vadd.f32 1e-05, %v2208_v22 }
 0x6ae   : > { %v2183_v28 = vpop.xlane.xlu0 %2182  ;;  %v2185_v48 = vpop.xlane.xlu1 %2184 }
 0x6af   : > { %v2209_v58 = vmul.f32 0.015625, %v2183_v28  ;;  %5080 = vrsqrt.f32 %v2223_v39  ;;  %v5075_v57 = vpop.eup %5074  ;;  %v2210_v51 = vmul.f32 0.015625, %v2185_v48 }
 0x6b0   : > { %v2252_v44 = vmul.f32 %v5075_v57, %v6643_v55 }
 0x6b1   : > { %v2225_v46 = vadd.f32 1e-05, %v2209_v58  ;;  %v2226_v21 = vadd.f32 1e-05, %v2210_v51 }
 0x6b2   : > { %v2187_v34 = vpop.xlane.xlu0 %2186  ;;  %v2275_v11 = vmul.f32 %v6741_v45, %v2252_v44 }
 0x6b3   : > { %v2211_v61 = vmul.f32 0.015625, %v2187_v34  ;;  %5082 = vrsqrt.f32 %v2225_v46 }
 0x6b4   : > { %5084 = vrsqrt.f32 %v2224_v17  ;;  %v2298_v62 = vadd.f32 %v6748_v9, %v2275_v11 }
 0x6b5   : > { %v2227_v40 = vadd.f32 1e-05, %v2211_v61 }
 0x6b7   : > { %5086 = vrsqrt.f32 %v2227_v40 }
 0x6b8   : > { %v5077_v13 = vpop.eup %5076  ;;  %5088 = vrsqrt.f32 %v2226_v21 }
 0x6b9   : > { %v2253_v3 = vmul.f32 %v5077_v13, %v6656_v33  ;;  %v5079_v27 = vpop.eup %5078 }
 0x6ba   : > { %v2254_v33 = vmul.f32 %v5079_v27, %v6649_v7 }
 0x6bb   : > { %v2276_v55 = vmul.f32 %v6741_v45, %v2253_v3 }
 0x6bc   : > { %v5081_v15 = vpop.eup %5080  ;;  %v2277_v17 = vmul.f32 %v6741_v45, %v2254_v33 }
 0x6bd   : > { %v2189_v26 = vpop.xlane.xlu1 %2188  ;;  %v2299_v8 = vadd.f32 %v6748_v9, %v2276_v55  ;;  %v2255_v5 = vmul.f32 %v5081_v15, %v6659_v2 }
 0x6be   : > { %v2212_v35 = vmul.f32 0.015625, %v2189_v26  ;;  %v2300_v51 = vadd.f32 %v6748_v9, %v2277_v17 }
 0x6bf   : > { %v2314_v53 = vpack.c.bf16 %v2299_v8, %v2298_v62  ;;  %v2278_v22 = vmul.f32 %v6741_v45, %v2255_v5 }
 0x6c0   : > { %v5083_v39 = vpop.eup %5082  ;;  %v2228_v28 = vadd.f32 1e-05, %v2212_v35 }
 0x6c1   : > { %2569 = vmatmul.mubr.bf16.vlgmr.msra.gmra.mxu1 %v2314_v53  ;;  %2682 = vmatmul.mubr.bf16.vlgmr.msra.gmra.mxu0 %v2314_v53  ;;  %v2191_v58 = vpop.xlane.xlu0 %2190  ;;  %v5085_v46 = vpop.eup %5084  ;;  %v2301_v7 = vadd.f32 %v6748_v9, %v2278_v22  ;;  %v2257_v2 = vmul.f32 %v5083_v39, %v6671_v0 }
 0x6c2   : > { %v2193_v57 = vpop.xlane.xlu1 %2192  ;;  %v2213_v48 = vmul.f32 0.015625, %v2191_v58  ;;  %2578 = vmatprep.mubr.bf16.mxu1 %v8021_v14  ;;  %2691 = vmatprep.mubr.bf16.mxu0 %v8021_v14  ;;  %5090 = vrsqrt.f32 %v2228_v28  ;;  %v2256_v40 = vmul.f32 %v5085_v46, %v6666_v37 }
 0x6c3   : > { %v2214_v61 = vmul.f32 0.015625, %v2193_v57  ;;  %v2315_v3 = vpack.c.bf16 %v2301_v7, %v2300_v51  ;;  %v2280_v21 = vmul.f32 %v6741_v45, %v2257_v2 }
 0x6c4   : > { %v2229_v34 = vadd.f32 1e-05, %v2213_v48  ;;  %v5087_v11 = vpop.eup %5086  ;;  %v2279_v0 = vmul.f32 %v6741_v45, %v2256_v40 }
 0x6c5   : > { %v2195_v44 = vpop.xlane.xlu0 %2194  ;;  %v2230_v55 = vadd.f32 1e-05, %v2214_v61  ;;  %v5089_v15 = vpop.eup %5088  ;;  %v2303_v37 = vadd.f32 %v6748_v9, %v2280_v21  ;;  %v2259_v26 = vmul.f32 %v5087_v11, %v6681_v32 }
 0x6c6   : > { %v2215_v13 = vmul.f32 0.015625, %v2195_v44  ;;  %5092 = vrsqrt.f32 %v2229_v34  ;;  %v2302_v62 = vadd.f32 %v6748_v9, %v2279_v0  ;;  %v2258_v8 = vmul.f32 %v5089_v15, %v6678_v18 }
 0x6c7   : > { %v2282_v35 = vmul.f32 %v6741_v45, %v2259_v26 }
 0x6c8   : > { %v2231_v27 = vadd.f32 1e-05, %v2215_v13  ;;  %v2316_v33 = vpack.c.bf16 %v2303_v37, %v2302_v62  ;;  %v2281_v5 = vmul.f32 %v6741_v45, %v2258_v8 }
 0x6c9   : > { %2579 = vmatmul.mubr.bf16.gmra.mxu1 %v2315_v3  ;;  %2692 = vmatmul.mubr.bf16.gmra.mxu0 %v2315_v3  ;;  %v2305_v22 = vadd.f32 %v6748_v9, %v2282_v35 }
 0x6ca   : > { %2588 = vmatprep.mubr.bf16.mxu1 %v8021_v14  ;;  %2701 = vmatprep.mubr.bf16.mxu0 %v8021_v14  ;;  %5094 = vrsqrt.f32 %v2231_v27  ;;  %v2304_v39 = vadd.f32 %v6748_v9, %v2281_v5 }
 0x6cb   : > { %5096 = vrsqrt.f32 %v2230_v55 }
 0x6cc   : > { %v2317_v58 = vpack.c.bf16 %v2305_v22, %v2304_v39 }
 0x6cf   : > { %v5091_v53 = vpop.eup %5090 }
 0x6d0   : > { %v2260_v28 = vmul.f32 %v5091_v53, %v6691_v42 }
 0x6d1   : > { %2589 = vmatmul.mubr.bf16.gmra.mxu1 %v2316_v33  ;;  %2702 = vmatmul.mubr.bf16.gmra.mxu0 %v2316_v33 }
 0x6d2   : > { %2598 = vmatprep.mubr.bf16.mxu1 %v8021_v14  ;;  %2711 = vmatprep.mubr.bf16.mxu0 %v8021_v14  ;;  %v2283_v57 = vmul.f32 %v6741_v45, %v2260_v28 }
 0x6d3   : > { %v5093_v32 = vpop.eup %5092 }
 0x6d4   : > { %v2261_v18 = vmul.f32 %v5093_v32, %v6701_v30  ;;  %v2306_v42 = vadd.f32 %v6748_v9, %v2283_v57 }
 0x6d6   : > { %v2284_v17 = vmul.f32 %v6741_v45, %v2261_v18 }
 0x6d7   : > { %v5095_v46 = vpop.eup %5094 }
 0x6d8   : > { %v5097_v48 = vpop.eup %5096  ;;  %v2307_v7 = vadd.f32 %v6748_v9, %v2284_v17  ;;  %v2263_v2 = vmul.f32 %v5095_v46, %v6709_v36 }
 0x6d9   : > { %2599 = vmatmul.mubr.bf16.gmra.mxu1 %v2317_v58  ;;  %2712 = vmatmul.mubr.bf16.gmra.mxu0 %v2317_v58  ;;  %v2262_v30 = vmul.f32 %v5097_v48, %v6698_v16 }
 0x6da   : > { %2608 = vmatprep.mubr.bf16.mxu1 %v8021_v14  ;;  %2721 = vmatprep.mubr.bf16.mxu0 %v8021_v14  ;;  %v2318_v34 = vpack.c.bf16 %v2307_v7, %v2306_v42  ;;  %v2286_v61 = vmul.f32 %v6741_v45, %v2263_v2 }
 0x6db   : > { %v2285_v44 = vmul.f32 %v6741_v45, %v2262_v30  ;;  %v8057_v30 = vsub.s32 2, %v8036_v49 }
 0x6dc   : > { %v2309_v51 = vadd.f32 %v6748_v9, %v2286_v61 }
 0x6dd   : > { %v2308_v40 = vadd.f32 %v6748_v9, %v2285_v44 }
 0x6df   : > { %v2319_v36 = vpack.c.bf16 %v2309_v51, %v2308_v40 }
 0x6e1   : > { %2609 = vmatmul.mubr.bf16.gmra.mxu1 %v2318_v34  ;;  %2722 = vmatmul.mubr.bf16.gmra.mxu0 %v2318_v34 }
 0x6e2   : > { %2618 = vmatprep.mubr.bf16.mxu1 %v8021_v14  ;;  %2731 = vmatprep.mubr.bf16.mxu0 %v8021_v14 }
 0x6e9   : > { %2619 = vmatmul.mubr.bf16.gmra.mxu1 %v2319_v36  ;;  %2732 = vmatmul.mubr.bf16.gmra.mxu0 %v2319_v36 }
 0x6ea   : > { %2628 = vmatprep.mubr.bf16.mxu1 %v8021_v14  ;;  %2741 = vmatprep.mubr.bf16.mxu0 %v8021_v14 }
 0x6fb   : > { %v2199_v16 = vpop.xlane.xlu0 %2198 }
 0x6fc   : > { %v2217_v13 = vmul.f32 0.015625, %v2199_v16 }
 0x6fe   : > { %v2233_v3 = vadd.f32 1e-05, %v2217_v13 }
 0x700   : > { %5098 = vrsqrt.f32 %v2233_v3  ;;  %v2197_v21 = vpop.xlane.xlu1 %2196 }
 0x701   : > { %v2216_v11 = vmul.f32 0.015625, %v2197_v21 }
 0x703   : > { %v2232_v27 = vadd.f32 1e-05, %v2216_v11 }
 0x704   : > { %v2201_v55 = vpop.xlane.xlu1 %2200  ;;  %v2203_v0 = vpop.xlane.xlu0 %2202 }
 0x705   : > { %5100 = vrsqrt.f32 %v2232_v27  ;;  %v2218_v15 = vmul.f32 0.015625, %v2201_v55  ;;  %v2219_v37 = vmul.f32 0.015625, %v2203_v0 }
 0x707   : > { %v2234_v26 = vadd.f32 1e-05, %v2218_v15  ;;  %v2235_v62 = vadd.f32 1e-05, %v2219_v37 }
 0x709   : > { %5102 = vrsqrt.f32 %v2234_v26 }
 0x70a   : > { %5104 = vrsqrt.f32 %v2235_v62 }
 0x70d   : > { %v5099_v8 = vpop.eup %5098 }
 0x70e   : > { %v2265_v33 = vmul.f32 %v5099_v8, %v6715_v10 }
 0x710   : > { %v2288_v53 = vmul.f32 %v6741_v45, %v2265_v33 }
 0x712   : > { %v5101_v35 = vpop.eup %5100  ;;  %v2311_v18 = vadd.f32 %v6748_v9, %v2288_v53 }
 0x713   : > { %v2264_v5 = vmul.f32 %v5101_v35, %v6721_v4 }
 0x715   : > { %v2287_v22 = vmul.f32 %v6741_v45, %v2264_v5 }
 0x716   : > { %v5103_v32 = vpop.eup %5102 }
 0x717   : > { %v5105_v39 = vpop.eup %5104  ;;  %v2310_v28 = vadd.f32 %v6748_v9, %v2287_v22  ;;  %v2266_v58 = vmul.f32 %v5103_v32, %v6728_v1  ;;  %v2354_v1 = vld [vmem:[%s7856_s7] sm:$0xf] }
 0x718   : > { %v2267_v17 = vmul.f32 %v5105_v39, %v6731_v29 }
 0x719   : > { %v2320_v46 = vpack.c.bf16 %v2311_v18, %v2310_v28  ;;  %v2289_v10 = vmul.f32 %v6741_v45, %v2266_v58 }
 0x71a   : > { %v2290_v57 = vmul.f32 %v6741_v45, %v2267_v17  ;;  %v8056_v45 = vsub.s32 0, %v8036_v49 }
 0x71b   : > { %2629 = vmatmul.mubr.bf16.gmra.mxu1 %v2320_v46  ;;  %2742 = vmatmul.mubr.bf16.gmra.mxu0 %v2320_v46  ;;  %v2312_v4 = vadd.f32 %v6748_v9, %v2289_v10 }
 0x71c   : > { %2638 = vmatprep.mubr.bf16.mxu1 %v8021_v14  ;;  %2751 = vmatprep.mubr.bf16.mxu0 %v8021_v14  ;;  %v2313_v48 = vadd.f32 %v6748_v9, %v2290_v57  ;;  %v6814_v42 = vrot.slane %v2354_v1, %v8056_v45  ;;  %v6818_v14 = vrot.slane %v2354_v1, %v8057_v30  ;;  %v8058_v9 = vsub.s32 1, %v8036_v49 }
 0x71e   : > { %v2321_v7 = vpack.c.bf16 %v2313_v48, %v2312_v4  ;;  %v6824_v44 = vrot.slane %v2354_v1, %v8058_v9 }
 0x723   : > { %2639 = vmatmul.mubr.bf16.gmra.mxu1 %v2321_v7  ;;  %2752 = vmatmul.mubr.bf16.gmra.mxu0 %v2321_v7 }
 0x781   : > { %v2570_v29 = vpop.f32.mrf.mxu1  ;;  %v2683_v2 = vpop.f32.mrf.mxu0 }
 0x782   : > { %v2571_v36 = vadd.f32 %v2570_v29, %v6814_v42  ;;  %v2684_v16 = vadd.f32 %v2683_v2, %v6818_v14 }
 0x783   : > { %v2572_v34 = vpop.f32.mrf.mxu1  ;;  %v6820_v61 = vpop.f32.mrf.mxu0 }
 0x784   : > { %v2573_v27 = vadd.f32 %v2572_v34, %v6824_v44 }
 0x785   : > { %v2574_v51 = vpop.f32.mrf.mxu1  ;;  %v2687_v40 = vpop.f32.mrf.mxu0 }
 0x786   : > { %v2575_v13 = vadd.f32 %v2574_v51, %v6814_v42  ;;  %v2688_v3 = vadd.f32 %v2687_v40, %v6818_v14 }
 0x787   : > { %v2576_v21 = vpop.f32.mrf.mxu1  ;;  %v6830_v11 = vpop.f32.mrf.mxu0 }
 0x788   : > { %8059 = vst [vmem:[#allocation21_spill] sm:$0xff] %v6830_v11  ;;  %v6833_v55 = vpack.c.bf16 %v2575_v13, %v2571_v36  ;;  %v6835_v0 = vpack.c.bf16 %v2688_v3, %v2684_v16  ;;  %v2577_v15 = vadd.f32 %v2576_v21, %v6824_v44 }
 0x789   : > { %v2580_v37 = vpop.f32.mrf.mxu1  ;;  %v2693_v26 = vpop.f32.mrf.mxu0 }
 0x78a   : > { %v6838_v62 = vpack.c.bf16 %v2577_v15, %v2573_v27  ;;  %4664 = vmatprep.mubr.msk.bf16.mxu1 %vm2786_vm3, %v6833_v55  ;;  %v2581_v53 = vadd.f32 %v2580_v37, %v6814_v42  ;;  %v2694_v22 = vadd.f32 %v2693_v26, %v6818_v14 }
 0x78b   : > { %v6842_v8 = vpop.f32.mrf.mxu1  ;;  %v6844_v33 = vpop.f32.mrf.mxu0 }
 0x78d   : > { %v2584_v35 = vpop.f32.mrf.mxu1  ;;  %v2697_v5 = vpop.f32.mrf.mxu0 }
 0x78e   : > { %v2585_v32 = vadd.f32 %v2584_v35, %v6814_v42  ;;  %v2698_v39 = vadd.f32 %v2697_v5, %v6818_v14 }
 0x78f   : > { %v2586_v58 = vpop.f32.mrf.mxu1  ;;  %v6854_v17 = vpop.f32.mrf.mxu0 }
 0x790   : > { %v6850_v28 = vpack.c.bf16 %v2585_v32, %v2581_v53  ;;  %v6852_v18 = vpack.c.bf16 %v2698_v39, %v2694_v22  ;;  %8060 = vst [vmem:[#allocation19_spill] sm:$0xff] %v6854_v17 }
 0x791   : > { %v6856_v46 = vpop.f32.mrf.mxu1  ;;  %v6858_v10 = vpop.f32.mrf.mxu0 }
 0x793   : > { %v6860_v57 = vpop.f32.mrf.mxu1  ;;  %v6862_v4 = vpop.f32.mrf.mxu0 }
 0x794   : > { %8061 = vst [vmem:[#allocation23_spill] sm:$0xff] %v6862_v4 }
 0x795   : > { %v6864_v48 = vpop.f32.mrf.mxu1  ;;  %v6866_v7 = vpop.f32.mrf.mxu0 }
 0x797   : > { %v6868_v1 = vpop.f32.mrf.mxu1  ;;  %v6870_v29 = vpop.f32.mrf.mxu0 }
 0x798   : > { %8062 = vst [vmem:[#allocation22_spill] sm:$0xff] %v6870_v29 }
 0x799   : > { %v6872_v2 = vpop.f32.mrf.mxu1  ;;  %v6874_v45 = vpop.f32.mrf.mxu0 }
 0x79b   : > { %v2602_v30 = vpop.f32.mrf.mxu1  ;;  %v6876_v34 = vpop.f32.mrf.mxu0 }
 0x79c   : > { %8063 = vst [vmem:[#allocation25_spill] sm:$0xff] %v6876_v34 }
 0x79d   : > { %v6878_v9 = vpop.f32.mrf.mxu1  ;;  %v6880_v51 = vpop.f32.mrf.mxu0 }
 0x79f   : > { %v2606_v40 = vpop.f32.mrf.mxu1  ;;  %v6882_v36 = vpop.f32.mrf.mxu0 }
 0x7a0   : > { %8064 = vst [vmem:[#allocation24_spill] sm:$0xff] %v6882_v36 }
 0x7a1   : > { %v6884_v16 = vpop.f32.mrf.mxu1  ;;  %v6886_v13 = vpop.f32.mrf.mxu0 }
 0x7a3   : > { %v6888_v3 = vpop.f32.mrf.mxu1  ;;  %v6890_v21 = vpop.f32.mrf.mxu0 }
 0x7a4   : > { %8065 = vst [vmem:[#allocation26_spill] sm:$0xff] %v6890_v21 }
 0x7a5   : > { %v6892_v27 = vpop.f32.mrf.mxu1  ;;  %v2727_v15 = vpop.f32.mrf.mxu0 }
 0x7a7   : > { %v2616_v37 = vpop.f32.mrf.mxu1  ;;  %v6894_v26 = vpop.f32.mrf.mxu0 }
 0x7a8   : > { %8066 = vst [vmem:[#allocation27_spill] sm:$0xff] %v6894_v26 }
 0x7a9   : > { %v6896_v35 = vpop.f32.mrf.mxu1  ;;  %v2733_v5 = vpop.f32.mrf.mxu0 }
 0x7ab   : > { %v2622_v53 = vpop.f32.mrf.mxu1  ;;  %v6898_v22 = vpop.f32.mrf.mxu0 }
 0x7ac   : > { %8067 = vst [vmem:[#allocation28_spill] sm:$0xff] %v6898_v22 }
 0x7ad   : > { %v6900_v32 = vpop.f32.mrf.mxu1  ;;  %v2737_v39 = vpop.f32.mrf.mxu0 }
 0x7af   : > { %v2626_v60 = vpop.f32.mrf.mxu1  ;;  %v6902_v52 = vpop.f32.mrf.mxu0 }
 0x7b0   : > { %8068 = vst [vmem:[#allocation29_spill] sm:$0xff] %v6902_v52  ;;  %v2607_v52 = vadd.f32 %v2606_v40, %v6824_v44 }
 0x7db   : > { %v6904_v63 = vpop.f32.mrf.mxu1  ;;  %v2743_v47 = vpop.f32.mrf.mxu0 }
 0x7dd   : > { %v2632_v6 = vpop.f32.mrf.mxu1  ;;  %v6906_v54 = vpop.f32.mrf.mxu0 }
 0x7de   : > { %8069 = vst [vmem:[#allocation31_spill] sm:$0xff] %v6906_v54  ;;  %v2633_v38 = vadd.f32 %v2632_v6, %v6824_v44  ;;  %v2603_v54 = vadd.f32 %v2602_v30, %v6824_v44 }
 0x7df   : > { %v6908_v50 = vpop.f32.mrf.mxu1  ;;  %v2747_v19 = vpop.f32.mrf.mxu0 }
 0x7e0   : > { %v2748_v43 = vadd.f32 %v2747_v19, %v6818_v14 }
 0x7e1   : > { %v2636_v26 = vpop.f32.mrf.mxu1  ;;  %v6910_v21 = vpop.f32.mrf.mxu0 }
 0x7e2   : > { %8070 = vst [vmem:[#allocation30_spill] sm:$0xff] %v6910_v21  ;;  %v2637_v24 = vadd.f32 %v2636_v26, %v6824_v44  ;;  %v2587_v21 = vadd.f32 %v2586_v58, %v6824_v44  ;;  %v6924_v26 = vpack.c.bf16 %v2607_v52, %v2603_v54 }
 0x7e3   : > { %v6914_v22 = vpop.f32.mrf.mxu1  ;;  %v2753_v56 = vpop.f32.mrf.mxu0 }
 0x7e4   : > { %v2776_v12 = vpack.c.bf16 %v2637_v24, %v2633_v38  ;;  %v2754_v40 = vadd.f32 %v2753_v56, %v6818_v14  ;;  %v2583_v24 = vadd.f32 %v6842_v8, %v6824_v44  ;;  %v2738_v56 = vadd.f32 %v2737_v39, %v6818_v14 }
 0x7e5   : > { %v2642_v29 = vpop.f32.mrf.mxu1  ;;  %v6917_v4 = vpop.f32.mrf.mxu0  ;;  %v2734_v8 = vadd.f32 %v2733_v5, %v6818_v14  ;;  %v2591_v5 = vadd.f32 %v6856_v46, %v6814_v42  ;;  %v2615_v46 = vadd.f32 %v6892_v27, %v6814_v42  ;;  %v2708_v27 = vadd.f32 %v6866_v7, %v6818_v14 }
 0x7e6   : > { %8071 = vst [vmem:[#allocation32_spill] sm:$0xff] %v6917_v4  ;;  %3257 = vrot.lane.b32.xlu0 %v2776_v12, %s5414_s11  ;;  %v2744_v4 = vadd.f32 %v2743_v47, %v6818_v14  ;;  %v2643_v36 = vadd.f32 %v2642_v29, %v6824_v44  ;;  %v6938_v19 = vpack.c.bf16 %v2587_v21, %v2583_v24 }
 0x7e7   : > { %v6922_v23 = vpop.f32.mrf.mxu1  ;;  %v2757_v6 = vpop.f32.mrf.mxu0  ;;  %v2627_v47 = vadd.f32 %v2626_v60, %v6824_v44  ;;  %v2623_v21 = vadd.f32 %v2622_v53, %v6824_v44  ;;  %v2728_v60 = vadd.f32 %v2727_v15, %v6818_v14  ;;  %v2724_v53 = vadd.f32 %v6886_v13, %v6818_v14 }
 0x7e8   : > { %v2758_v38 = vadd.f32 %v2757_v6, %v6818_v14  ;;  %v6941_v54 = vpack.c.bf16 %v2748_v43, %v2744_v4  ;;  %v2595_v43 = vadd.f32 %v6864_v48, %v6814_v42  ;;  %v2783_v4 = vpack.c.bf16 %v2738_v56, %v2734_v8 }
 0x7e9   : > { %v2646_v30 = vpop.f32.mrf.mxu1  ;;  %v2613_v48 = vadd.f32 %v6888_v3, %v6824_v44  ;;  %v6975_v39 = vpack.c.bf16 %v2728_v60, %v2724_v53  ;;  %v2597_v13 = vadd.f32 %v6868_v1, %v6824_v44  ;;  %v2714_v3 = vadd.f32 %v6874_v45, %v6818_v14 }
 0x7ea   : > { %v6933_v58 = vpack.c.bf16 %v2758_v38, %v2754_v40  ;;  %v2647_v34 = vadd.f32 %v2646_v30, %v6824_v44  ;;  %3251 = vrot.lane.b32.xlu0 %v6924_v26, %s5414_s11  ;;  %v6969_v15 = vpack.c.bf16 %v2595_v43, %v2591_v5  ;;  %v2611_v6 = vadd.f32 %v6884_v16, %v6814_v42 }
 0x7eb   : > { %v2830_v1 = vsel %vm2786_vm3, %v2776_v12, 0  ;;  %v2635_v16 = vadd.f32 %v6908_v50, %v6814_v42  ;;  %v2625_v24 = vadd.f32 %v6900_v32, %v6814_v42  ;;  %v2645_v56 = vadd.f32 %v6922_v23, %v6814_v42 }
 0x7ec   : > { %v2777_v52 = vpack.c.bf16 %v2647_v34, %v2643_v36  ;;  %4680 = vmatprep.subr.bf16.mxu0 %v6933_v58  ;;  %v2617_v34 = vadd.f32 %v2616_v37, %v6824_v44  ;;  %v2775_v36 = vpack.c.bf16 %v2627_v47, %v2623_v21  ;;  %v2718_v37 = vadd.f32 %v6880_v51, %v6818_v14 }
 0x7ed   : > { %4681 = vmatpush3.bf16.msra.mxu0 %v6933_v58  ;;  %v2593_v51 = vadd.f32 %v6860_v57, %v6824_v44  ;;  %v2766_v45 = vpack.c.bf16 %v2615_v46, %v2611_v6  ;;  %v2704_v44 = vadd.f32 %v6858_v10, %v6818_v14  ;;  %v2601_v14 = vadd.f32 %v6872_v2, %v6814_v42 }
 0x7ee   : > { %3247 = vrot.lane.b32.xlu0 %v6938_v19, %s5414_s11  ;;  %4682 = vmatprep.subr.bf16.mxu0 %v6941_v54  ;;  %v2833_v29 = vsel %vm2786_vm3, %v2777_v52, 0  ;;  %v2781_v40 = vpack.c.bf16 %v2718_v37, %v2714_v3  ;;  %v2827_v50 = vsel %vm2786_vm3, %v2775_v36, 0  ;;  %v2641_v32 = vadd.f32 %v6914_v22, %v6814_v42 }
 0x7ef   : > { %3259 = vrot.lane.b32.xlu1 %v2777_v52, %s5414_s11  ;;  %4792 = vmatprep.subr.msk.bf16.mxu1 %vm2786_vm3, %v2777_v52  ;;  %v2772_v38 = vpack.c.bf16 %v2597_v13, %v2593_v51  ;;  %v2780_v57 = vpack.c.bf16 %v2708_v27, %v2704_v44  ;;  %v2821_v52 = vsel %vm2786_vm3, %v6924_v26, 0  ;;  %v2812_v22 = vsel %vm2786_vm3, %v6838_v62, 0  ;;  %v8072_v27 = vld [vmem:[#allocation33_spill] sm:$0xff]  ;;  %v8073_v44 = vld [vmem:[#allocation34_spill] sm:$0xff] }
 0x7f0   : > { %4649 = vmatpush3.bf16.xpose.msra.mxu1 %v2833_v29 }
 0x7f1   : > { %4793 = vmatprep.subr.msk.bf16.mxu1 %vm2786_vm3, %v2776_v12  ;;  %4683 = vmatpush3.bf16.msra.mxu0 %v6941_v54  ;;  %v2631_v12 = vadd.f32 %v6904_v63, %v6814_v42  ;;  %v2605_v63 = vadd.f32 %v6878_v9, %v6814_v42  ;;  %v2621_v9 = vadd.f32 %v6896_v35, %v6814_v42  ;;  %v2818_v23 = vsel %vm2786_vm3, %v2772_v38, 0 }
 0x7f2   : > { %3221 = vrot.lane.b32.xlu0 %v6833_v55, %s5414_s11  ;;  %4684 = vmatprep.subr.bf16.mxu0 %v2783_v4  ;;  %v2774_v55 = vpack.c.bf16 %v2617_v34, %v2613_v48  ;;  %v2769_v35 = vpack.c.bf16 %v2645_v56, %v2641_v32  ;;  %v2815_v42 = vsel %vm2786_vm3, %v6938_v19, 0  ;;  %v8076_v56 = vld [vmem:[#allocation37_spill] sm:$0xff] }
 0x7f3   : > { %3255 = vrot.lane.b32.xlu1 %v2775_v36, %s5414_s11  ;;  %v2768_v7 = vpack.c.bf16 %v2635_v16, %v2631_v12  ;;  %v2765_v10 = vpack.c.bf16 %v2605_v63, %v2601_v14  ;;  %v2767_v30 = vpack.c.bf16 %v2625_v24, %v2621_v9  ;;  %v8074_v63 = vld [vmem:[#allocation35_spill] sm:$0xff]  ;;  %v8075_v9 = vld [vmem:[#allocation36_spill] sm:$0xff] }
 0x7f4   : > { %v2824_v2 = vsel %vm2786_vm3, %v2774_v55, 0 }
 0x7f5   : > { %4685 = vmatpush3.bf16.msra.mxu0 %v2783_v4 }
 0x7f6   : > { %3225 = vrot.lane.b32.xlu0 %v6969_v15, %s5414_s11  ;;  %4686 = vmatprep.subr.bf16.mxu0 %v6975_v39 }
 0x7f7   : > { %3253 = vrot.lane.b32.xlu1 %v2774_v55, %s5414_s11 }
 0x7f8   : > { %4651 = vmatpush3.bf16.xpose.msra.mxu1 %v2830_v1 }
 0x7f9   : > { %4794 = vmatprep.subr.msk.bf16.mxu1 %vm2786_vm3, %v2775_v36  ;;  %4687 = vmatpush3.bf16.msra.mxu0 %v6975_v39 }
 0x7fa   : > { %3229 = vrot.lane.b32.xlu0 %v2766_v45, %s5414_s11  ;;  %4688 = vmatprep.subr.bf16.mxu0 %v2781_v40 }
 0x7fb   : > { %3249 = vrot.lane.b32.xlu1 %v2772_v38, %s5414_s11 }
 0x7fd   : > { %4689 = vmatpush3.bf16.msra.mxu0 %v2781_v40 }
 0x7fe   : > { %3233 = vrot.lane.b32.xlu0 %v2768_v7, %s5414_s11  ;;  %4690 = vmatprep.subr.bf16.mxu0 %v2780_v57 }
 0x7ff   : > { %3245 = vrot.lane.b32.xlu1 %v6838_v62, %s5414_s11 }
 0x800   : > { %4653 = vmatpush3.bf16.xpose.msra.mxu1 %v2827_v50 }
 0x801   : > { %4795 = vmatprep.subr.msk.bf16.mxu1 %vm2786_vm3, %v2774_v55  ;;  %4691 = vmatpush3.bf16.msra.mxu0 %v2780_v57 }
 0x802   : > { %3608 = vrot.lane.b32.xlu0 %v2783_v4, %s5414_s11  ;;  %4692 = vmatprep.subr.bf16.mxu0 %v6852_v18 }
 0x803   : > { %3223 = vrot.lane.b32.xlu1 %v6850_v28, %s5414_s11 }
 0x805   : > { %4693 = vmatpush3.bf16.msra.mxu0 %v6852_v18 }
 0x806   : > { %3604 = vrot.lane.b32.xlu0 %v2781_v40, %s5414_s11  ;;  %4694 = vmatprep.subr.bf16.mxu0 %v6835_v0 }
 0x807   : > { %3227 = vrot.lane.b32.xlu1 %v2765_v10, %s5414_s11 }
 0x808   : > { %4655 = vmatpush3.bf16.xpose.msra.mxu1 %v2824_v2 }
 0x809   : > { %4796 = vmatprep.subr.msk.bf16.mxu1 %vm2786_vm3, %v6924_v26  ;;  %4695 = vmatpush3.bf16.msra.mxu0 %v6835_v0 }
 0x80a   : > { %3602 = vrot.lane.b32.xlu0 %v2780_v57, %s5414_s11 }
 0x80b   : > { %3231 = vrot.lane.b32.xlu1 %v2767_v30, %s5414_s11 }
 0x80f   : > { %3235 = vrot.lane.b32.xlu1 %v2769_v35, %s5414_s11 }
 0x810   : > { %4657 = vmatpush3.bf16.xpose.msra.mxu1 %v2821_v52 }
 0x811   : > { %4797 = vmatprep.subr.msk.bf16.mxu1 %vm2786_vm3, %v2772_v38 }
 0x813   : > { %3612 = vrot.lane.b32.xlu1 %v6933_v58, %s5414_s11 }
 0x817   : > { %3610 = vrot.lane.b32.xlu1 %v6941_v54, %s5414_s11 }
 0x818   : > { %4659 = vmatpush3.bf16.xpose.msra.mxu1 %v2818_v23 }
 0x819   : > { %4798 = vmatprep.subr.msk.bf16.mxu1 %vm2786_vm3, %v6938_v19 }
 0x81b   : > { %3606 = vrot.lane.b32.xlu1 %v6975_v39, %s5414_s11 }
 0x820   : > { %4661 = vmatpush3.bf16.xpose.msra.mxu1 %v2815_v42  ;;  %v8077_v42 = vld [vmem:[#allocation38_spill] sm:$0xff] }
 0x821   : > { %4799 = vmatprep.subr.msk.bf16.mxu1 %vm2786_vm3, %v6838_v62 }
 0x828   : > { %4663 = vmatpush3.bf16.xpose.msra.mxu1 %v2812_v22 }
 0x82f   : > { %4665 = vmatmul.mubr.msk.bf16.vlgmr.msra.gmra.mxu1 %vm2786_vm3, %v6850_v28 }
 0x830   : > { %4668 = vmatprep.mubr.msk.bf16.mxu1 %vm2786_vm3, %v6969_v15 }
 0x837   : > { %4669 = vmatmul.mubr.msk.bf16.gmra.mxu1 %vm2786_vm3, %v2765_v10 }
 0x838   : > { %4672 = vmatprep.mubr.msk.bf16.mxu1 %vm2786_vm3, %v2766_v45 }
 0x83f   : > { %4673 = vmatmul.mubr.msk.bf16.gmra.mxu1 %vm2786_vm3, %v2767_v30 }
 0x840   : > { %4676 = vmatprep.mubr.msk.bf16.mxu1 %vm2786_vm3, %v2768_v7 }
 0x847   : > { %4677 = vmatmul.mubr.msk.bf16.gmra.mxu1 %vm2786_vm3, %v2769_v35 }
 0x858   : > { %v3258_v26 = vpop.permute.xlu0 %3257 }
 0x859   : > { %v3304_v29 = vsel %vm2786_vm3, %v3258_v26, 0 }
 0x85c   : > { %v3252_v58 = vpop.permute.xlu0 %3251 }
 0x85d   : > { %v3295_v48 = vsel %vm2786_vm3, %v3252_v58, 0 }
 0x860   : > { %v3248_v62 = vpop.permute.xlu0 %3247 }
 0x861   : > { %v3260_v19 = vpop.permute.xlu1 %3259  ;;  %v3289_v46 = vsel %vm2786_vm3, %v3248_v62, 0 }
 0x862   : > { %4800 = vmatprep.subr.msk.bf16.mxu1 %vm2786_vm3, %v3260_v19  ;;  %v3307_v28 = vsel %vm2786_vm3, %v3260_v19, 0 }
 0x863   : > { %4713 = vmatpush3.bf16.xpose.msra.mxu1 %v3307_v28 }
 0x864   : > { %4801 = vmatprep.subr.msk.bf16.mxu1 %vm2786_vm3, %v3258_v26  ;;  %v3222_v54 = vpop.permute.xlu0 %3221 }
 0x865   : > { %v3256_v47 = vpop.permute.xlu1 %3255  ;;  %4728 = vmatprep.mubr.msk.bf16.mxu1 %vm2786_vm3, %v3222_v54 }
 0x866   : > { %v3301_v60 = vsel %vm2786_vm3, %v3256_v47, 0 }
 0x868   : > { %v3226_v13 = vpop.permute.xlu0 %3225 }
 0x869   : > { %v3254_v8 = vpop.permute.xlu1 %3253 }
 0x86a   : > { %v3298_v36 = vsel %vm2786_vm3, %v3254_v8, 0 }
 0x86b   : > { %4715 = vmatpush3.bf16.xpose.msra.mxu1 %v3304_v29 }
 0x86c   : > { %4802 = vmatprep.subr.msk.bf16.mxu1 %vm2786_vm3, %v3256_v47  ;;  %v3230_v55 = vpop.permute.xlu0 %3229  ;;  %v8079_v47 = vld [vmem:[#allocation41_spill] sm:$0xff] }
 0x86d   : > { %v3250_v21 = vpop.permute.xlu1 %3249 }
 0x86e   : > { %v3292_v37 = vsel %vm2786_vm3, %v3250_v21, 0 }
 0x870   : > { %v3234_v3 = vpop.permute.xlu0 %3233 }
 0x871   : > { %v3246_v43 = vpop.permute.xlu1 %3245 }
 0x872   : > { %v3286_v39 = vsel %vm2786_vm3, %v3246_v43, 0 }
 0x873   : > { %4717 = vmatpush3.bf16.xpose.msra.mxu1 %v3301_v60 }
 0x874   : > { %4803 = vmatprep.subr.msk.bf16.mxu1 %vm2786_vm3, %v3254_v8 }
 0x875   : > { %v3224_v4 = vpop.permute.xlu1 %3223 }
 0x879   : > { %v3228_v34 = vpop.permute.xlu1 %3227 }
 0x87b   : > { %4719 = vmatpush3.bf16.xpose.msra.mxu1 %v3298_v36  ;;  %v8081_v36 = vld [vmem:[#allocation43_spill] sm:$0xff] }
 0x87c   : > { %4804 = vmatprep.subr.msk.bf16.mxu1 %vm2786_vm3, %v3252_v58 }
 0x87d   : > { %v3232_v5 = vpop.permute.xlu1 %3231 }
 0x881   : > { %v3236_v53 = vpop.permute.xlu1 %3235 }
 0x883   : > { %4721 = vmatpush3.bf16.xpose.msra.mxu1 %v3295_v48 }
 0x884   : > { %4805 = vmatprep.subr.msk.bf16.mxu1 %vm2786_vm3, %v3250_v21  ;;  %v8080_v21 = vld [vmem:[#allocation42_spill] sm:$0xff] }
 0x885   : > { %v7073_v15 = vpop.permute.xlu1 %3612 }
 0x886   : > { %4744 = vmatprep.subr.bf16.mxu0 %v7073_v15 }
 0x88b   : > { %4723 = vmatpush3.bf16.xpose.msra.mxu1 %v3292_v37  ;;  %v8082_v37 = vld [vmem:[#allocation44_spill] sm:$0xff] }
 0x88c   : > { %4806 = vmatprep.subr.msk.bf16.mxu1 %vm2786_vm3, %v3248_v62  ;;  %v8078_v62 = vld [vmem:[#allocation39_spill] sm:$0xff] }
 0x893   : > { %4725 = vmatpush3.bf16.xpose.msra.mxu1 %v3289_v46 }
 0x894   : > { %4807 = vmatprep.subr.msk.bf16.mxu1 %vm2786_vm3, %v3246_v43 }
 0x89b   : > { %4727 = vmatpush3.bf16.xpose.msra.mxu1 %v3286_v39 }
 0x8a2   : > { %4729 = vmatmul.mubr.msk.bf16.vlgmr.msra.gmra.mxu1 %vm2786_vm3, %v3224_v4 }
 0x8a3   : > { %4732 = vmatprep.mubr.msk.bf16.mxu1 %vm2786_vm3, %v3226_v13 }
 0x8aa   : > { %4733 = vmatmul.mubr.msk.bf16.gmra.mxu1 %vm2786_vm3, %v3228_v34 }
 0x8ab   : > { %4736 = vmatprep.mubr.msk.bf16.mxu1 %vm2786_vm3, %v3230_v55  ;;  %v8083_v55 = vld [vmem:[#allocation45_spill] sm:$0xff] }
 0x8b2   : > { %4737 = vmatmul.mubr.msk.bf16.gmra.mxu1 %vm2786_vm3, %v3232_v5 }
 0x8b3   : > { %4740 = vmatprep.mubr.msk.bf16.mxu1 %vm2786_vm3, %v3234_v3 }
 0x8ba   : > { %4741 = vmatmul.mubr.msk.bf16.gmra.mxu1 %vm2786_vm3, %v3236_v53 }
 0x8ef   : > { %v4666_v6 = vpop.f32.mrf.mxu1 }
 0x8f0   : > { %v2934_v51 = vmul.f32 0.25, %v4666_v6 }
 0x8f1   : > { %v2869_v1 = vpop.f32.mrf.mxu1 }
 0x8f2   : > { %v7089_v40 = vadd.f32 %v2934_v51, %v8072_v27  ;;  %v2932_v45 = vmul.f32 0.25, %v2869_v1  ;;  %v8084_v51 = vld [vmem:[#allocation46_spill] sm:$0xff] }
 0x8f3   : > { %v4667_v16 = vpop.f32.mrf.mxu1 }
 0x8f4   : > { %2968 = vmax.xlane.f32.xlu0 %v7089_v40  ;;  %v7093_v12 = vadd.f32 %v2932_v45, %v8073_v44  ;;  %v2935_v57 = vmul.f32 0.25, %v4667_v16 }
 0x8f5   : > { %v2872_v38 = vpop.f32.mrf.mxu1 }
 0x8f6   : > { %v2933_v7 = vmul.f32 0.25, %v2872_v38  ;;  %v7100_v2 = vadd.f32 %v2935_v57, %v8075_v9  ;;  %v8085_v57 = vld [vmem:[#allocation47_spill] sm:$0xff] }
 0x8f7   : > { %v4670_v50 = vpop.f32.mrf.mxu1 }
 0x8f8   : > { %v7096_v14 = vadd.f32 %v2933_v7, %v8074_v63  ;;  %v2938_v10 = vmul.f32 0.25, %v4670_v50  ;;  %2964 = vmax.xlane.f32.xlu0 %v7093_v12 }
 0x8f9   : > { %v2885_v24 = vpop.f32.mrf.mxu1 }
 0x8fa   : > { %2966 = vmax.xlane.f32.xlu1 %v7096_v14  ;;  %v7104_v32 = vadd.f32 %v2938_v10, %v8076_v56  ;;  %v2936_v35 = vmul.f32 0.25, %v2885_v24  ;;  %v8086_v10 = vld [vmem:[#allocation48_spill] sm:$0xff] }
 0x8fb   : > { %v4671_v30 = vpop.f32.mrf.mxu1 }
 0x8fc   : > { %v2939_v52 = vmul.f32 0.25, %v4671_v30  ;;  %2970 = vmax.xlane.f32.xlu0 %v7100_v2  ;;  %v7112_v19 = vadd.f32 %v2936_v35, %v8078_v62  ;;  %v8087_v30 = vld [vmem:[#allocation49_spill] sm:$0xff] }
 0x8fd   : > { %v2888_v23 = vpop.f32.mrf.mxu1 }
 0x8fe   : > { %v7108_v22 = vadd.f32 %v2939_v52, %v8077_v42  ;;  %v2937_v26 = vmul.f32 0.25, %v2888_v23  ;;  %2976 = vmax.xlane.f32.xlu1 %v7104_v32 }
 0x8ff   : > { %v4674_v58 = vpop.f32.mrf.mxu1 }
 0x900   : > { %v2942_v28 = vmul.f32 0.25, %v4674_v58  ;;  %2978 = vmax.xlane.f32.xlu0 %v7108_v22  ;;  %v7116_v8 = vadd.f32 %v2937_v26, %v8079_v47 }
 0x901   : > { %v2901_v54 = vpop.f32.mrf.mxu1 }
 0x902   : > { %2972 = vmax.xlane.f32.xlu1 %v7112_v19  ;;  %v7120_v43 = vadd.f32 %v2942_v28, %v8080_v21  ;;  %v2940_v60 = vmul.f32 0.25, %v2901_v54 }
 0x903   : > { %v4675_v29 = vpop.f32.mrf.mxu1 }
 0x904   : > { %v2943_v4 = vmul.f32 0.25, %v4675_v29  ;;  %2974 = vmax.xlane.f32.xlu0 %v7116_v8  ;;  %v7128_v46 = vadd.f32 %v2940_v60, %v8082_v37 }
 0x905   : > { %v2904_v34 = vpop.f32.mrf.mxu1 }
 0x906   : > { %v7124_v5 = vadd.f32 %v2943_v4, %v8081_v36  ;;  %v2941_v53 = vmul.f32 0.25, %v2904_v34  ;;  %2984 = vmax.xlane.f32.xlu1 %v7120_v43 }
 0x907   : > { %v4678_v48 = vpop.f32.mrf.mxu1 }
 0x908   : > { %v2946_v39 = vmul.f32 0.25, %v4678_v48  ;;  %2986 = vmax.xlane.f32.xlu0 %v7124_v5  ;;  %v7132_v3 = vadd.f32 %v2941_v53, %v8083_v55 }
 0x909   : > { %v2917_v13 = vpop.f32.mrf.mxu1 }
 0x90a   : > { %2980 = vmax.xlane.f32.xlu1 %v7128_v46  ;;  %v7136_v1 = vadd.f32 %v2946_v39, %v8084_v51  ;;  %v2944_v45 = vmul.f32 0.25, %v2917_v13  ;;  %v7164_v13 = vpop.permute.xlu0 %3608 }
 0x90b   : > { %v4679_v6 = vpop.f32.mrf.mxu1 }
 0x90c   : > { %v2947_v16 = vmul.f32 0.25, %v4679_v6  ;;  %2982 = vmax.xlane.f32.xlu0 %v7132_v3  ;;  %v7144_v24 = vadd.f32 %v2944_v45, %v8086_v10 }
 0x90d   : > { %v2920_v38 = vpop.f32.mrf.mxu1 }
 0x90e   : > { %v7140_v7 = vadd.f32 %v2947_v16, %v8085_v57  ;;  %v2945_v50 = vmul.f32 0.25, %v2920_v38  ;;  %2992 = vmax.xlane.f32.xlu1 %v7136_v1 }
 0x910   : > { %2994 = vmax.xlane.f32.xlu0 %v7140_v7  ;;  %v7148_v35 = vadd.f32 %v2945_v50, %v8087_v30 }
 0x912   : > { %2988 = vmax.xlane.f32.xlu1 %v7144_v24 }
 0x914   : > { %2990 = vmax.xlane.f32.xlu0 %v7148_v35 }
 0x962   : > { %v4730_v52 = vpop.f32.mrf.mxu1 }
 0x963   : > { %v3408_v23 = vmul.f32 0.25, %v4730_v52 }
 0x964   : > { %v3343_v26 = vpop.f32.mrf.mxu1 }
 0x965   : > { %v7153_v58 = vadd.f32 %v3408_v23, %v8072_v27  ;;  %v3406_v28 = vmul.f32 0.25, %v3343_v26  ;;  %v7180_v26 = vpop.permute.xlu0 %3604 }
 0x966   : > { %v4731_v54 = vpop.f32.mrf.mxu1 }
 0x967   : > { %v3409_v29 = vmul.f32 0.25, %v4731_v54  ;;  %3442 = vmax.xlane.f32.xlu1 %v7153_v58  ;;  %v7157_v4 = vadd.f32 %v3406_v28, %v8073_v44 }
 0x968   : > { %v3346_v60 = vpop.f32.mrf.mxu1 }
 0x969   : > { %v7160_v34 = vadd.f32 %v3409_v29, %v8075_v9  ;;  %v3407_v53 = vmul.f32 0.25, %v3346_v60 }
 0x96a   : > { %v4734_v48 = vpop.f32.mrf.mxu1 }
 0x96b   : > { %v3412_v39 = vmul.f32 0.25, %v4734_v48  ;;  %3438 = vmax.xlane.f32.xlu1 %v7157_v4  ;;  %3444 = vmax.xlane.f32.xlu0 %v7160_v34  ;;  %v7167_v6 = vadd.f32 %v3407_v53, %v8074_v63  ;;  %v7192_v48 = vpop.permute.xlu0 %3602 }
 0x96c   : > { %v3359_v27 = vpop.f32.mrf.mxu1 }
 0x96d   : > { %v7170_v45 = vadd.f32 %v3412_v39, %v8076_v56  ;;  %v3410_v44 = vmul.f32 0.25, %v3359_v27  ;;  %v7194_v39 = vpop.permute.xlu1 %3610 }
 0x96e   : > { %v4735_v16 = vpop.f32.mrf.mxu1 }
 0x96f   : > { %v3413_v9 = vmul.f32 0.25, %v4735_v16  ;;  %3440 = vmax.xlane.f32.xlu0 %v7167_v6  ;;  %3450 = vmax.xlane.f32.xlu1 %v7170_v45  ;;  %v7175_v50 = vadd.f32 %v3410_v44, %v8078_v62 }
 0x970   : > { %v3362_v38 = vpop.f32.mrf.mxu1 }
 0x971   : > { %v7178_v52 = vadd.f32 %v3413_v9, %v8077_v42  ;;  %v3411_v23 = vmul.f32 0.25, %v3362_v38 }
 0x972   : > { %v4738_v63 = vpop.f32.mrf.mxu1 }
 0x973   : > { %v3416_v56 = vmul.f32 0.25, %v4738_v63  ;;  %3446 = vmax.xlane.f32.xlu1 %v7175_v50  ;;  %3452 = vmax.xlane.f32.xlu0 %v7178_v52  ;;  %v7185_v54 = vadd.f32 %v3411_v23, %v8079_v47 }
 0x974   : > { %v3375_v28 = vpop.f32.mrf.mxu1 }
 0x975   : > { %v7188_v29 = vadd.f32 %v3416_v56, %v8080_v21  ;;  %v3414_v62 = vmul.f32 0.25, %v3375_v28  ;;  %v7211_v28 = vpop.permute.xlu1 %3606 }
 0x976   : > { %v4739_v60 = vpop.f32.mrf.mxu1 }
 0x977   : > { %v3417_v42 = vmul.f32 0.25, %v4739_v60  ;;  %3448 = vmax.xlane.f32.xlu0 %v7185_v54  ;;  %3458 = vmax.xlane.f32.xlu1 %v7188_v29  ;;  %v7197_v27 = vadd.f32 %v3414_v62, %v8082_v37 }
 0x978   : > { %v3378_v53 = vpop.f32.mrf.mxu1 }
 0x979   : > { %v7200_v47 = vadd.f32 %v3417_v42, %v8081_v36  ;;  %v3415_v21 = vmul.f32 0.25, %v3378_v53 }
 0x97a   : > { %v4742_v44 = vpop.f32.mrf.mxu1 }
 0x97b   : > { %v3420_v16 = vmul.f32 0.25, %v4742_v44  ;;  %3454 = vmax.xlane.f32.xlu1 %v7197_v27  ;;  %3460 = vmax.xlane.f32.xlu0 %v7200_v47  ;;  %v7205_v38 = vadd.f32 %v3415_v21, %v8083_v55 }
 0x97c   : > { %v3391_v9 = vpop.f32.mrf.mxu1 }
 0x97d   : > { %v7208_v23 = vadd.f32 %v3420_v16, %v8084_v51  ;;  %v3418_v63 = vmul.f32 0.25, %v3391_v9  ;;  %v2969_v37 = vpop.xlane.xlu0 %2968 }
 0x97e   : > { %v2998_v56 = vsub.f32 %v7089_v40, %v2969_v37  ;;  %v4743_v36 = vpop.f32.mrf.mxu1 }
 0x97f   : > { %v3421_v62 = vmul.f32 0.25, %v4743_v36  ;;  %3456 = vmax.xlane.f32.xlu0 %v7205_v38  ;;  %3466 = vmax.xlane.f32.xlu1 %v7208_v23  ;;  %v7216_v55 = vadd.f32 %v3418_v63, %v8086_v10 }
 0x980   : > { %v3016_v60 = vmul.f32 1.442695, %v2998_v56  ;;  %v3394_v42 = vpop.f32.mrf.mxu1 }
 0x981   : > { %v7219_v51 = vadd.f32 %v3421_v62, %v8085_v57  ;;  %v3419_v53 = vmul.f32 0.25, %v3394_v42  ;;  %v2965_v21 = vpop.xlane.xlu0 %2964 }
 0x982   : > { %5106 = vpow2.f32 %v3016_v60  ;;  %v2996_v40 = vsub.f32 %v7093_v12, %v2965_v21 }
 0x983   : > { %v2967_v44 = vpop.xlane.xlu1 %2966  ;;  %3462 = vmax.xlane.f32.xlu1 %v7216_v55  ;;  %3468 = vmax.xlane.f32.xlu0 %v7219_v51  ;;  %v7225_v9 = vadd.f32 %v3419_v53, %v8087_v30 }
 0x984   : > { %v3012_v16 = vmul.f32 1.442695, %v2996_v40  ;;  %v2997_v10 = vsub.f32 %v7096_v14, %v2967_v44 }
 0x985   : > { %v2971_v37 = vpop.xlane.xlu0 %2970 }
 0x986   : > { %5108 = vpow2.f32 %v3012_v16  ;;  %v2999_v57 = vsub.f32 %v7100_v2, %v2971_v37  ;;  %v3014_v62 = vmul.f32 1.442695, %v2997_v10 }
 0x987   : > { %v2977_v63 = vpop.xlane.xlu1 %2976  ;;  %3464 = vmax.xlane.f32.xlu0 %v7225_v9 }
 0x988   : > { %v3018_v56 = vmul.f32 1.442695, %v2999_v57  ;;  %v3002_v12 = vsub.f32 %v7104_v32, %v2977_v63 }
 0x989   : > { %v2979_v36 = vpop.xlane.xlu0 %2978 }
 0x98a   : > { %5110 = vpow2.f32 %v3018_v56  ;;  %v3024_v60 = vmul.f32 1.442695, %v3002_v12  ;;  %v3003_v42 = vsub.f32 %v7108_v22, %v2979_v36 }
 0x98b   : > { %v2973_v30 = vpop.xlane.xlu1 %2972 }
 0x98c   : > { %5112 = vpow2.f32 %v3024_v60  ;;  %v3000_v53 = vsub.f32 %v7112_v19, %v2973_v30  ;;  %v3026_v14 = vmul.f32 1.442695, %v3003_v42 }
 0x98d   : > { %v2975_v21 = vpop.xlane.xlu0 %2974  ;;  %5114 = vpow2.f32 %v3014_v62 }
 0x98e   : > { %v3020_v2 = vmul.f32 1.442695, %v3000_v53  ;;  %v3001_v40 = vsub.f32 %v7116_v8, %v2975_v21 }
 0x98f   : > { %v7234_v44 = vpop.eup %5106  ;;  %v2985_v16 = vpop.xlane.xlu1 %2984 }
 0x990   : > { %5116 = vpow2.f32 %v3020_v2  ;;  %v3006_v32 = vsub.f32 %v7120_v43, %v2985_v16  ;;  %3048 = vadd.xlane.f32.xlu1 %v7234_v44  ;;  %v3022_v22 = vmul.f32 1.442695, %v3001_v40 }
 0x991   : > { %v2987_v37 = vpop.xlane.xlu0 %2986  ;;  %5118 = vpow2.f32 %v3026_v14 }
 0x992   : > { %v3032_v10 = vmul.f32 1.442695, %v3006_v32  ;;  %v3007_v19 = vsub.f32 %v7124_v5, %v2987_v37 }
 0x993   : > { %v7239_v57 = vpop.eup %5108  ;;  %v2981_v63 = vpop.xlane.xlu1 %2980 }
 0x994   : > { %5120 = vpow2.f32 %v3032_v10  ;;  %v3004_v8 = vsub.f32 %v7128_v46, %v2981_v63  ;;  %3044 = vadd.xlane.f32.xlu1 %v7239_v57  ;;  %v3034_v12 = vmul.f32 1.442695, %v3007_v19 }
 0x995   : > { %v2983_v56 = vpop.xlane.xlu0 %2982  ;;  %5122 = vpow2.f32 %v3022_v22 }
 0x996   : > { %v3028_v43 = vmul.f32 1.442695, %v3004_v8  ;;  %v3005_v36 = vsub.f32 %v7132_v3, %v2983_v56 }
 0x997   : > { %v7244_v62 = vpop.eup %5110  ;;  %v2993_v60 = vpop.xlane.xlu1 %2992 }
 0x998   : > { %5124 = vpow2.f32 %v3028_v43  ;;  %v3010_v5 = vsub.f32 %v7136_v1, %v2993_v60  ;;  %3050 = vadd.xlane.f32.xlu0 %v7244_v62  ;;  %v3030_v46 = vmul.f32 1.442695, %v3005_v36 }
 0x999   : > { %v7248_v42 = vpop.eup %5112  ;;  %v2995_v30 = vpop.xlane.xlu0 %2994  ;;  %5126 = vpow2.f32 %v3034_v12 }
 0x99a   : > { %v3040_v53 = vmul.f32 1.442695, %v3010_v5  ;;  %v3011_v21 = vsub.f32 %v7140_v7, %v2995_v30  ;;  %3056 = vadd.xlane.f32.xlu1 %v7248_v42  ;;  %v7252_v14 = vpop.eup %5114 }
 0x99b   : > { %v2989_v3 = vpop.xlane.xlu1 %2988 }
 0x99c   : > { %5128 = vpow2.f32 %v3040_v53  ;;  %v3008_v2 = vsub.f32 %v7144_v24, %v2989_v3  ;;  %3046 = vadd.xlane.f32.xlu0 %v7252_v14  ;;  %v3042_v16 = vmul.f32 1.442695, %v3011_v21 }
 0x99d   : > { %v7256_v1 = vpop.eup %5116  ;;  %v2991_v40 = vpop.xlane.xlu0 %2990  ;;  %5130 = vpow2.f32 %v3030_v46 }
 0x99e   : > { %v3036_v32 = vmul.f32 1.442695, %v3008_v2  ;;  %v3009_v37 = vsub.f32 %v7148_v35, %v2991_v40  ;;  %3052 = vadd.xlane.f32.xlu1 %v7256_v1  ;;  %v7260_v7 = vpop.eup %5118 }
 0x9a0   : > { %5132 = vpow2.f32 %v3036_v32  ;;  %3058 = vadd.xlane.f32.xlu0 %v7260_v7  ;;  %v3038_v24 = vmul.f32 1.442695, %v3009_v37 }
 0x9a1   : > { %v7263_v22 = vpop.eup %5120  ;;  %5134 = vpow2.f32 %v3042_v16 }
 0x9a2   : > { %3064 = vadd.xlane.f32.xlu1 %v7263_v22  ;;  %v7266_v10 = vpop.eup %5122  ;;  %5136 = vpow2.f32 %v3038_v24 }
 0x9a4   : > { %3054 = vadd.xlane.f32.xlu0 %v7266_v10 }
 0x9a5   : > { %v7269_v19 = vpop.eup %5124 }
 0x9a6   : > { %3060 = vadd.xlane.f32.xlu1 %v7269_v19  ;;  %v7272_v35 = vpop.eup %5126 }
 0x9a8   : > { %3066 = vadd.xlane.f32.xlu0 %v7272_v35 }
 0x9a9   : > { %v7275_v63 = vpop.eup %5128 }
 0x9aa   : > { %3072 = vadd.xlane.f32.xlu1 %v7275_v63  ;;  %v7278_v8 = vpop.eup %5130 }
 0x9ac   : > { %3062 = vadd.xlane.f32.xlu0 %v7278_v8 }
 0x9ad   : > { %v7281_v56 = vpop.eup %5132 }
 0x9ae   : > { %3068 = vadd.xlane.f32.xlu1 %v7281_v56  ;;  %v7284_v12 = vpop.eup %5134 }
 0x9af   : > { %v7287_v43 = vpop.eup %5136 }
 0x9b0   : > { %3074 = vadd.xlane.f32.xlu0 %v7284_v12 }
 0x9b4   : > { %3070 = vadd.xlane.f32.xlu0 %v7287_v43 }
 0x9bf   : > { %3600 = vrot.lane.b32.xlu1 %v6852_v18, %s5414_s11 }
 0x9f0   : > { %v3443_v36 = vpop.xlane.xlu1 %3442 }
 0x9f1   : > { %v3472_v60 = vsub.f32 %v7153_v58, %v3443_v36 }
 0x9f3   : > { %v3490_v5 = vmul.f32 1.442695, %v3472_v60 }
 0x9f4   : > { %v3439_v30 = vpop.xlane.xlu1 %3438  ;;  %v3445_v46 = vpop.xlane.xlu0 %3444 }
 0x9f5   : > { %5138 = vpow2.f32 %v3490_v5  ;;  %v3470_v53 = vsub.f32 %v7157_v4, %v3439_v30  ;;  %v3473_v21 = vsub.f32 %v7160_v34, %v3445_v46 }
 0x9f7   : > { %v3486_v3 = vmul.f32 1.442695, %v3470_v53  ;;  %v3492_v2 = vmul.f32 1.442695, %v3473_v21 }
 0x9f8   : > { %v3451_v40 = vpop.xlane.xlu1 %3450  ;;  %v3441_v16 = vpop.xlane.xlu0 %3440 }
 0x9f9   : > { %5140 = vpow2.f32 %v3486_v3  ;;  %v3476_v32 = vsub.f32 %v7170_v45, %v3451_v40  ;;  %v3471_v18 = vsub.f32 %v7167_v6, %v3441_v16 }
 0x9fa   : > { %5142 = vpow2.f32 %v3492_v2 }
 0x9fb   : > { %v3498_v37 = vmul.f32 1.442695, %v3476_v32  ;;  %v3488_v58 = vmul.f32 1.442695, %v3471_v18 }
 0x9fc   : > { %v3447_v24 = vpop.xlane.xlu1 %3446  ;;  %v3453_v36 = vpop.xlane.xlu0 %3452 }
 0x9fd   : > { %5144 = vpow2.f32 %v3498_v37  ;;  %v3474_v60 = vsub.f32 %v7175_v50, %v3447_v24  ;;  %v3477_v4 = vsub.f32 %v7178_v52, %v3453_v36 }
 0x9fe   : > { %5146 = vpow2.f32 %v3488_v58 }
 0x9ff   : > { %v3494_v34 = vmul.f32 1.442695, %v3474_v60  ;;  %v3500_v46 = vmul.f32 1.442695, %v3477_v4 }
 0xa00   : > { %v3459_v5 = vpop.xlane.xlu1 %3458  ;;  %v3449_v30 = vpop.xlane.xlu0 %3448 }
 0xa01   : > { %5148 = vpow2.f32 %v3494_v34  ;;  %v3480_v45 = vsub.f32 %v7188_v29, %v3459_v5  ;;  %v3475_v6 = vsub.f32 %v7185_v54, %v3449_v30 }
 0xa02   : > { %v7301_v53 = vpop.eup %5138  ;;  %5150 = vpow2.f32 %v3500_v46 }
 0xa03   : > { %v3496_v21 = vmul.f32 1.442695, %v3475_v6  ;;  %3522 = vadd.xlane.f32.xlu0 %v7301_v53  ;;  %v3506_v50 = vmul.f32 1.442695, %v3480_v45 }
 0xa04   : > { %v3455_v3 = vpop.xlane.xlu1 %3454  ;;  %v3461_v2 = vpop.xlane.xlu0 %3460 }
 0xa05   : > { %v3478_v52 = vsub.f32 %v7197_v27, %v3455_v3  ;;  %5152 = vpow2.f32 %v3496_v21  ;;  %v3481_v18 = vsub.f32 %v7200_v47, %v3461_v2 }
 0xa06   : > { %v7305_v40 = vpop.eup %5140  ;;  %5154 = vpow2.f32 %v3506_v50 }
 0xa07   : > { %3518 = vadd.xlane.f32.xlu0 %v7305_v40  ;;  %v7308_v32 = vpop.eup %5142  ;;  %v3502_v54 = vmul.f32 1.442695, %v3478_v52  ;;  %v3508_v34 = vmul.f32 1.442695, %v3481_v18 }
 0xa08   : > { %v3467_v16 = vpop.xlane.xlu1 %3466  ;;  %v3457_v29 = vpop.xlane.xlu0 %3456 }
 0xa09   : > { %v3479_v37 = vsub.f32 %v7205_v38, %v3457_v29  ;;  %v3484_v24 = vsub.f32 %v7208_v23, %v3467_v16  ;;  %5156 = vpow2.f32 %v3502_v54 }
 0xa0a   : > { %v7312_v58 = vpop.eup %5144 }
 0xa0b   : > { %v3504_v27 = vmul.f32 1.442695, %v3479_v37  ;;  %3530 = vadd.xlane.f32.xlu1 %v7312_v58  ;;  %3524 = vadd.xlane.f32.xlu0 %v7308_v32  ;;  %v7317_v4 = vpop.eup %5146  ;;  %v3514_v38 = vmul.f32 1.442695, %v3484_v24 }
 0xa0c   : > { %v3463_v36 = vpop.xlane.xlu1 %3462  ;;  %v3469_v60 = vpop.xlane.xlu0 %3468 }
 0xa0d   : > { %v3482_v5 = vsub.f32 %v7216_v55, %v3463_v36  ;;  %5158 = vpow2.f32 %v3504_v27  ;;  %v3485_v46 = vsub.f32 %v7219_v51, %v3469_v60 }
 0xa0e   : > { %v7320_v47 = vpop.eup %5148  ;;  %5160 = vpow2.f32 %v3508_v34 }
 0xa0f   : > { %3526 = vadd.xlane.f32.xlu1 %v7320_v47  ;;  %3520 = vadd.xlane.f32.xlu0 %v7317_v4  ;;  %v3510_v23 = vmul.f32 1.442695, %v3482_v5  ;;  %v7326_v6 = vpop.eup %5150  ;;  %5162 = vpow2.f32 %v3514_v38  ;;  %v3516_v3 = vmul.f32 1.442695, %v3485_v46 }
 0xa10   : > { %v3465_v30 = vpop.xlane.xlu0 %3464 }
 0xa11   : > { %v3483_v45 = vsub.f32 %v7225_v9, %v3465_v30  ;;  %5164 = vpow2.f32 %v3510_v23 }
 0xa12   : > { %v7328_v21 = vpop.eup %5152 }
 0xa13   : > { %v3512_v55 = vmul.f32 1.442695, %v3483_v45  ;;  %3532 = vadd.xlane.f32.xlu1 %v7326_v6  ;;  %3528 = vadd.xlane.f32.xlu0 %v7328_v21  ;;  %v7332_v2 = vpop.eup %5154 }
 0xa15   : > { %5166 = vpow2.f32 %v3512_v55 }
 0xa16   : > { %5168 = vpow2.f32 %v3516_v3  ;;  %v7335_v9 = vpop.eup %5156 }
 0xa17   : > { %3538 = vadd.xlane.f32.xlu1 %v7332_v2 }
 0xa19   : > { %v3049_v51 = vpop.xlane.xlu1 %3048 }
 0xa1a   : > { %v7337_v50 = vpop.eup %5158 }
 0xa1b   : > { %3534 = vadd.xlane.f32.xlu1 %v7335_v9  ;;  %3536 = vadd.xlane.f32.xlu0 %v7337_v50  ;;  %v7341_v52 = vpop.eup %5160 }
 0xa1c   : > { %v7343_v16 = vpop.eup %5162 }
 0xa1d   : > { %v3045_v29 = vpop.xlane.xlu1 %3044 }
 0xa1e   : > { %v7347_v54 = vpop.eup %5164 }
 0xa1f   : > { %3540 = vadd.xlane.f32.xlu1 %v7341_v52  ;;  %3546 = vadd.xlane.f32.xlu0 %v7343_v16 }
 0xa21   : > { %v3051_v18 = vpop.xlane.xlu0 %3050 }
 0xa22   : > { %v7349_v37 = vpop.eup %5166  ;;  %5170 = vrcp.f32 %v3051_v18 }
 0xa23   : > { %v3057_v24 = vpop.xlane.xlu1 %3056  ;;  %3542 = vadd.xlane.f32.xlu1 %v7347_v54  ;;  %5172 = vrcp.f32 %v3045_v29  ;;  %3544 = vadd.xlane.f32.xlu0 %v7349_v37  ;;  %v7353_v36 = vpop.eup %5168 }
 0xa24   : > { %5174 = vrcp.f32 %v3049_v51 }
 0xa25   : > { %v3047_v27 = vpop.xlane.xlu0 %3046 }
 0xa26   : > { %5176 = vrcp.f32 %v3047_v27 }
 0xa27   : > { %v3053_v60 = vpop.xlane.xlu1 %3052  ;;  %3548 = vadd.xlane.f32.xlu1 %v7353_v36 }
 0xa29   : > { %v3059_v34 = vpop.xlane.xlu0 %3058 }
 0xa2a   : > { %5178 = vrcp.f32 %v3059_v34 }
 0xa2b   : > { %v3065_v5 = vpop.xlane.xlu1 %3064  ;;  %5180 = vrcp.f32 %v3053_v60 }
 0xa2c   : > { %5182 = vrcp.f32 %v3057_v24 }
 0xa2d   : > { %v3055_v38 = vpop.xlane.xlu0 %3054 }
 0xa2e   : > { %5184 = vrcp.f32 %v3055_v38 }
 0xa2f   : > { %v3061_v23 = vpop.xlane.xlu1 %3060  ;;  %v5171_v30 = vpop.eup %5170 }
 0xa30   : > { %v5173_v46 = vpop.eup %5172  ;;  %v3083_v29 = vmul.f32 %v5171_v30, %v7244_v62 }
 0xa31   : > { %v3067_v45 = vpop.xlane.xlu0 %3066  ;;  %v5175_v55 = vpop.eup %5174  ;;  %v3077_v18 = vmul.f32 %v5173_v46, %v7239_v57 }
 0xa32   : > { %5186 = vrcp.f32 %v3067_v45  ;;  %v3081_v24 = vmul.f32 %v5175_v55, %v7234_v44 }
 0xa33   : > { %v5177_v3 = vpop.eup %5176  ;;  %v3073_v51 = vpop.xlane.xlu1 %3072  ;;  %5188 = vrcp.f32 %v3061_v23 }
 0xa34   : > { %v3079_v27 = vmul.f32 %v5177_v3, %v7252_v14  ;;  %5190 = vrcp.f32 %v3065_v5  ;;  %v3109_v38 = vpack.c.bf16 %v3083_v29, %v3081_v24 }
 0xa35   : > { %v3063_v60 = vpop.xlane.xlu0 %3062 }
 0xa36   : > { %5192 = vrcp.f32 %v3063_v60  ;;  %v3108_v34 = vpack.c.bf16 %v3079_v27, %v3077_v18 }
 0xa37   : > { %v5179_v41 = vpop.eup %5178  ;;  %v3069_v11 = vpop.xlane.xlu1 %3068 }
 0xa38   : > { %4696 = vmatprep.mubr.bf16.mxu0 %v3108_v34  ;;  %v5181_v59 = vpop.eup %5180  ;;  %v3091_v44 = vmul.f32 %v5179_v41, %v7260_v7 }
 0xa39   : > { %4697 = vmatmul.mubr.bf16.vlgmr.msra.gmra.mxu0 %v3109_v38  ;;  %v3075_v45 = vpop.xlane.xlu0 %3074  ;;  %v5183_v17 = vpop.eup %5182  ;;  %3598 = vrot.lane.b32.xlu0 %v6835_v0, %s5414_s11  ;;  %v3085_v62 = vmul.f32 %v5181_v59, %v7256_v1  ;;  %s7793_s11 = scalar_lea.hbm %s7859_s10, %s4352_s25 }
 0xa3a   : > { %4745 = vmatpush3.bf16.msra.mxu0 %v7073_v15  ;;  %5194 = vrcp.f32 %v3075_v45  ;;  %v3089_v23 = vmul.f32 %v5183_v17, %v7248_v42 }
 0xa3b   : > { %v5185_v57 = vpop.eup %5184  ;;  %4746 = vmatprep.subr.bf16.mxu0 %v7194_v39  ;;  %5196 = vrcp.f32 %v3069_v11  ;;  %v3601_v3 = vpop.permute.xlu1 %3600 }
 0xa3c   : > { %v3087_v14 = vmul.f32 %v5185_v57, %v7266_v10  ;;  %5198 = vrcp.f32 %v3073_v51  ;;  %v3111_v15 = vpack.c.bf16 %v3091_v44, %v3089_v23 }
 0xa3d   : > { %v3071_v5 = vpop.xlane.xlu0 %3070 }
 0xa3e   : > { %4747 = vmatpush3.bf16.msra.mxu0 %v7194_v39  ;;  %5200 = vrcp.f32 %v3071_v5  ;;  %v3110_v0 = vpack.c.bf16 %v3087_v14, %v3085_v62 }
 0xa3f   : > { %4748 = vmatprep.subr.bf16.mxu0 %v7164_v13  ;;  %v5187_v30 = vpop.eup %5186 }
 0xa40   : > { %4700 = vmatprep.mubr.bf16.mxu0 %v3110_v0  ;;  %v5189_v46 = vpop.eup %5188  ;;  %v3099_v11 = vmul.f32 %v5187_v30, %v7272_v35 }
 0xa41   : > { %4701 = vmatmul.mubr.bf16.gmra.mxu0 %v3111_v15  ;;  %v5191_v41 = vpop.eup %5190  ;;  %v3093_v17 = vmul.f32 %v5189_v46, %v7269_v19 }
 0xa42   : > { %4749 = vmatpush3.bf16.msra.mxu0 %v7164_v13  ;;  %v3097_v42 = vmul.f32 %v5191_v41, %v7263_v22 }
 0xa43   : > { %v5193_v59 = vpop.eup %5192  ;;  %4750 = vmatprep.subr.bf16.mxu0 %v7211_v28 }
 0xa44   : > { %v3095_v39 = vmul.f32 %v5193_v59, %v7278_v8  ;;  %v3113_v7 = vpack.c.bf16 %v3099_v11, %v3097_v42 }
 0xa46   : > { %4751 = vmatpush3.bf16.msra.mxu0 %v7211_v28  ;;  %v3112_v1 = vpack.c.bf16 %v3095_v39, %v3093_v17 }
 0xa47   : > { %4752 = vmatprep.subr.bf16.mxu0 %v7180_v26  ;;  %v5195_v10 = vpop.eup %5194 }
 0xa48   : > { %4704 = vmatprep.mubr.bf16.mxu0 %v3112_v1  ;;  %v5197_v13 = vpop.eup %5196  ;;  %v3107_v19 = vmul.f32 %v5195_v10, %v7284_v12 }
 0xa49   : > { %4705 = vmatmul.mubr.bf16.gmra.mxu0 %v3113_v7  ;;  %v5199_v55 = vpop.eup %5198  ;;  %v3101_v22 = vmul.f32 %v5197_v13, %v7281_v56 }
 0xa4a   : > { %4753 = vmatpush3.bf16.msra.mxu0 %v7180_v26  ;;  %v3105_v8 = vmul.f32 %v5199_v55, %v7275_v63 }
 0xa4b   : > { %v5201_v35 = vpop.eup %5200  ;;  %4754 = vmatprep.subr.bf16.mxu0 %v7192_v48 }
 0xa4c   : > { %v3103_v28 = vmul.f32 %v5201_v35, %v7287_v43  ;;  %v3115_v29 = vpack.c.bf16 %v3107_v19, %v3105_v8 }
 0xa4e   : > { %4755 = vmatpush3.bf16.msra.mxu0 %v7192_v48  ;;  %v3114_v51 = vpack.c.bf16 %v3103_v28, %v3101_v22 }
 0xa4f   : > { %4756 = vmatprep.subr.bf16.mxu0 %v3601_v3 }
 0xa50   : > { %4708 = vmatprep.mubr.bf16.mxu0 %v3114_v51 }
 0xa51   : > { %4709 = vmatmul.mubr.bf16.gmra.mxu0 %v3115_v29 }
 0xa52   : > { %4757 = vmatpush3.bf16.msra.mxu0 %v3601_v3 }
 0xa8c   : > { %v3523_v26 = vpop.xlane.xlu0 %3522 }
 0xa90   : > { %v3519_v18 = vpop.xlane.xlu0 %3518 }
 0xa91   : > { %5202 = vrcp.f32 %v3519_v18 }
 0xa94   : > { %v3531_v27 = vpop.xlane.xlu1 %3530  ;;  %v3525_v60 = vpop.xlane.xlu0 %3524 }
 0xa98   : > { %v3527_v12 = vpop.xlane.xlu1 %3526  ;;  %v3521_v56 = vpop.xlane.xlu0 %3520 }
 0xa99   : > { %5204 = vrcp.f32 %v3521_v56  ;;  %v7401_v56 = vpop.f32.mrf.mxu0 }
 0xa9a   : > { %5206 = vrcp.f32 %v3525_v60 }
 0xa9c   : > { %v3533_v43 = vpop.xlane.xlu1 %3532  ;;  %v3529_v24 = vpop.xlane.xlu0 %3528 }
 0xa9d   : > { %5208 = vrcp.f32 %v3529_v24 }
 0xa9e   : > { %5210 = vrcp.f32 %v3523_v26  ;;  %v5203_v34 = vpop.eup %5202 }
 0xa9f   : > { %5212 = vrcp.f32 %v3527_v12  ;;  %v3551_v44 = vmul.f32 %v5203_v34, %v7305_v40 }
 0xaa0   : > { %v3539_v63 = vpop.xlane.xlu1 %3538  ;;  %5214 = vrcp.f32 %v3533_v43 }
 0xaa4   : > { %v3535_v48 = vpop.xlane.xlu1 %3534  ;;  %v3537_v38 = vpop.xlane.xlu0 %3536 }
 0xaa5   : > { %5216 = vrcp.f32 %v3535_v48 }
 0xaa6   : > { %v5205_v45 = vpop.eup %5204  ;;  %5218 = vrcp.f32 %v3537_v38 }
 0xaa7   : > { %v3553_v62 = vmul.f32 %v5205_v45, %v7317_v4  ;;  %5220 = vrcp.f32 %v3531_v27  ;;  %v5207_v23 = vpop.eup %5206 }
 0xaa8   : > { %v3541_v57 = vpop.xlane.xlu1 %3540  ;;  %v3547_v14 = vpop.xlane.xlu0 %3546  ;;  %v3557_v59 = vmul.f32 %v5207_v23, %v7308_v32 }
 0xaa9   : > { %v3582_v5 = vpack.c.bf16 %v3553_v62, %v3551_v44  ;;  %5222 = vrcp.f32 %v3541_v57 }
 0xaaa   : > { %v5209_v30 = vpop.eup %5208 }
 0xaab   : > { %4760 = vmatprep.mubr.bf16.mxu0 %v3582_v5  ;;  %v5211_v46 = vpop.eup %5210  ;;  %v3561_v40 = vmul.f32 %v5209_v30, %v7328_v21 }
 0xaac   : > { %v3543_v0 = vpop.xlane.xlu1 %3542  ;;  %v3545_v15 = vpop.xlane.xlu0 %3544  ;;  %v3555_v4 = vmul.f32 %v5211_v46, %v7301_v53 }
 0xaad   : > { %v5213_v41 = vpop.eup %5212  ;;  %5224 = vrcp.f32 %v3543_v0 }
 0xaae   : > { %5226 = vrcp.f32 %v3545_v15  ;;  %v3559_v17 = vmul.f32 %v5213_v41, %v7320_v47  ;;  %v5215_v39 = vpop.eup %5214  ;;  %v3583_v42 = vpack.c.bf16 %v3557_v59, %v3555_v4 }
 0xaaf   : > { %5228 = vrcp.f32 %v3539_v63  ;;  %v3565_v55 = vmul.f32 %v5215_v39, %v7326_v6 }
 0xab0   : > { %v3599_v11 = vpop.permute.xlu0 %3598  ;;  %v3549_v7 = vpop.xlane.xlu1 %3548  ;;  %v3584_v10 = vpack.c.bf16 %v3561_v40, %v3559_v17 }
 0xab1   : > { %4758 = vmatprep.subr.bf16.mxu0 %v3599_v11  ;;  %5230 = vrcp.f32 %v3549_v7  ;;  %v5267_v7 = vld [vmem:[%s7856_s7] sm:$0xf] }
 0xab2   : > { %4759 = vmatpush3.bf16.msra.mxu0 %v3599_v11  ;;  %v5217_v1 = vpop.eup %5216  ;;  %5232 = vrcp.f32 %v3547_v14 }
 0xab3   : > { %v5219_v13 = vpop.eup %5218  ;;  %v3567_v21 = vmul.f32 %v5217_v1, %v7335_v9 }
 0xab4   : > { %v5221_v32 = vpop.eup %5220  ;;  %v3569_v53 = vmul.f32 %v5219_v13, %v7337_v50 }
 0xab5   : > { %4761 = vmatmul.mubr.bf16.vlgmr.msra.gmra.mxu0 %v3583_v42  ;;  %v3563_v35 = vmul.f32 %v5221_v32, %v7312_v58 }
 0xab6   : > { %4764 = vmatprep.mubr.bf16.mxu0 %v3584_v10  ;;  %v5223_v47 = vpop.eup %5222  ;;  %v3586_v28 = vpack.c.bf16 %v3569_v53, %v3567_v21  ;;  %v8088_v10 = vsub.s32 3, %v8036_v49 }
 0xab7   : > { %v3585_v19 = vpack.c.bf16 %v3565_v55, %v3563_v35  ;;  %v3573_v51 = vmul.f32 %v5223_v47, %v7341_v52 }
 0xab8   : > { %v7452_v13 = vrot.slane %v5267_v7, %v8088_v10  ;;  %v8097_v10 = vld [vmem:[#allocation23_spill] sm:$0xff] }
 0xaba   : > { %v5225_v22 = vpop.eup %5224  ;;  %v2696_v21 = vadd.f32 %v6844_v33, %v7452_v13 }
 0xabb   : > { %v5227_v8 = vpop.eup %5226  ;;  %v3575_v29 = vmul.f32 %v5225_v22, %v7347_v54 }
 0xabc   : > { %v5229_v3 = vpop.eup %5228  ;;  %v3577_v6 = vmul.f32 %v5227_v8, %v7349_v37  ;;  %v2686_v8 = vadd.f32 %v6820_v61, %v7452_v13 }
 0xabd   : > { %4765 = vmatmul.mubr.bf16.gmra.mxu0 %v3585_v19  ;;  %v3571_v9 = vmul.f32 %v5229_v3, %v7332_v2 }
 0xabe   : > { %4768 = vmatprep.mubr.bf16.mxu0 %v3586_v28  ;;  %v5231_v26 = vpop.eup %5230  ;;  %v3588_v18 = vpack.c.bf16 %v3577_v6, %v3575_v29 }
 0xabf   : > { %v3587_v50 = vpack.c.bf16 %v3573_v51, %v3571_v9  ;;  %v5233_v58 = vpop.eup %5232  ;;  %v3581_v27 = vmul.f32 %v5231_v26, %v7353_v36  ;;  %v8089_v9 = vld [vmem:[#allocation19_spill] sm:$0xff] }
 0xac0   : > { %v3579_v60 = vmul.f32 %v5233_v58, %v7343_v16  ;;  %v2700_v61 = vadd.f32 %v8089_v9, %v7452_v13 }
 0xac2   : > { %v3589_v12 = vpack.c.bf16 %v3581_v27, %v3579_v60 }
 0xac5   : > { %4769 = vmatmul.mubr.bf16.gmra.mxu0 %v3587_v50 }
 0xac6   : > { %4772 = vmatprep.mubr.bf16.mxu0 %v3588_v18  ;;  %v8090_v18 = vld [vmem:[#allocation21_spill] sm:$0xff] }
 0xac7   : > { %v2690_v58 = vadd.f32 %v8090_v18, %v7452_v13 }
 0xacd   : > { %4773 = vmatmul.mubr.bf16.gmra.mxu0 %v3589_v12 }
 0xaf9   : > { %v4698_v52 = vpop.f32.mrf.mxu0 }
 0xafb   : > { %v3150_v54 = vpop.f32.mrf.mxu0 }
 0xafd   : > { %v7403_v43 = vpop.f32.mrf.mxu0 }
 0xaff   : > { %v7405_v37 = vpop.f32.mrf.mxu0 }
 0xb01   : > { %v7407_v2 = vpop.f32.mrf.mxu0 }
 0xb03   : > { %v7409_v24 = vpop.f32.mrf.mxu0 }
 0xb05   : > { %v7411_v63 = vpop.f32.mrf.mxu0 }
 0xb07   : > { %v7413_v48 = vpop.f32.mrf.mxu0 }
 0xb09   : > { %v7415_v36 = vpop.f32.mrf.mxu0 }
 0xb0b   : > { %v7417_v16 = vpop.f32.mrf.mxu0 }
 0xb0d   : > { %v7419_v34 = vpop.f32.mrf.mxu0 }
 0xb0f   : > { %v7421_v38 = vpop.f32.mrf.mxu0 }
 0xb11   : > { %v7423_v45 = vpop.f32.mrf.mxu0 }
 0xb13   : > { %v7425_v57 = vpop.f32.mrf.mxu0 }
 0xb15   : > { %v7427_v44 = vpop.f32.mrf.mxu0 }
 0xb17   : > { %v7429_v62 = vpop.f32.mrf.mxu0 }
 0xb75   : > { %v4762_v14 = vpop.f32.mrf.mxu0 }
 0xb76   : > { %3739 = vrot.lane.b32.xlu0 %v4762_v14, %s5415_s23  ;;  %v8106_v14 = vld [vmem:[#allocation27_spill] sm:$0xff] }
 0xb77   : > { %v3656_v5 = vpop.f32.mrf.mxu0 }
 0xb78   : > { %3735 = vrot.lane.b32.xlu1 %v3656_v5, %s5415_s23 }
 0xb79   : > { %v4763_v23 = vpop.f32.mrf.mxu0 }
 0xb7b   : > { %v3659_v0 = vpop.f32.mrf.mxu0 }
 0xb7c   : > { %3741 = vrot.lane.b32.xlu1 %v4763_v23, %s5415_s23 }
 0xb7d   : > { %v4766_v15 = vpop.f32.mrf.mxu0 }
 0xb7e   : > { %3747 = vrot.lane.b32.xlu0 %v4766_v15, %s5415_s23 }
 0xb7f   : > { %v3672_v30 = vpop.f32.mrf.mxu0 }
 0xb80   : > { %3737 = vrot.lane.b32.xlu1 %v3659_v0, %s5415_s23  ;;  %v8093_v0 = vld [vmem:[#allocation25_spill] sm:$0xff] }
 0xb81   : > { %v4767_v46 = vpop.f32.mrf.mxu0  ;;  %v2716_v15 = vadd.f32 %v8093_v0, %v7452_v13 }
 0xb82   : > { %3743 = vrot.lane.b32.xlu0 %v3672_v30, %s5415_s23  ;;  %v8094_v30 = vld [vmem:[#allocation24_spill] sm:$0xff] }
 0xb83   : > { %v3675_v41 = vpop.f32.mrf.mxu0 }
 0xb84   : > { %3749 = vrot.lane.b32.xlu1 %v4767_v46, %s5415_s23  ;;  %v2720_v46 = vadd.f32 %v8094_v30, %v7452_v13 }
 0xb85   : > { %v4770_v59 = vpop.f32.mrf.mxu0 }
 0xb86   : > { %3755 = vrot.lane.b32.xlu0 %v4770_v59, %s5415_s23 }
 0xb87   : > { %v3688_v11 = vpop.f32.mrf.mxu0 }
 0xb88   : > { %3745 = vrot.lane.b32.xlu1 %v3675_v41, %s5415_s23 }
 0xb89   : > { %v4771_v40 = vpop.f32.mrf.mxu0 }
 0xb8a   : > { %3751 = vrot.lane.b32.xlu0 %v3688_v11, %s5415_s23 }
 0xb8b   : > { %v3691_v4 = vpop.f32.mrf.mxu0 }
 0xb8c   : > { %3757 = vrot.lane.b32.xlu1 %v4771_v40, %s5415_s23 }
 0xb8d   : > { %v4774_v17 = vpop.f32.mrf.mxu0 }
 0xb8f   : > { %v3704_v39 = vpop.f32.mrf.mxu0 }
 0xb90   : > { %3753 = vrot.lane.b32.xlu1 %v3691_v4, %s5415_s23  ;;  %3759 = vrot.lane.b32.xlu0 %v3704_v39, %s5415_s23 }
 0xb91   : > { %v4775_v42 = vpop.f32.mrf.mxu0 }
 0xb93   : > { %v3707_v1 = vpop.f32.mrf.mxu0 }
 0xb94   : > { %3763 = vrot.lane.b32.xlu0 %v4774_v17, %s5415_s23  ;;  %3761 = vrot.lane.b32.xlu1 %v3707_v1, %s5415_s23 }
 0xb98   : > { %3765 = vrot.lane.b32.xlu1 %v4775_v42, %s5415_s23  ;;  %v8111_v42 = vld [vmem:[#allocation30_spill] sm:$0xff]  ;;  %s5320_s23 = scalar_lea.vmem %s7795_s28, 2048 }
 0xb99   : > { %p5321_p8 = scmp.ne.s32.totalorder %s7795_s28, %s5320_s23  ;;  %p5328_p6 = scmp.lt.s32.totalorder %s5326_s12, %s5320_s23 }
 0xb9b   : > { %p5322_p12 = pnand %p5321_p8, %p8120_p10  ;;  %p5329_p13 = por %p5328_p6, %p5327_p5 }
 0xb9d   : > { %p5323_p1 = pneg %p5322_p12 }
 0xb9f   : > { %p5330_p4 = pnand %p5329_p13, %p5323_p1 }
 0xbe8   : > { %v3740_v32 = vpop.permute.xlu0 %3739 }
 0xbe9   : > { %v3785_v55 = vsel %vm2786_vm3, %v4698_v52, %v3740_v32  ;;  %v2706_v32 = vadd.f32 %v8097_v10, %v7452_v13 }
 0xbea   : > { %v3801_v53 = vsel %vm977_vm2, %v3785_v55, 0.0  ;;  %v3736_v35 = vpop.permute.xlu1 %3735  ;;  %v8098_v55 = vld [vmem:[#allocation22_spill] sm:$0xff] }
 0xbeb   : > { %v3817_v47 = vsel %vm633_vm5, %v3801_v53, 0.0  ;;  %v3783_v19 = vsel %vm2786_vm3, %v3150_v54, %v3736_v35 }
 0xbec   : > { %v3799_v22 = vsel %vm977_vm2, %v3783_v19, 0.0  ;;  %v7462_v28 = vadd.f32 %v3817_v47, %v2696_v21  ;;  %v2710_v21 = vadd.f32 %v8098_v55, %v7452_v13  ;;  %v8116_v47 = vld [vmem:[#allocation32_spill] sm:$0xff] }
 0xbed   : > { %v3815_v49 = vsel %vm631_vm4, %v3799_v22, 0.0 }
 0xbee   : > { %v3742_v3 = vpop.permute.xlu1 %3741  ;;  %3851 = vadd.xlane.f32.xlu0 %v7462_v28  ;;  %v7472_v29 = vadd.f32 %v3815_v49, %v2686_v8 }
 0xbef   : > { %v3786_v33 = vsel %vm2786_vm3, %v7403_v43, %v3742_v3 }
 0xbf0   : > { %v3802_v20 = vsel %vm977_vm2, %v3786_v33, 0.0  ;;  %v3748_v51 = vpop.permute.xlu0 %3747 }
 0xbf1   : > { %v3818_v6 = vsel %vm634_vm6, %v3802_v20, 0.0  ;;  %v3789_v31 = vsel %vm2786_vm3, %v7407_v2, %v3748_v51  ;;  %v8101_v51 = vld [vmem:[#allocation28_spill] sm:$0xff] }
 0xbf2   : > { %v3738_v50 = vpop.permute.xlu1 %3737  ;;  %3847 = vadd.xlane.f32.xlu0 %v7472_v29  ;;  %v3805_v27 = vsel %vm977_vm2, %v3789_v31, 0.0  ;;  %v7487_v12 = vadd.f32 %v3818_v6, %v2700_v61  ;;  %v2736_v6 = vadd.f32 %v8101_v51, %v7452_v13  ;;  %v8102_v31 = vld [vmem:[#allocation29_spill] sm:$0xff] }
 0xbf3   : > { %v3784_v26 = vsel %vm2786_vm3, %v7405_v37, %v3738_v50  ;;  %v3821_v5 = vsel %vm637_vm11, %v3805_v27, 0.0  ;;  %v2740_v9 = vadd.f32 %v8102_v31, %v7452_v13 }
 0xbf4   : > { %v3800_v25 = vsel %vm977_vm2, %v3784_v26, 0.0  ;;  %v3744_v60 = vpop.permute.xlu0 %3743  ;;  %v7513_v39 = vadd.f32 %v3821_v5, %v2716_v15  ;;  %v2730_v5 = vadd.f32 %v8106_v14, %v7452_v13  ;;  %v8107_v15 = vld [vmem:[#allocation55_spill] sm:$0xff] }
 0xbf5   : > { %v3816_v54 = vsel %vm632_vm7, %v3800_v25, 0.0  ;;  %v3787_v43 = vsel %vm2786_vm3, %v7409_v24, %v3744_v60  ;;  %vm8108_vm4 = vcmp.gt.f32.partialorder %v8107_v15, 0.0 }
 0xbf6   : > { %v3750_v2 = vpop.permute.xlu1 %3749  ;;  %3853 = vadd.xlane.f32.xlu0 %v7487_v12  ;;  %v7494_v37 = vadd.f32 %v3816_v54, %v2690_v58  ;;  %v3803_v41 = vsel %vm977_vm2, %v3787_v43, 0.0  ;;  %v8105_v43 = vld [vmem:[#allocation26_spill] sm:$0xff] }
 0xbf7   : > { %v3790_v23 = vsel %vm2786_vm3, %v7411_v63, %v3750_v2  ;;  %v3819_v1 = vsel %vm635_vm9, %v3803_v41, 0.0  ;;  %v2726_v2 = vadd.f32 %v8105_v43, %v7452_v13 }
 0xbf8   : > { %v3806_v24 = vsel %vm977_vm2, %v3790_v23, 0.0  ;;  %v3756_v59 = vpop.permute.xlu0 %3755  ;;  %3849 = vadd.xlane.f32.xlu1 %v7494_v37  ;;  %v7533_v8 = vadd.f32 %v3819_v1, %v2706_v32  ;;  %v2750_v1 = vadd.f32 %v8111_v42, %v7452_v13  ;;  %v8112_v32 = vld [vmem:[#allocation59_spill] sm:$0xff] }
 0xbf9   : > { %v3822_v40 = vsel %vm638_vm10, %v3806_v24, 0.0  ;;  %v3793_v4 = vsel %vm2786_vm3, %v7415_v36, %v3756_v59  ;;  %vm8113_vm5 = vcmp.gt.f32.partialorder %v8112_v32, 0.0 }
 0xbfa   : > { %v3746_v63 = vpop.permute.xlu1 %3745  ;;  %v7511_v17 = vadd.f32 %v3822_v40, %v2720_v46  ;;  %v3809_v53 = vsel %vm977_vm2, %v3793_v4, 0.0  ;;  %v8110_v4 = vld [vmem:[#allocation31_spill] sm:$0xff] }
 0xbfb   : > { %v3788_v7 = vsel %vm2786_vm3, %v7413_v48, %v3746_v63  ;;  %v3825_v33 = vsel %vm641_vm13, %v3809_v53, 0.0  ;;  %v2746_v63 = vadd.f32 %v8110_v4, %v7452_v13  ;;  %v8114_v53 = vld [vmem:[#allocation18_spill] sm:$0xff] }
 0xbfc   : > { %v3804_v36 = vsel %vm977_vm2, %v3788_v7, 0.0  ;;  %v3752_v35 = vpop.permute.xlu0 %3751  ;;  %3861 = vadd.xlane.f32.xlu0 %v7511_v17  ;;  %3859 = vadd.xlane.f32.xlu1 %v7513_v39  ;;  %v7551_v27 = vadd.f32 %v3825_v33, %v2736_v6  ;;  %vm8115_vm6 = vcmp.gt.f32.partialorder %v8114_v53, 0.0  ;;  %v8119_v6 = vmov 0.0  }
 0xbfd   : > { %v3820_v19 = vsel %vm636_vm8, %v3804_v36, 0.0  ;;  %v3791_v48 = vsel %vm2786_vm3, %v7417_v16, %v3752_v35 }
 0xbfe   : > { %v3758_v22 = vpop.permute.xlu1 %3757  ;;  %v7531_v49 = vadd.f32 %v3820_v19, %v2710_v21  ;;  %v3807_v61 = vsel %vm977_vm2, %v3791_v48, 0.0  ;;  %v2756_v19 = vadd.f32 %v8116_v47, %v7452_v13  ;;  %v2760_v48 = vadd.f32 %v7401_v56, %v7452_v13 }
 0xbff   : > { %v3794_v20 = vsel %vm2786_vm3, %v7419_v34, %v3758_v22  ;;  %v3823_v60 = vsel %vm639_vm12, %v3807_v61, 0.0 }
 0xc00   : > { %v3810_v16 = vsel %vm977_vm2, %v3794_v20, 0.0  ;;  %3857 = vadd.xlane.f32.xlu0 %v7531_v49  ;;  %3855 = vadd.xlane.f32.xlu1 %v7533_v8  ;;  %v7571_v41 = vadd.f32 %v3823_v60, %v2726_v2 }
 0xc01   : > { %v3826_v26 = vsel %vm642_vm15, %v3810_v16, 0.0 }
 0xc02   : > { %v3754_v18 = vpop.permute.xlu1 %3753  ;;  %v3760_v58 = vpop.permute.xlu0 %3759  ;;  %v7549_v34 = vadd.f32 %v3826_v26, %v2740_v9 }
 0xc03   : > { %v3792_v52 = vsel %vm2786_vm3, %v7421_v38, %v3754_v18  ;;  %v3795_v54 = vsel %vm2786_vm3, %v7425_v57, %v3760_v58 }
 0xc04   : > { %v3808_v23 = vsel %vm977_vm2, %v3792_v52, 0.0  ;;  %v3811_v0 = vsel %vm977_vm2, %v3795_v54, 0.0  ;;  %3869 = vadd.xlane.f32.xlu0 %v7549_v34  ;;  %3867 = vadd.xlane.f32.xlu1 %v7551_v27 }
 0xc05   : > { %v3824_v38 = vsel %vm8108_vm4, %v3808_v23, 0.0  ;;  %v3827_v59 = vsel %vm643_vm1, %v3811_v0, 0.0 }
 0xc06   : > { %v3764_v30 = vpop.permute.xlu0 %3763  ;;  %v3762_v46 = vpop.permute.xlu1 %3761  ;;  %v7569_v57 = vadd.f32 %v3824_v38, %v2730_v5  ;;  %v7589_v21 = vadd.f32 %v3827_v59, %v2746_v63 }
 0xc07   : > { %v3797_v11 = vsel %vm2786_vm3, %v7423_v45, %v3764_v30  ;;  %v3796_v40 = vsel %vm2786_vm3, %v7429_v62, %v3762_v46 }
 0xc08   : > { %v3813_v7 = vsel %vm977_vm2, %v3797_v11, 0.0  ;;  %v3812_v10 = vsel %vm977_vm2, %v3796_v40, 0.0  ;;  %3865 = vadd.xlane.f32.xlu0 %v7569_v57  ;;  %3863 = vadd.xlane.f32.xlu1 %v7571_v41 }
 0xc09   : > { %v3828_v45 = vsel %vm8113_vm5, %v3812_v10, 0.0  ;;  %v3829_v36 = vsel %vm8115_vm6, %v3813_v7, 0.0 }
 0xc0a   : > { %v3766_v55 = vpop.permute.xlu1 %3765  ;;  %v7591_v62 = vadd.f32 %v3828_v45, %v2750_v1  ;;  %v7606_v20 = vadd.f32 %v3829_v36, %v2756_v19 }
 0xc0b   : > { %v3798_v35 = vsel %vm2786_vm3, %v7427_v44, %v3766_v55  ;;  %v8118_v44 = vld [vmem:[#allocation20_spill] sm:$0xff] }
 0xc0c   : > { %v3814_v22 = vsel %vm977_vm2, %v3798_v35, 0.0  ;;  %3871 = vadd.xlane.f32.xlu1 %v7589_v21  ;;  %3873 = vadd.xlane.f32.xlu0 %v7591_v62  ;;  %vm3911_vm7 = vcmp.lt.s32.totalorder %v8118_v44, 32 }
 0xc0d   : > { %v3830_v33 = vsel %vm646_vm14, %v3814_v22, 0.0  ;;  %v7614_v31 = vsel %vm3911_vm7, 1.0, %v8119_v6 }
 0xc0e   : > { %v7608_v51 = vadd.f32 %v3830_v33, %v2760_v48 }
 0xc10   : > { %3875 = vadd.xlane.f32.xlu1 %v7606_v20  ;;  %3877 = vadd.xlane.f32.xlu0 %v7608_v51 }
 0xc77   : > { %v3852_v56 = vpop.xlane.xlu0 %3851 }
 0xc78   : > { %v3881_v13 = vmul.f32 0.03125, %v3852_v56 }
 0xc7a   : > { %v3897_v9 = vsub.f32 %v7462_v28, %v3881_v13 }
 0xc7b   : > { %v3848_v61 = vpop.xlane.xlu0 %3847 }
 0xc7c   : > { %v7618_v16 = vmul.f32 %v7614_v31, %v3897_v9  ;;  %v3879_v50 = vmul.f32 0.03125, %v3848_v61 }
 0xc7e   : > { %v3895_v26 = vsub.f32 %v7472_v29, %v3879_v50  ;;  %v3932_v18 = vmul.f32 %v7618_v16, %v7618_v16 }
 0xc7f   : > { %v3854_v58 = vpop.xlane.xlu0 %3853 }
 0xc80   : > { %v7624_v25 = vmul.f32 %v7614_v31, %v3895_v26  ;;  %v3882_v60 = vmul.f32 0.03125, %v3854_v58  ;;  %3950 = vadd.xlane.f32.xlu1 %v3932_v18 }
 0xc81   : > { %v3850_v52 = vpop.xlane.xlu1 %3849 }
 0xc82   : > { %v3898_v54 = vsub.f32 %v7487_v12, %v3882_v60  ;;  %v3880_v28 = vmul.f32 0.03125, %v3850_v52  ;;  %v3930_v43 = vmul.f32 %v7624_v25, %v7624_v25 }
 0xc84   : > { %v7630_v2 = vmul.f32 %v7614_v31, %v3898_v54  ;;  %v3896_v29 = vsub.f32 %v7494_v37, %v3880_v28  ;;  %3946 = vadd.xlane.f32.xlu1 %v3930_v43 }
 0xc85   : > { %v3862_v14 = vpop.xlane.xlu0 %3861  ;;  %v3860_v5 = vpop.xlane.xlu1 %3859 }
 0xc86   : > { %v7634_v23 = vmul.f32 %v7614_v31, %v3896_v29  ;;  %v3886_v0 = vmul.f32 0.03125, %v3862_v14  ;;  %v3885_v15 = vmul.f32 0.03125, %v3860_v5  ;;  %v3933_v12 = vmul.f32 %v7630_v2, %v7630_v2 }
 0xc88   : > { %v3902_v38 = vsub.f32 %v7511_v17, %v3886_v0  ;;  %v3901_v30 = vsub.f32 %v7513_v39, %v3885_v15  ;;  %3952 = vadd.xlane.f32.xlu0 %v3933_v12  ;;  %v3931_v37 = vmul.f32 %v7634_v23, %v7634_v23 }
 0xc89   : > { %v3858_v46 = vpop.xlane.xlu0 %3857  ;;  %v3856_v24 = vpop.xlane.xlu1 %3855 }
 0xc8a   : > { %v7643_v59 = vmul.f32 %v7614_v31, %v3902_v38  ;;  %v7646_v11 = vmul.f32 %v7614_v31, %v3901_v30  ;;  %v3884_v40 = vmul.f32 0.03125, %v3858_v46  ;;  %v3883_v4 = vmul.f32 0.03125, %v3856_v24 }
 0xc8c   : > { %v3900_v63 = vsub.f32 %v7531_v49, %v3884_v40  ;;  %v3899_v17 = vsub.f32 %v7533_v8, %v3883_v4  ;;  %3948 = vadd.xlane.f32.xlu0 %v3931_v37  ;;  %v3936_v39 = vmul.f32 %v7646_v11, %v7646_v11  ;;  %v3937_v7 = vmul.f32 %v7643_v59, %v7643_v59 }
 0xc8d   : > { %v3870_v42 = vpop.xlane.xlu0 %3869  ;;  %v3868_v1 = vpop.xlane.xlu1 %3867 }
 0xc8e   : > { %v7655_v10 = vmul.f32 %v7614_v31, %v3900_v63  ;;  %v7658_v32 = vmul.f32 %v7614_v31, %v3899_v17  ;;  %v3890_v45 = vmul.f32 0.03125, %v3870_v42  ;;  %v3889_v55 = vmul.f32 0.03125, %v3868_v1  ;;  %3958 = vadd.xlane.f32.xlu1 %v3936_v39 }
 0xc90   : > { %v3906_v49 = vsub.f32 %v7549_v34, %v3890_v45  ;;  %v3905_v8 = vsub.f32 %v7551_v27, %v3889_v55  ;;  %3960 = vadd.xlane.f32.xlu0 %v3937_v7  ;;  %v3934_v53 = vmul.f32 %v7658_v32, %v7658_v32  ;;  %v3935_v47 = vmul.f32 %v7655_v10, %v7655_v10 }
 0xc91   : > { %v3866_v36 = vpop.xlane.xlu0 %3865  ;;  %v3864_v35 = vpop.xlane.xlu1 %3863 }
 0xc92   : > { %v7667_v19 = vmul.f32 %v7614_v31, %v3906_v49  ;;  %v7670_v48 = vmul.f32 %v7614_v31, %v3905_v8  ;;  %v3888_v22 = vmul.f32 0.03125, %v3866_v36  ;;  %v3887_v3 = vmul.f32 0.03125, %v3864_v35  ;;  %3954 = vadd.xlane.f32.xlu1 %v3934_v53  ;;  %v7716_v49 = vld [vmem:[%s7857_s8] ss:$0 sm:$0xff] }
 0xc94   : > { %v3904_v34 = vsub.f32 %v7569_v57, %v3888_v22  ;;  %v3903_v27 = vsub.f32 %v7571_v41, %v3887_v3  ;;  %3956 = vadd.xlane.f32.xlu0 %v3935_v47  ;;  %v3940_v33 = vmul.f32 %v7670_v48, %v7670_v48  ;;  %v3941_v13 = vmul.f32 %v7667_v19, %v7667_v19  ;;  %v7724_v47 = vld [vmem:[%s7858_s9] ss:$0 sm:$0xff] }
 0xc95   : > { %v3874_v44 = vpop.xlane.xlu0 %3873  ;;  %v3872_v56 = vpop.xlane.xlu1 %3871 }
 0xc96   : > { %v7679_v6 = vmul.f32 %v7614_v31, %v3904_v34  ;;  %v7682_v9 = vmul.f32 %v7614_v31, %v3903_v27  ;;  %v3892_v61 = vmul.f32 0.03125, %v3874_v44  ;;  %v3891_v50 = vmul.f32 0.03125, %v3872_v56  ;;  %3966 = vadd.xlane.f32.xlu1 %v3940_v33 }
 0xc98   : > { %v3908_v57 = vsub.f32 %v7591_v62, %v3892_v61  ;;  %v3907_v41 = vsub.f32 %v7589_v21, %v3891_v50  ;;  %3968 = vadd.xlane.f32.xlu0 %v3941_v13  ;;  %v3938_v26 = vmul.f32 %v7682_v9, %v7682_v9  ;;  %v3939_v60 = vmul.f32 %v7679_v6, %v7679_v6 }
 0xc99   : > { %v3878_v18 = vpop.xlane.xlu0 %3877  ;;  %v3876_v58 = vpop.xlane.xlu1 %3875 }
 0xc9a   : > { %v7691_v52 = vmul.f32 %v7614_v31, %v3908_v57  ;;  %v7694_v54 = vmul.f32 %v7614_v31, %v3907_v41  ;;  %v3894_v28 = vmul.f32 0.03125, %v3878_v18  ;;  %v3893_v43 = vmul.f32 0.03125, %v3876_v58  ;;  %3962 = vadd.xlane.f32.xlu1 %v3938_v26 }
 0xc9c   : > { %v3910_v21 = vsub.f32 %v7608_v51, %v3894_v28  ;;  %v3909_v62 = vsub.f32 %v7606_v20, %v3893_v43  ;;  %3964 = vadd.xlane.f32.xlu0 %v3939_v60  ;;  %v3942_v29 = vmul.f32 %v7694_v54, %v7694_v54  ;;  %v3943_v0 = vmul.f32 %v7691_v52, %v7691_v52 }
 0xc9e   : > { %v7701_v14 = vmul.f32 %v7614_v31, %v3910_v21  ;;  %v7704_v5 = vmul.f32 %v7614_v31, %v3909_v62  ;;  %3970 = vadd.xlane.f32.xlu1 %v3942_v29 }
 0xca0   : > { %3972 = vadd.xlane.f32.xlu0 %v3943_v0  ;;  %v3944_v51 = vmul.f32 %v7704_v5, %v7704_v5  ;;  %v3945_v20 = vmul.f32 %v7701_v14, %v7701_v14 }
 0xca2   : > { %3974 = vadd.xlane.f32.xlu1 %v3944_v51 }
 0xca4   : > { %3976 = vadd.xlane.f32.xlu0 %v3945_v20 }
 0xd09   : > { %v3951_v15 = vpop.xlane.xlu1 %3950 }
 0xd0a   : > { %v3980_v12 = vmul.f32 0.03125, %v3951_v15 }
 0xd0c   : > { %v3996_v38 = vadd.f32 1e-05, %v3980_v12 }
 0xd0d   : > { %v3947_v30 = vpop.xlane.xlu1 %3946 }
 0xd0e   : > { %5234 = vrsqrt.f32 %v3996_v38  ;;  %v3978_v31 = vmul.f32 0.03125, %v3947_v30 }
 0xd10   : > { %v3994_v46 = vadd.f32 1e-05, %v3978_v31 }
 0xd11   : > { %v3953_v24 = vpop.xlane.xlu0 %3952 }
 0xd12   : > { %5236 = vrsqrt.f32 %v3994_v46  ;;  %v3981_v37 = vmul.f32 0.03125, %v3953_v24 }
 0xd14   : > { %v3997_v40 = vadd.f32 1e-05, %v3981_v37 }
 0xd15   : > { %v3949_v4 = vpop.xlane.xlu0 %3948 }
 0xd16   : > { %5238 = vrsqrt.f32 %v3997_v40  ;;  %v3979_v63 = vmul.f32 0.03125, %v3949_v4 }
 0xd17   : > { %v3959_v17 = vpop.xlane.xlu1 %3958 }
 0xd18   : > { %v3995_v39 = vadd.f32 1e-05, %v3979_v63  ;;  %v3984_v42 = vmul.f32 0.03125, %v3959_v17 }
 0xd19   : > { %v3961_v1 = vpop.xlane.xlu0 %3960 }
 0xd1a   : > { %5240 = vrsqrt.f32 %v3995_v39  ;;  %v4000_v7 = vadd.f32 1e-05, %v3984_v42  ;;  %v3985_v45 = vmul.f32 0.03125, %v3961_v1 }
 0xd1b   : > { %v5235_v55 = vpop.eup %5234  ;;  %v3955_v8 = vpop.xlane.xlu1 %3954 }
 0xd1c   : > { %v4028_v53 = vmul.f32 %v5235_v55, %v7618_v16  ;;  %5242 = vrsqrt.f32 %v4000_v7  ;;  %v4001_v36 = vadd.f32 1e-05, %v3985_v45  ;;  %v3982_v35 = vmul.f32 0.03125, %v3955_v8 }
 0xd1d   : > { %v3957_v22 = vpop.xlane.xlu0 %3956 }
 0xd1e   : > { %v4051_v3 = vmul.f32 %v7716_v49, %v4028_v53  ;;  %5244 = vrsqrt.f32 %v4001_v36  ;;  %v3998_v34 = vadd.f32 1e-05, %v3982_v35  ;;  %v3983_v27 = vmul.f32 0.03125, %v3957_v22 }
 0xd1f   : > { %v5237_v33 = vpop.eup %5236  ;;  %v3967_v44 = vpop.xlane.xlu1 %3966 }
 0xd20   : > { %v4074_v56 = vadd.f32 %v7724_v47, %v4051_v3  ;;  %v4026_v16 = vmul.f32 %v5237_v33, %v7624_v25  ;;  %5246 = vrsqrt.f32 %v3998_v34  ;;  %v3999_v13 = vadd.f32 1e-05, %v3983_v27 }
 0xd21   : > { %v3988_v61 = vmul.f32 0.03125, %v3967_v44  ;;  %v3969_v50 = vpop.xlane.xlu0 %3968 }
 0xd22   : > { %4090 = vst [vmem:[%s7729_s3 + $0x10] sm:$0xff] %v4074_v56  ;;  %v4049_v57 = vmul.f32 %v7716_v49, %v4026_v16  ;;  %5248 = vrsqrt.f32 %v3999_v13  ;;  %v3989_v41 = vmul.f32 0.03125, %v3969_v50 }
 0xd23   : > { %v5239_v26 = vpop.eup %5238  ;;  %v4004_v18 = vadd.f32 1e-05, %v3988_v61  ;;  %v3963_v58 = vpop.xlane.xlu1 %3962 }
 0xd24   : > { %v4072_v60 = vadd.f32 %v7724_v47, %v4049_v57  ;;  %v4029_v25 = vmul.f32 %v5239_v26, %v7630_v2  ;;  %v4005_v28 = vadd.f32 1e-05, %v3989_v41  ;;  %v3986_v43 = vmul.f32 0.03125, %v3963_v58 }
 0xd25   : > { %5250 = vrsqrt.f32 %v4004_v18  ;;  %v3965_v21 = vpop.xlane.xlu0 %3964 }
 0xd26   : > { %4088 = vst [vmem:[%s7729_s3] sm:$0xff] %v4072_v60  ;;  %v4052_v62 = vmul.f32 %v7716_v49, %v4029_v25  ;;  %5252 = vrsqrt.f32 %v4005_v28  ;;  %v4002_v29 = vadd.f32 1e-05, %v3986_v43  ;;  %v3987_v0 = vmul.f32 0.03125, %v3965_v21 }
 0xd27   : > { %v5241_v51 = vpop.eup %5240  ;;  %v3971_v20 = vpop.xlane.xlu1 %3970 }
 0xd28   : > { %v4075_v15 = vadd.f32 %v7724_v47, %v4052_v62  ;;  %v4027_v12 = vmul.f32 %v5241_v51, %v7634_v23  ;;  %5254 = vrsqrt.f32 %v4002_v29  ;;  %v4003_v38 = vadd.f32 1e-05, %v3987_v0 }
 0xd29   : > { %v5243_v2 = vpop.eup %5242  ;;  %v3990_v30 = vmul.f32 0.03125, %v3971_v20  ;;  %v3973_v31 = vpop.xlane.xlu0 %3972 }
 0xd2a   : > { %4091 = vst [vmem:[%s7729_s3 + $0x18] sm:$0xff] %v4075_v15  ;;  %v4050_v46 = vmul.f32 %v7716_v49, %v4027_v12  ;;  %v4032_v24 = vmul.f32 %v5243_v2, %v7646_v11  ;;  %5256 = vrsqrt.f32 %v4003_v38  ;;  %v3991_v37 = vmul.f32 0.03125, %v3973_v31 }
 0xd2b   : > { %v5245_v40 = vpop.eup %5244  ;;  %v4006_v4 = vadd.f32 1e-05, %v3990_v30  ;;  %v3975_v63 = vpop.xlane.xlu1 %3974 }
 0xd2c   : > { %v4073_v17 = vadd.f32 %v7724_v47, %v4050_v46  ;;  %v4055_v23 = vmul.f32 %v7716_v49, %v4032_v24  ;;  %v4033_v39 = vmul.f32 %v5245_v40, %v7643_v59  ;;  %v4007_v42 = vadd.f32 1e-05, %v3991_v37 }
 0xd2d   : > { %v5247_v1 = vpop.eup %5246  ;;  %5258 = vrsqrt.f32 %v4006_v4  ;;  %v3992_v7 = vmul.f32 0.03125, %v3975_v63  ;;  %v3977_v45 = vpop.xlane.xlu0 %3976 }
 0xd2e   : > { %4089 = vst [vmem:[%s7729_s3 + $0x8] sm:$0xff] %v4073_v17  ;;  %v4078_v11 = vadd.f32 %v7724_v47, %v4055_v23  ;;  %v4056_v55 = vmul.f32 %v7716_v49, %v4033_v39  ;;  %v4030_v8 = vmul.f32 %v5247_v1, %v7658_v32  ;;  %5260 = vrsqrt.f32 %v4007_v42 }
 0xd2f   : > { %v5249_v53 = vpop.eup %5248  ;;  %v4008_v36 = vadd.f32 1e-05, %v3992_v7  ;;  %v3993_v35 = vmul.f32 0.03125, %v3977_v45 }
 0xd30   : > { %4094 = vst [vmem:[%s7729_s3 + $0x30] sm:$0xff] %v4078_v11  ;;  %v4079_v59 = vadd.f32 %v7724_v47, %v4056_v55  ;;  %v4053_v22 = vmul.f32 %v7716_v49, %v4030_v8  ;;  %v4031_v3 = vmul.f32 %v5249_v53, %v7655_v10 }
 0xd31   : > { %5262 = vrsqrt.f32 %v4008_v36  ;;  %v4009_v34 = vadd.f32 1e-05, %v3993_v35 }
 0xd32   : > { %v5251_v27 = vpop.eup %5250  ;;  %4095 = vst [vmem:[%s7729_s3 + $0x38] sm:$0xff] %v4079_v59  ;;  %v4076_v33 = vadd.f32 %v7724_v47, %v4053_v22  ;;  %v4054_v32 = vmul.f32 %v7716_v49, %v4031_v3 }
 0xd33   : > { %v5253_v44 = vpop.eup %5252  ;;  %v4036_v56 = vmul.f32 %v5251_v27, %v7670_v48  ;;  %5264 = vrsqrt.f32 %v4009_v34 }
 0xd34   : > { %4092 = vst [vmem:[%s7729_s3 + $0x20] sm:$0xff] %v4076_v33  ;;  %v4077_v16 = vadd.f32 %v7724_v47, %v4054_v32  ;;  %v4037_v13 = vmul.f32 %v5253_v44, %v7667_v19 }
 0xd35   : > { %v5255_v10 = vpop.eup %5254  ;;  %v4059_v61 = vmul.f32 %v7716_v49, %v4036_v56 }
 0xd36   : > { %4093 = vst [vmem:[%s7729_s3 + $0x28] sm:$0xff] %v4077_v16  ;;  %v4060_v50 = vmul.f32 %v7716_v49, %v4037_v13  ;;  %v4034_v57 = vmul.f32 %v5255_v10, %v7682_v9 }
 0xd37   : > { %v5257_v41 = vpop.eup %5256  ;;  %v4082_v26 = vadd.f32 %v7724_v47, %v4059_v61 }
 0xd38   : > { %v4083_v48 = vadd.f32 %v7724_v47, %v4060_v50  ;;  %v4057_v18 = vmul.f32 %v7716_v49, %v4034_v57  ;;  %v4035_v58 = vmul.f32 %v5257_v41, %v7679_v6 }
 0xd39   : > { %4098 = vst [vmem:[%s7729_s3 + $0x50] sm:$0xff] %v4082_v26 }
 0xd3a   : > { %v5259_v19 = vpop.eup %5258  ;;  %4099 = vst [vmem:[%s7729_s3 + $0x58] sm:$0xff] %v4083_v48  ;;  %v4080_v60 = vadd.f32 %v7724_v47, %v4057_v18  ;;  %v4058_v25 = vmul.f32 %v7716_v49, %v4035_v58 }
 0xd3b   : > { %v5261_v28 = vpop.eup %5260  ;;  %v4038_v9 = vmul.f32 %v5259_v19, %v7694_v54 }
 0xd3c   : > { %4096 = vst [vmem:[%s7729_s3 + $0x40] sm:$0xff] %v4080_v60  ;;  %v4081_v43 = vadd.f32 %v7724_v47, %v4058_v25  ;;  %v4039_v21 = vmul.f32 %v5261_v28, %v7691_v52 }
 0xd3d   : > { %v4061_v6 = vmul.f32 %v7716_v49, %v4038_v9 }
 0xd3e   : > { %v5263_v62 = vpop.eup %5262  ;;  %4097 = vst [vmem:[%s7729_s3 + $0x48] sm:$0xff] %v4081_v43  ;;  %v4062_v29 = vmul.f32 %v7716_v49, %v4039_v21 }
 0xd3f   : > { %v4084_v0 = vadd.f32 %v7724_v47, %v4061_v6  ;;  %v4040_v51 = vmul.f32 %v5263_v62, %v7704_v5 }
 0xd40   : > { %v5265_v54 = vpop.eup %5264  ;;  %v4085_v20 = vadd.f32 %v7724_v47, %v4062_v29 }
 0xd41   : > { %4100 = vst [vmem:[%s7729_s3 + $0x60] sm:$0xff] %v4084_v0  ;;  %v4063_v52 = vmul.f32 %v7716_v49, %v4040_v51  ;;  %v4041_v15 = vmul.f32 %v5265_v54, %v7701_v14 }
 0xd42   : > { %4101 = vst [vmem:[%s7729_s3 + $0x68] sm:$0xff] %v4085_v20 }
 0xd43   : > { %v4086_v12 = vadd.f32 %v7724_v47, %v4063_v52  ;;  %v4064_v38 = vmul.f32 %v7716_v49, %v4041_v15 }
 0xd45   : > { %4102 = vst [vmem:[%s7729_s3 + $0x70] sm:$0xff] %v4086_v12  ;;  %v4087_v14 = vadd.f32 %v7724_v47, %v4064_v38 }
 0xd47   : > { %4103 = vst [vmem:[%s7729_s3 + $0x78] sm:$0xff] %v4087_v14 }
 0xd48   : > { %5333 = shalt.err (!%p5330_p4)
}
 0xd49   : > { %s5334_s22 = scalar_lea.hbm %s7793_s11, 2048  ;;  %s5338_s15 = scalar_lea.hbm %s7859_s10, 4096 }
 0xd4a   : > { %p5335_p9 = scmp.ne.s32.totalorder %s7793_s11, %s5334_s22  ;;  %p5339_p3 = scmp.lt.s32.totalorder %s7793_s11, %s7859_s10 }
 0xd4b   : > { %p5340_p7 = scmp.lt.s32.totalorder %s5338_s15, %s5334_s22 }
 0xd4c   : > { %p5336_p0 = pnand %p5335_p9, %p8120_p10 }
 0xd4d   : > { %p5341_p8 = por %p5340_p7, %p5339_p3 }
 0xd4e   : > { %p5337_p2 = pneg %p5336_p0 }
 0xd50   : > { %p5342_p12 = pnand %p5341_p8, %p5337_p2 }
 0xd52   : > { %5345 = shalt.err (!%p5342_p12)
}
 0xd53   : > { %s5417_s25 = smov 128   ;;  %s5418_s30 = smov 8  }
 0xd54   : > { %4816 = dma.vmem_to_hbm [thread:$0]  (%p8120_p10), %s7795_s28, 2048, %s7793_s11, %s7802_s19, %s5417_s25, %s5417_s25, %s5418_s30  }
 0xd55 PF: > { %s8121_s16 = sld [smem:[#allocation16_spill]]  ;;  %s4133_s23 = sand.u32 1, %s5384_s13  }
 0xd56   : > { %s4134_s26 = scalar_lea.sflag [#allocation5], %s4133_s23 }
 0xd5b   : > { %p8122_p1 = scmp.ne.s32.totalorder %s8121_s16, 0 }
 0xd5d   : > { %p4826_p5 = pnand %p4226_p11, %p8122_p1 }
 0xd5f   : > { %p4827_p6 = pneg %p4826_p5 }
 0xd61   : > { %5379 = dma.done.wait (%p4827_p6), %s4134_s26, 2048  }
 0xd62   : > { %5381 = vsyncadd (%p4827_p6), %s4134_s26, 4294965248  ;;  %s8123_s18 = sld [smem:[#allocation13_spill]]  ;;  %s8127_s13 = smov %s5388_s14 }
 0xd63   : > { %s8124_s27 = sld [smem:[#allocation12_spill]]  ;;  %s8129_s16 = smov %s5400_s17 }
 0xd64   : > { %s8125_s15 = sld [smem:[#allocation15_spill]] }
 0xd65   : > { %s8126_s12 = sld [smem:[#allocation14_spill]] }
 0xd68   : > { %p22_p10 = scmp.ge.s32.totalorder %s8123_s18, 4  }
 0xd69   : > { %s8128_s14 = smov %s8124_s27 }
 0xd6a   :  { %24 = sbr.rel (!%p22_p10) target bundleno = 8 (0x8), region = 153 }
 0xd6b   : > { %s8130_s17 = smov %s8126_s12 }
 0xd6f   :  { %4139 = vsyncpa [#allocation4], 1 }
 0xd70   :  { %4141 = vsyncpa [#allocation4 + $0x1], 1 }
 0xd71   :  { %4142 = vsyncpa [#allocation7], 1 }
 0xd72   :  { %4143 = vsyncpa [#allocation5], 1 }
 0xd73   :  { %4145 = vsyncpa [#allocation5 + $0x1], 1 }

</bundles_post_ra>
